<compile_context>
chip_gen: v6e
topology: v6e:2x2x1
jax: 0.10.0
libtpu: 0.0.40
codegen_flags: <defaults>
</compile_context>

<pallas_src>
import jax
import jax.numpy as jnp
from jax.experimental import pallas as pl
from jax.experimental.pallas import tpu as pltpu

# ------------------------- config (matches module __init__) -------------------
CIN = 2048           # fixed by nn.Conv2d(2048, head_channel, 1, 1, 0)
HEAD_CHANNEL = 32    # cfg['head_channel']
NUM_LAYERS = 2       # cfg['num_layers']
HC2 = HEAD_CHANNEL // 2
HC4 = HEAD_CHANNEL // 4
OUT_C = 16
LEAKY_SLOPE = 0.01   # PyTorch LeakyReLU default
BN_EPS = 1e-5        # PyTorch BatchNorm2d default


def _round_up(x, m):
    return ((x + m - 1) // m) * m


# ------------------------------- Pallas kernel --------------------------------
def multihead_kernel(x_ref, w0_ref, b0_ref, wl_ref, bl_ref,
                     wc1_ref, bc1_ref, wc2_ref, bc2_ref, wc3_ref, bc3_ref,
                     o_ref):
    # x_ref: (nb, CIN, T) float32, pixels on the lane axis.  Cast to bf16 here
    # (not in the wrapper) so x is read from HBM exactly once.
    nb = x_ref.shape[0]
    for n in range(nb):                        # static unroll over block samples
        xb = x_ref[n].astype(jnp.bfloat16)     # (CIN, T)

        # Stem: Conv2d(2048 -> hc) + ReLU    (bf16 x bf16 MXU, f32 accumulate)
        h = jnp.dot(w0_ref[...], xb, preferred_element_type=jnp.float32)
        h = jnp.maximum(h + b0_ref[...], 0.0)                    # (hc, T) f32

        # Hidden layers: Conv2d(hc -> hc) + folded BN + LeakyReLU (static unroll)
        for l in range(NUM_LAYERS):
            z = jnp.dot(wl_ref[l], h, preferred_element_type=jnp.float32) + bl_ref[l]
            h = jnp.where(z > 0.0, z, LEAKY_SLOPE * z)

        # Classifier: (conv + BN + ReLU) x2, final conv
        c = jnp.dot(wc1_ref[...], h, preferred_element_type=jnp.float32) + bc1_ref[...]
        c = jnp.maximum(c, 0.0)
        c = jnp.dot(wc2_ref[...], c, preferred_element_type=jnp.float32) + bc2_ref[...]
        c = jnp.maximum(c, 0.0)
        out = jnp.dot(wc3_ref[...], c, preferred_element_type=jnp.float32) + bc3_ref[...]
        o_ref[n] = out.astype(o_ref.dtype)                       # (16, T)


# --------------------------------- wrapper -------------------------------------
def multihead_pallas(x_nchw, params, *, tile_hw=2048, vmem_limit_bytes=56 << 20):
    """x_nchw: (N, 2048, H, W) float32.  Returns (N, 16, H, W) float32.

    tile_hw: pixel-tile width (lane axis).  f32 x-block at 2048 px = 16 MiB
    (32 MiB double-buffered): fine on v5e/v6e/v7x.  v5e/v6e may raise to 4096
    (set vmem_limit_bytes ~72 MiB); keep <= 2048 on v7x (64 MiB/TC budget).
    """
    N, C, H, W = x_nchw.shape
    assert C == CIN
    HW = H * W
    HW128 = _round_up(HW, 128)
    tile_hw = _round_up(tile_hw, 128)

    # No astype / pad passes: x goes to the kernel as-is (NCHW view, f32).
    x = x_nchw.reshape(N, CIN, HW)

    if HW128 >= tile_hw:
        # Large feature map: tile the pixel axis; ragged tail handled by the
        # cdiv grid (Pallas clamps the last block; OOB lanes never written).
        tile = tile_hw
        nb = 1
    else:
        # Small feature map: one block covers the full pixel extent (legal even
        # when HW isn't a lane multiple) and several samples ride per grid step
        # so DMA chunks stay large.
        tile = HW
        nb = min(N, max(1, tile_hw // HW128))
        # Keep >= 2 grid steps when possible so both v7x TensorCores get work.
        nb = min(nb, max(1, (N + 1) // 2))

    grid = (pl.cdiv(N, nb), pl.cdiv(HW, tile))

    w0, b0, wl, bl, wc1, bc1, wc2, bc2, wc3, bc3 = params
    weights = (w0, b0, wl, bl, wc1, bc1, wc2, bc2, wc3, bc3)
    full = lambda nd: (lambda b, j: (0,) * nd)   # weights: whole-array blocks

    # Advisory cost estimate so XLA can overlap the producer of x with us.
    flops_per_px = 2 * (CIN * HEAD_CHANNEL
                        + NUM_LAYERS * HEAD_CHANNEL * HEAD_CHANNEL
                        + HEAD_CHANNEL * HC2 + HC2 * HC4 + HC4 * OUT_C)
    bytes_accessed = (int(x.size) * x.dtype.itemsize
                      + N * OUT_C * HW * 4
                      + sum(int(p.size) * p.dtype.itemsize for p in weights))

    out = pl.pallas_call(
        multihead_kernel,
        out_shape=jax.ShapeDtypeStruct((N, OUT_C, HW), jnp.float32),
        grid_spec=pltpu.PrefetchScalarGridSpec(
            num_scalar_prefetch=0,
            grid=grid,
            in_specs=[
                pl.BlockSpec((nb, CIN, tile), lambda b, j: (b, 0, j)),   # x
                pl.BlockSpec(w0.shape, full(2)),                         # stem W (bf16)
                pl.BlockSpec(b0.shape, full(2)),                         # stem b
                pl.BlockSpec(wl.shape, full(3)),                         # stacked layer W
                pl.BlockSpec(bl.shape, full(3)),                         # stacked layer b
                pl.BlockSpec(wc1.shape, full(2)),
                pl.BlockSpec(bc1.shape, full(2)),
                pl.BlockSpec(wc2.shape, full(2)),
                pl.BlockSpec(bc2.shape, full(2)),
                pl.BlockSpec(wc3.shape, full(2)),
                pl.BlockSpec(bc3.shape, full(2)),
            ],
            out_specs=pl.BlockSpec((nb, OUT_C, tile), lambda b, j: (b, 0, j)),
        ),
        compiler_params=pltpu.CompilerParams(
            dimension_semantics=("parallel", "parallel"),
            vmem_limit_bytes=vmem_limit_bytes),
        cost_estimate=pl.CostEstimate(
            flops=int(flops_per_px) * N * HW,
            transcendentals=0,
            bytes_accessed=int(bytes_accessed)),
    )(x, *weights)

    return out.reshape(N, OUT_C, H, W)


# --------------------------- deterministic parameters --------------------------
def _fold_bn(w, b, gamma, beta, mean, var):
    """Fold eval-mode BatchNorm into the preceding 1x1 conv (W: [Cout, Cin])."""
    scale = gamma / jnp.sqrt(var + BN_EPS)                # (Cout,)
    return w * scale[:, None], b * scale + (beta - mean * scale)


def make_params(key):
    ks = jax.random.split(key, 32)
    k = iter(ks)

    def conv_w(cin, cout):
        return jax.random.normal(next(k), (cout, cin), jnp.float32) * (1.0 / jnp.sqrt(cin))

    def conv_b(cout):
        return jax.random.normal(next(k), (cout,), jnp.float32) * 0.05

    def bn(c):
        gamma = 1.0 + 0.1 * jax.random.normal(next(k), (c,), jnp.float32)
        beta = 0.1 * jax.random.normal(next(k), (c,), jnp.float32)
        mean = 0.1 * jax.random.normal(next(k), (c,), jnp.float32)
        var = 0.5 + jax.random.uniform(next(k), (c,), jnp.float32)
        return gamma, beta, mean, var

    # stem conv (no BN) — stored bf16 (matmul against in-kernel bf16 x, f32 acc)
    w0 = conv_w(CIN, HEAD_CHANNEL)
    b0 = conv_b(HEAD_CHANNEL)

    # hidden layers: conv + BN folded (kept f32; tiny weights, no HBM impact)
    wl_list, bl_list = [], []
    for _ in range(NUM_LAYERS):
        w, b = _fold_bn(conv_w(HEAD_CHANNEL, HEAD_CHANNEL), conv_b(HEAD_CHANNEL),
                        *bn(HEAD_CHANNEL))
        wl_list.append(w)
        bl_list.append(b)
    wl = jnp.stack(wl_list)                 # (L, hc, hc)
    bl = jnp.stack(bl_list)[:, :, None]     # (L, hc, 1)

    # classifier
    wc1, bc1 = _fold_bn(conv_w(HEAD_CHANNEL, HC2), conv_b(HC2), *bn(HC2))
    wc2, bc2 = _fold_bn(conv_w(HC2, HC4), conv_b(HC4), *bn(HC4))
    wc3, bc3 = conv_w(HC4, OUT_C), conv_b(OUT_C)

    return (w0.astype(jnp.bfloat16), b0[:, None], wl, bl,
            wc1, bc1[:, None], wc2, bc2[:, None], wc3, bc3[:, None])


# ------------------------------ reference (pure JAX) ----------------------------
def multihead_ref(x_nchw, params):
    w0, b0, wl, bl, wc1, bc1, wc2, bc2, wc3, bc3 = params
    N, C, H, W = x_nchw.shape
    # Match the kernel's in-kernel bf16 quantization of x / stem weight (f32 acc).
    x = x_nchw.reshape(N, C, H * W).astype(jnp.bfloat16).astype(jnp.float32)
    w0 = w0.astype(jnp.float32)
    h = jnp.maximum(jnp.einsum('oc,ncp->nop', w0, x) + b0[None], 0.0)
    for l in range(NUM_LAYERS):
        z = jnp.einsum('oc,ncp->nop', wl[l], h) + bl[l][None]
        h = jnp.where(z > 0.0, z, LEAKY_SLOPE * z)
    c = jnp.maximum(jnp.einsum('oc,ncp->nop', wc1, h) + bc1[None], 0.0)
    c = jnp.maximum(jnp.einsum('oc,ncp->nop', wc2, c) + bc2[None], 0.0)
    out = jnp.einsum('oc,ncp->nop', wc3, c) + bc3[None]
    return out.reshape(N, OUT_C, H, W)


# ------------------------------------ main --------------------------------------
if __name__ == "__main__":
    key = jax.random.PRNGKey(0)
    kx, kx2, kp = jax.random.split(key, 3)
    params = make_params(kp)

    # Case 1: small feature map (HW=100, not a lane multiple) — small-HW path:
    # full-extent pixel block, 2 samples per grid step, ragged batch tail.
    N, H, W = 3, 10, 10
    x = jax.random.normal(kx, (N, CIN, H, W), jnp.float32)   # NCHW like PyTorch
    ref = multihead_ref(x, params)

    out = jax.block_until_ready(multihead_pallas(x, params))
    assert out.shape == (N, OUT_C, H, W)
    err1 = float(jnp.max(jnp.abs(out - ref)))
    assert jnp.allclose(out, ref, rtol=1e-2, atol=1e-2), f"case1 mismatch: {err1}"

    # Case 2: force the pixel-tiled path with a ragged (OOB-clamped) tail block.
    out2 = jax.block_until_ready(multihead_pallas(x, params, tile_hw=128))
    err2 = float(jnp.max(jnp.abs(out2 - ref)))
    assert jnp.allclose(out2, ref, rtol=1e-2, atol=1e-2), f"case2 mismatch: {err2}"

    # Case 3: HW a multiple of the tile -> multiple lane-dense pixel blocks.
    N3, H3, W3 = 2, 16, 16
    x3 = jax.random.normal(kx2, (N3, CIN, H3, W3), jnp.float32)
    ref3 = multihead_ref(x3, params)
    out3 = jax.block_until_ready(multihead_pallas(x3, params, tile_hw=128))
    err3 = float(jnp.max(jnp.abs(out3 - ref3)))
    assert jnp.allclose(out3, ref3, rtol=1e-2, atol=1e-2), f"case3 mismatch: {err3}"

    print("KERNEL_OK")
</pallas_src>

<mosaic_0001>
module attributes {stable_mosaic.version = 11 : i64} {
  func.func @multihead_kernel(%arg0: i32, %arg1: i32, %arg2: memref<2x2048x100xf32, #tpu.memory_space<vmem>>, %arg3: memref<32x2048xbf16, #tpu.memory_space<vmem>>, %arg4: memref<32x1xf32, #tpu.memory_space<vmem>>, %arg5: memref<2x32x32xf32, #tpu.memory_space<vmem>>, %arg6: memref<2x32x1xf32, #tpu.memory_space<vmem>>, %arg7: memref<16x32xf32, #tpu.memory_space<vmem>>, %arg8: memref<16x1xf32, #tpu.memory_space<vmem>>, %arg9: memref<8x16xf32, #tpu.memory_space<vmem>>, %arg10: memref<8x1xf32, #tpu.memory_space<vmem>>, %arg11: memref<16x8xf32, #tpu.memory_space<vmem>>, %arg12: memref<16x1xf32, #tpu.memory_space<vmem>>, %arg13: memref<2x16x100xf32, #tpu.memory_space<vmem>>) attributes {dimension_semantics = [#tpu.dimension_semantics<parallel>, #tpu.dimension_semantics<parallel>], iteration_bounds = array<i64: 2, 1>, scalar_prefetch = 0 : i64, scratch_operands = 0 : i64, tpu.core_type = #tpu.core_type<tc>, window_params = [{transform_indices = @transform_0, window_bounds = array<i64: 2, 2048, 100>}, {pipeline_mode = #tpu.pipeline_mode<synchronous>, transform_indices = @transform_1, window_bounds = array<i64: 32, 2048>}, {pipeline_mode = #tpu.pipeline_mode<synchronous>, transform_indices = @transform_2, window_bounds = array<i64: 32, 1>}, {pipeline_mode = #tpu.pipeline_mode<synchronous>, transform_indices = @transform_3, window_bounds = array<i64: 2, 32, 32>}, {pipeline_mode = #tpu.pipeline_mode<synchronous>, transform_indices = @transform_4, window_bounds = array<i64: 2, 32, 1>}, {pipeline_mode = #tpu.pipeline_mode<synchronous>, transform_indices = @transform_5, window_bounds = array<i64: 16, 32>}, {pipeline_mode = #tpu.pipeline_mode<synchronous>, transform_indices = @transform_6, window_bounds = array<i64: 16, 1>}, {pipeline_mode = #tpu.pipeline_mode<synchronous>, transform_indices = @transform_7, window_bounds = array<i64: 8, 16>}, {pipeline_mode = #tpu.pipeline_mode<synchronous>, transform_indices = @transform_8, window_bounds = array<i64: 8, 1>}, {pipeline_mode = #tpu.pipeline_mode<synchronous>, transform_indices = @transform_9, window_bounds = array<i64: 16, 8>}, {pipeline_mode = #tpu.pipeline_mode<synchronous>, transform_indices = @transform_10, window_bounds = array<i64: 16, 1>}, {transform_indices = @transform_11, window_bounds = array<i64: 2, 16, 100>}]} {
    %c0 = arith.constant 0 : index
    %c0_0 = arith.constant 0 : index
    %c0_1 = arith.constant 0 : index
    %0 = vector.load %arg2[%c0, %c0_0, %c0_1] : memref<2x2048x100xf32, #tpu.memory_space<vmem>>, vector<1x2048x100xf32>
    %1 = vector.shape_cast %0 : vector<1x2048x100xf32> to vector<2048x100xf32>
    %2 = arith.truncf %1 : vector<2048x100xf32> to vector<2048x100xbf16>
    %c0_2 = arith.constant 0 : index
    %c0_3 = arith.constant 0 : index
    %3 = vector.load %arg3[%c0_2, %c0_3] : memref<32x2048xbf16, #tpu.memory_space<vmem>>, vector<32x2048xbf16>
    %cst = arith.constant dense<0.000000e+00> : vector<32x100xf32>
    %4 = tpu.matmul %3, %2, %cst {dimension_numbers = #tpu.dot_dimension_numbers<[1], [0], [0], [1], [0, 0, 1, 1], [], []>} : vector<32x2048xbf16>, vector<2048x100xbf16>, vector<32x100xf32> -> vector<32x100xf32>
    %c0_4 = arith.constant 0 : index
    %c0_5 = arith.constant 0 : index
    %5 = vector.load %arg4[%c0_4, %c0_5] : memref<32x1xf32, #tpu.memory_space<vmem>>, vector<32x1xf32>
    %6 = vector.broadcast %5 : vector<32x1xf32> to vector<32x100xf32>
    %7 = arith.addf %4, %6 : vector<32x100xf32>
    %cst_6 = arith.constant 0.000000e+00 : f32
    %8 = vector.broadcast %cst_6 : f32 to vector<32x100xf32>
    %9 = arith.maximumf %7, %8 : vector<32x100xf32>
    %c0_7 = arith.constant 0 : index
    %c0_8 = arith.constant 0 : index
    %c0_9 = arith.constant 0 : index
    %10 = vector.load %arg5[%c0_7, %c0_8, %c0_9] : memref<2x32x32xf32, #tpu.memory_space<vmem>>, vector<1x32x32xf32>
    %11 = vector.shape_cast %10 : vector<1x32x32xf32> to vector<32x32xf32>
    %cst_10 = arith.constant dense<0.000000e+00> : vector<32x100xf32>
    %12 = tpu.matmul %11, %9, %cst_10 {dimension_numbers = #tpu.dot_dimension_numbers<[1], [0], [0], [1], [0, 0, 1, 1], [], []>} : vector<32x32xf32>, vector<32x100xf32>, vector<32x100xf32> -> vector<32x100xf32>
    %c0_11 = arith.constant 0 : index
    %c0_12 = arith.constant 0 : index
    %c0_13 = arith.constant 0 : index
    %13 = vector.load %arg6[%c0_11, %c0_12, %c0_13] : memref<2x32x1xf32, #tpu.memory_space<vmem>>, vector<1x32x1xf32>
    %14 = vector.shape_cast %13 : vector<1x32x1xf32> to vector<32x1xf32>
    %15 = vector.broadcast %14 : vector<32x1xf32> to vector<32x100xf32>
    %16 = arith.addf %12, %15 : vector<32x100xf32>
    %cst_14 = arith.constant 0.000000e+00 : f32
    %17 = vector.broadcast %cst_14 : f32 to vector<32x100xf32>
    %18 = arith.cmpf ogt, %16, %17 : vector<32x100xf32>
    %cst_15 = arith.constant 0.00999999977 : f32
    %19 = vector.broadcast %cst_15 : f32 to vector<32x100xf32>
    %20 = arith.mulf %19, %16 : vector<32x100xf32>
    %21 = arith.select %18, %16, %20 : vector<32x100xi1>, vector<32x100xf32>
    %c1 = arith.constant 1 : index
    %c0_16 = arith.constant 0 : index
    %c0_17 = arith.constant 0 : index
    %22 = vector.load %arg5[%c1, %c0_16, %c0_17] : memref<2x32x32xf32, #tpu.memory_space<vmem>>, vector<1x32x32xf32>
    %23 = vector.shape_cast %22 : vector<1x32x32xf32> to vector<32x32xf32>
    %cst_18 = arith.constant dense<0.000000e+00> : vector<32x100xf32>
    %24 = tpu.matmul %23, %21, %cst_18 {dimension_numbers = #tpu.dot_dimension_numbers<[1], [0], [0], [1], [0, 0, 1, 1], [], []>} : vector<32x32xf32>, vector<32x100xf32>, vector<32x100xf32> -> vector<32x100xf32>
    %c1_19 = arith.constant 1 : index
    %c0_20 = arith.constant 0 : index
    %c0_21 = arith.constant 0 : index
    %25 = vector.load %arg6[%c1_19, %c0_20, %c0_21] : memref<2x32x1xf32, #tpu.memory_space<vmem>>, vector<1x32x1xf32>
    %26 = vector.shape_cast %25 : vector<1x32x1xf32> to vector<32x1xf32>
    %27 = vector.broadcast %26 : vector<32x1xf32> to vector<32x100xf32>
    %28 = arith.addf %24, %27 : vector<32x100xf32>
    %cst_22 = arith.constant 0.000000e+00 : f32
    %29 = vector.broadcast %cst_22 : f32 to vector<32x100xf32>
    %30 = arith.cmpf ogt, %28, %29 : vector<32x100xf32>
    %cst_23 = arith.constant 0.00999999977 : f32
    %31 = vector.broadcast %cst_23 : f32 to vector<32x100xf32>
    %32 = arith.mulf %31, %28 : vector<32x100xf32>
    %33 = arith.select %30, %28, %32 : vector<32x100xi1>, vector<32x100xf32>
    %c0_24 = arith.constant 0 : index
    %c0_25 = arith.constant 0 : index
    %34 = vector.load %arg7[%c0_24, %c0_25] : memref<16x32xf32, #tpu.memory_space<vmem>>, vector<16x32xf32>
    %cst_26 = arith.constant dense<0.000000e+00> : vector<16x100xf32>
    %35 = tpu.matmul %34, %33, %cst_26 {dimension_numbers = #tpu.dot_dimension_numbers<[1], [0], [0], [1], [0, 0, 1, 1], [], []>} : vector<16x32xf32>, vector<32x100xf32>, vector<16x100xf32> -> vector<16x100xf32>
    %c0_27 = arith.constant 0 : index
    %c0_28 = arith.constant 0 : index
    %36 = vector.load %arg8[%c0_27, %c0_28] : memref<16x1xf32, #tpu.memory_space<vmem>>, vector<16x1xf32>
    %37 = vector.broadcast %36 : vector<16x1xf32> to vector<16x100xf32>
    %38 = arith.addf %35, %37 : vector<16x100xf32>
    %cst_29 = arith.constant 0.000000e+00 : f32
    %39 = vector.broadcast %cst_29 : f32 to vector<16x100xf32>
    %40 = arith.maximumf %38, %39 : vector<16x100xf32>
    %c0_30 = arith.constant 0 : index
    %c0_31 = arith.constant 0 : index
    %41 = vector.load %arg9[%c0_30, %c0_31] : memref<8x16xf32, #tpu.memory_space<vmem>>, vector<8x16xf32>
    %cst_32 = arith.constant dense<0.000000e+00> : vector<8x100xf32>
    %42 = tpu.matmul %41, %40, %cst_32 {dimension_numbers = #tpu.dot_dimension_numbers<[1], [0], [0], [1], [0, 0, 1, 1], [], []>} : vector<8x16xf32>, vector<16x100xf32>, vector<8x100xf32> -> vector<8x100xf32>
    %c0_33 = arith.constant 0 : index
    %c0_34 = arith.constant 0 : index
    %43 = vector.load %arg10[%c0_33, %c0_34] : memref<8x1xf32, #tpu.memory_space<vmem>>, vector<8x1xf32>
    %44 = vector.broadcast %43 : vector<8x1xf32> to vector<8x100xf32>
    %45 = arith.addf %42, %44 : vector<8x100xf32>
    %cst_35 = arith.constant 0.000000e+00 : f32
    %46 = vector.broadcast %cst_35 : f32 to vector<8x100xf32>
    %47 = arith.maximumf %45, %46 : vector<8x100xf32>
    %c0_36 = arith.constant 0 : index
    %c0_37 = arith.constant 0 : index
    %48 = vector.load %arg11[%c0_36, %c0_37] : memref<16x8xf32, #tpu.memory_space<vmem>>, vector<16x8xf32>
    %cst_38 = arith.constant dense<0.000000e+00> : vector<16x100xf32>
    %49 = tpu.matmul %48, %47, %cst_38 {dimension_numbers = #tpu.dot_dimension_numbers<[1], [0], [0], [1], [0, 0, 1, 1], [], []>} : vector<16x8xf32>, vector<8x100xf32>, vector<16x100xf32> -> vector<16x100xf32>
    %c0_39 = arith.constant 0 : index
    %c0_40 = arith.constant 0 : index
    %50 = vector.load %arg12[%c0_39, %c0_40] : memref<16x1xf32, #tpu.memory_space<vmem>>, vector<16x1xf32>
    %51 = vector.broadcast %50 : vector<16x1xf32> to vector<16x100xf32>
    %52 = arith.addf %49, %51 : vector<16x100xf32>
    %c0_41 = arith.constant 0 : index
    %c0_42 = arith.constant 0 : index
    %c0_43 = arith.constant 0 : index
    %53 = vector.load %arg13[%c0_41, %c0_42, %c0_43] : memref<2x16x100xf32, #tpu.memory_space<vmem>>, vector<1x16x100xf32>
    %54 = vector.shape_cast %53 : vector<1x16x100xf32> to vector<16x100xf32>
    %55 = vector.shape_cast %52 : vector<16x100xf32> to vector<1x16x100xf32>
    tpu.vector_store %arg13[%c0_41, %c0_42, %c0_43], %55 {strides = array<i32>} : memref<2x16x100xf32, #tpu.memory_space<vmem>>, vector<1x16x100xf32>,
    %c1_44 = arith.constant 1 : index
    %c0_45 = arith.constant 0 : index
    %c0_46 = arith.constant 0 : index
    %56 = vector.load %arg2[%c1_44, %c0_45, %c0_46] : memref<2x2048x100xf32, #tpu.memory_space<vmem>>, vector<1x2048x100xf32>
    %57 = vector.shape_cast %56 : vector<1x2048x100xf32> to vector<2048x100xf32>
    %58 = arith.truncf %57 : vector<2048x100xf32> to vector<2048x100xbf16>
    %c0_47 = arith.constant 0 : index
    %c0_48 = arith.constant 0 : index
    %59 = vector.load %arg3[%c0_47, %c0_48] : memref<32x2048xbf16, #tpu.memory_space<vmem>>, vector<32x2048xbf16>
    %cst_49 = arith.constant dense<0.000000e+00> : vector<32x100xf32>
    %60 = tpu.matmul %59, %58, %cst_49 {dimension_numbers = #tpu.dot_dimension_numbers<[1], [0], [0], [1], [0, 0, 1, 1], [], []>} : vector<32x2048xbf16>, vector<2048x100xbf16>, vector<32x100xf32> -> vector<32x100xf32>
    %c0_50 = arith.constant 0 : index
    %c0_51 = arith.constant 0 : index
    %61 = vector.load %arg4[%c0_50, %c0_51] : memref<32x1xf32, #tpu.memory_space<vmem>>, vector<32x1xf32>
    %62 = vector.broadcast %61 : vector<32x1xf32> to vector<32x100xf32>
    %63 = arith.addf %60, %62 : vector<32x100xf32>
    %cst_52 = arith.constant 0.000000e+00 : f32
    %64 = vector.broadcast %cst_52 : f32 to vector<32x100xf32>
    %65 = arith.maximumf %63, %64 : vector<32x100xf32>
    %c0_53 = arith.constant 0 : index
    %c0_54 = arith.constant 0 : index
    %c0_55 = arith.constant 0 : index
    %66 = vector.load %arg5[%c0_53, %c0_54, %c0_55] : memref<2x32x32xf32, #tpu.memory_space<vmem>>, vector<1x32x32xf32>
    %67 = vector.shape_cast %66 : vector<1x32x32xf32> to vector<32x32xf32>
    %cst_56 = arith.constant dense<0.000000e+00> : vector<32x100xf32>
    %68 = tpu.matmul %67, %65, %cst_56 {dimension_numbers = #tpu.dot_dimension_numbers<[1], [0], [0], [1], [0, 0, 1, 1], [], []>} : vector<32x32xf32>, vector<32x100xf32>, vector<32x100xf32> -> vector<32x100xf32>
    %c0_57 = arith.constant 0 : index
    %c0_58 = arith.constant 0 : index
    %c0_59 = arith.constant 0 : index
    %69 = vector.load %arg6[%c0_57, %c0_58, %c0_59] : memref<2x32x1xf32, #tpu.memory_space<vmem>>, vector<1x32x1xf32>
    %70 = vector.shape_cast %69 : vector<1x32x1xf32> to vector<32x1xf32>
    %71 = vector.broadcast %70 : vector<32x1xf32> to vector<32x100xf32>
    %72 = arith.addf %68, %71 : vector<32x100xf32>
    %cst_60 = arith.constant 0.000000e+00 : f32
    %73 = vector.broadcast %cst_60 : f32 to vector<32x100xf32>
    %74 = arith.cmpf ogt, %72, %73 : vector<32x100xf32>
    %cst_61 = arith.constant 0.00999999977 : f32
    %75 = vector.broadcast %cst_61 : f32 to vector<32x100xf32>
    %76 = arith.mulf %75, %72 : vector<32x100xf32>
    %77 = arith.select %74, %72, %76 : vector<32x100xi1>, vector<32x100xf32>
    %c1_62 = arith.constant 1 : index
    %c0_63 = arith.constant 0 : index
    %c0_64 = arith.constant 0 : index
    %78 = vector.load %arg5[%c1_62, %c0_63, %c0_64] : memref<2x32x32xf32, #tpu.memory_space<vmem>>, vector<1x32x32xf32>
    %79 = vector.shape_cast %78 : vector<1x32x32xf32> to vector<32x32xf32>
    %cst_65 = arith.constant dense<0.000000e+00> : vector<32x100xf32>
    %80 = tpu.matmul %79, %77, %cst_65 {dimension_numbers = #tpu.dot_dimension_numbers<[1], [0], [0], [1], [0, 0, 1, 1], [], []>} : vector<32x32xf32>, vector<32x100xf32>, vector<32x100xf32> -> vector<32x100xf32>
    %c1_66 = arith.constant 1 : index
    %c0_67 = arith.constant 0 : index
    %c0_68 = arith.constant 0 : index
    %81 = vector.load %arg6[%c1_66, %c0_67, %c0_68] : memref<2x32x1xf32, #tpu.memory_space<vmem>>, vector<1x32x1xf32>
    %82 = vector.shape_cast %81 : vector<1x32x1xf32> to vector<32x1xf32>
    %83 = vector.broadcast %82 : vector<32x1xf32> to vector<32x100xf32>
    %84 = arith.addf %80, %83 : vector<32x100xf32>
    %cst_69 = arith.constant 0.000000e+00 : f32
    %85 = vector.broadcast %cst_69 : f32 to vector<32x100xf32>
    %86 = arith.cmpf ogt, %84, %85 : vector<32x100xf32>
    %cst_70 = arith.constant 0.00999999977 : f32
    %87 = vector.broadcast %cst_70 : f32 to vector<32x100xf32>
    %88 = arith.mulf %87, %84 : vector<32x100xf32>
    %89 = arith.select %86, %84, %88 : vector<32x100xi1>, vector<32x100xf32>
    %c0_71 = arith.constant 0 : index
    %c0_72 = arith.constant 0 : index
    %90 = vector.load %arg7[%c0_71, %c0_72] : memref<16x32xf32, #tpu.memory_space<vmem>>, vector<16x32xf32>
    %cst_73 = arith.constant dense<0.000000e+00> : vector<16x100xf32>
    %91 = tpu.matmul %90, %89, %cst_73 {dimension_numbers = #tpu.dot_dimension_numbers<[1], [0], [0], [1], [0, 0, 1, 1], [], []>} : vector<16x32xf32>, vector<32x100xf32>, vector<16x100xf32> -> vector<16x100xf32>
    %c0_74 = arith.constant 0 : index
    %c0_75 = arith.constant 0 : index
    %92 = vector.load %arg8[%c0_74, %c0_75] : memref<16x1xf32, #tpu.memory_space<vmem>>, vector<16x1xf32>
    %93 = vector.broadcast %92 : vector<16x1xf32> to vector<16x100xf32>
    %94 = arith.addf %91, %93 : vector<16x100xf32>
    %cst_76 = arith.constant 0.000000e+00 : f32
    %95 = vector.broadcast %cst_76 : f32 to vector<16x100xf32>
    %96 = arith.maximumf %94, %95 : vector<16x100xf32>
    %c0_77 = arith.constant 0 : index
    %c0_78 = arith.constant 0 : index
    %97 = vector.load %arg9[%c0_77, %c0_78] : memref<8x16xf32, #tpu.memory_space<vmem>>, vector<8x16xf32>
    %cst_79 = arith.constant dense<0.000000e+00> : vector<8x100xf32>
    %98 = tpu.matmul %97, %96, %cst_79 {dimension_numbers = #tpu.dot_dimension_numbers<[1], [0], [0], [1], [0, 0, 1, 1], [], []>} : vector<8x16xf32>, vector<16x100xf32>, vector<8x100xf32> -> vector<8x100xf32>
    %c0_80 = arith.constant 0 : index
    %c0_81 = arith.constant 0 : index
    %99 = vector.load %arg10[%c0_80, %c0_81] : memref<8x1xf32, #tpu.memory_space<vmem>>, vector<8x1xf32>
    %100 = vector.broadcast %99 : vector<8x1xf32> to vector<8x100xf32>
    %101 = arith.addf %98, %100 : vector<8x100xf32>
    %cst_82 = arith.constant 0.000000e+00 : f32
    %102 = vector.broadcast %cst_82 : f32 to vector<8x100xf32>
    %103 = arith.maximumf %101, %102 : vector<8x100xf32>
    %c0_83 = arith.constant 0 : index
    %c0_84 = arith.constant 0 : index
    %104 = vector.load %arg11[%c0_83, %c0_84] : memref<16x8xf32, #tpu.memory_space<vmem>>, vector<16x8xf32>
    %cst_85 = arith.constant dense<0.000000e+00> : vector<16x100xf32>
    %105 = tpu.matmul %104, %103, %cst_85 {dimension_numbers = #tpu.dot_dimension_numbers<[1], [0], [0], [1], [0, 0, 1, 1], [], []>} : vector<16x8xf32>, vector<8x100xf32>, vector<16x100xf32> -> vector<16x100xf32>
    %c0_86 = arith.constant 0 : index
    %c0_87 = arith.constant 0 : index
    %106 = vector.load %arg12[%c0_86, %c0_87] : memref<16x1xf32, #tpu.memory_space<vmem>>, vector<16x1xf32>
    %107 = vector.broadcast %106 : vector<16x1xf32> to vector<16x100xf32>
    %108 = arith.addf %105, %107 : vector<16x100xf32>
    %c1_88 = arith.constant 1 : index
    %c0_89 = arith.constant 0 : index
    %c0_90 = arith.constant 0 : index
    %109 = vector.load %arg13[%c1_88, %c0_89, %c0_90] : memref<2x16x100xf32, #tpu.memory_space<vmem>>, vector<1x16x100xf32>
    %110 = vector.shape_cast %109 : vector<1x16x100xf32> to vector<16x100xf32>
    %111 = vector.shape_cast %108 : vector<16x100xf32> to vector<1x16x100xf32>
    tpu.vector_store %arg13[%c1_88, %c0_89, %c0_90], %111 {strides = array<i32>} : memref<2x16x100xf32, #tpu.memory_space<vmem>>, vector<1x16x100xf32>,
    return
  }
  func.func @transform_0(%arg0: i32, %arg1: i32) -> (i32, i32, i32) {
    %c0_i32 = arith.constant 0 : i32
    %c0_i32_0 = arith.constant 0 : i32
    return %arg0, %c0_i32, %arg1 : i32, i32, i32
  }
  func.func @transform_1(%arg0: i32, %arg1: i32) -> (i32, i32) {
    %c0_i32 = arith.constant 0 : i32
    %c0_i32_0 = arith.constant 0 : i32
    %c0_i32_1 = arith.constant 0 : i32
    return %c0_i32, %c0_i32_0 : i32, i32
  }
  func.func @transform_2(%arg0: i32, %arg1: i32) -> (i32, i32) {
    %c0_i32 = arith.constant 0 : i32
    %c0_i32_0 = arith.constant 0 : i32
    %c0_i32_1 = arith.constant 0 : i32
    return %c0_i32, %c0_i32_0 : i32, i32
  }
  func.func @transform_3(%arg0: i32, %arg1: i32) -> (i32, i32, i32) {
    %c0_i32 = arith.constant 0 : i32
    %c0_i32_0 = arith.constant 0 : i32
    %c0_i32_1 = arith.constant 0 : i32
    %c0_i32_2 = arith.constant 0 : i32
    return %c0_i32, %c0_i32_0, %c0_i32_1 : i32, i32, i32
  }
  func.func @transform_4(%arg0: i32, %arg1: i32) -> (i32, i32, i32) {
    %c0_i32 = arith.constant 0 : i32
    %c0_i32_0 = arith.constant 0 : i32
    %c0_i32_1 = arith.constant 0 : i32
    %c0_i32_2 = arith.constant 0 : i32
    return %c0_i32, %c0_i32_0, %c0_i32_1 : i32, i32, i32
  }
  func.func @transform_5(%arg0: i32, %arg1: i32) -> (i32, i32) {
    %c0_i32 = arith.constant 0 : i32
    %c0_i32_0 = arith.constant 0 : i32
    %c0_i32_1 = arith.constant 0 : i32
    return %c0_i32, %c0_i32_0 : i32, i32
  }
  func.func @transform_6(%arg0: i32, %arg1: i32) -> (i32, i32) {
    %c0_i32 = arith.constant 0 : i32
    %c0_i32_0 = arith.constant 0 : i32
    %c0_i32_1 = arith.constant 0 : i32
    return %c0_i32, %c0_i32_0 : i32, i32
  }
  func.func @transform_7(%arg0: i32, %arg1: i32) -> (i32, i32) {
    %c0_i32 = arith.constant 0 : i32
    %c0_i32_0 = arith.constant 0 : i32
    %c0_i32_1 = arith.constant 0 : i32
    return %c0_i32, %c0_i32_0 : i32, i32
  }
  func.func @transform_8(%arg0: i32, %arg1: i32) -> (i32, i32) {
    %c0_i32 = arith.constant 0 : i32
    %c0_i32_0 = arith.constant 0 : i32
    %c0_i32_1 = arith.constant 0 : i32
    return %c0_i32, %c0_i32_0 : i32, i32
  }
  func.func @transform_9(%arg0: i32, %arg1: i32) -> (i32, i32) {
    %c0_i32 = arith.constant 0 : i32
    %c0_i32_0 = arith.constant 0 : i32
    %c0_i32_1 = arith.constant 0 : i32
    return %c0_i32, %c0_i32_0 : i32, i32
  }
  func.func @transform_10(%arg0: i32, %arg1: i32) -> (i32, i32) {
    %c0_i32 = arith.constant 0 : i32
    %c0_i32_0 = arith.constant 0 : i32
    %c0_i32_1 = arith.constant 0 : i32
    return %c0_i32, %c0_i32_0 : i32, i32
  }
  func.func @transform_11(%arg0: i32, %arg1: i32) -> (i32, i32, i32) {
    %c0_i32 = arith.constant 0 : i32
    %c0_i32_0 = arith.constant 0 : i32
    return %arg0, %c0_i32, %arg1 : i32, i32, i32
  }
}

</mosaic_0001>

<bundles_post_ra>
// kernel: tpu_custom_call.1
= control target key start
LH: loop header
LB: loop body
LE: loop exit
PB: predicated region body
PF: predicated region fallthrough
CT: control target
= control target key end

     0   :  { %s6158_s0 = inlined_call_operand.vmem [shape: f32[3,2048,100], index: 0, kind: input, shape index: {}]   ;;  %s6159_s1 = inlined_call_operand.vmem [shape: bf16[32,2048], index: 1, kind: input, shape index: {}]   ;;  %s6160_s2 = inlined_call_operand.vmem [shape: f32[32,1], index: 2, kind: input, shape index: {}]   ;;  %s6161_s3 = inlined_call_operand.vmem [shape: f32[2,32,32], index: 3, kind: input, shape index: {}]   ;;  %s6162_s4 = inlined_call_operand.vmem [shape: f32[2,32,1], index: 4, kind: input, shape index: {}]   ;;  %s6163_s5 = inlined_call_operand.vmem [shape: f32[16,32], index: 5, kind: input, shape index: {}]   ;;  %s6164_s6 = inlined_call_operand.vmem [shape: f32[16,1], index: 6, kind: input, shape index: {}]   ;;  %s6165_s7 = inlined_call_operand.vmem [shape: f32[8,16], index: 7, kind: input, shape index: {}]   ;;  %s6166_s8 = inlined_call_operand.vmem [shape: f32[8,1], index: 8, kind: input, shape index: {}]   ;;  %s6167_s9 = inlined_call_operand.vmem [shape: f32[16,8], index: 9, kind: input, shape index: {}]   ;;  %s6168_s10 = inlined_call_operand.vmem [shape: f32[16,1], index: 10, kind: input, shape index: {}]   ;;  %s6169_s11 = inlined_call_operand.hbm [shape: f32[3,16,100], index: 11, kind: output, shape index: {}]  }
   0x1   :  { %6173 = sst [smem:[#allocation24_spill]] %s6158_s0 }
   0x2   :  { %16 = vsyncpa [#allocation3], 0 }
   0x3   :  { %18 = vsyncpa [#allocation3 + $0x1], 0  ;;  %s4850_s17 = smov 0   ;;  %s4852_s18 = smov 0  }
   0x4   :  { %s4854_s19 = smov 0   ;;  %s4856_s20 = smov 0  }
   0x5   :  { %s4858_s21 = smov 0   ;;  %s4860_s22 = smov 0  }
   0x6 LB: > { %s3647_s23 = sadd.s32 4294967295, %s4782_s22   ;;  %s3648_s24 = sadd.s32 4294967294, %s4782_s22   ;;  %s4782_s22 = sphi %s4860_s22, %s24_s22   ;;  %s4778_s21 = sphi %s4858_s21, %s6224_s21   ;;  %s4774_s20 = sphi %s4856_s20, %s6223_s20   ;;  %s4770_s19 = sphi %s4854_s19, %s6222_s19   ;;  %s4766_s18 = sphi %s4852_s18, %s6221_s18   ;;  %s4762_s17 = sphi %s4850_s17, %s6220_s17  }
   0x7   : > { %s36_s25 = sadd.s32 1, %s4778_s21  ;;  %s283_s26 = sadd.s32 1, %s4770_s19 }
   0x8   : > { %p38_p0 = scmp.ge.s32.totalorder %s36_s25, 2  ;;  %p293_p1 = scmp.ne.s32.totalorder %s4770_s19, %s4766_s18 }
   0x9   : > { %p294_p2 = scmp.eq.s32.totalorder %s3647_s23, 1  ;;  %p299_p3 = scmp.ne.s32.totalorder %s4766_s18, %s4762_s17 }
   0xa   : > { %s6226_s25 = smov (%p38_p0, %s36_s25), 0  ;;  %p300_p5 = scmp.eq.s32.totalorder %s3648_s24, 1 }
   0xb   : > { %6174 = sst [smem:[#allocation5_spill]] %s6226_s25  ;;  %p4890_p4 = por %p294_p2, %p293_p1 }
   0xc   : > { %s278_s28 = ssub.s32 %s4778_s21, %s6226_s25  ;;  %p3651_p6 = scmp.ge.s32.totalorder %s4782_s22, 1 }
   0xd   : > { %p281_p7 = scmp.eq.s32.totalorder %s278_s28, 0  ;;  %p4897_p8 = por %p300_p5, %p299_p3 }
   0xe   : > { %p371_p9 = scmp.lt.s32.totalorder %s4782_s22, 3 }
   0xf   : > { %s4903_s30 = scalar_select %p281_p7, %s4770_s19, %s283_s26  }
  0x10   : > { %p372_p10 = pnand %p3651_p6, %p371_p9 }
  0x12   : > { %375 = sbr.rel (%p372_p10) target bundleno = 2597 (0xa25), region = 64 }
  0x17   : > { %s4906_s12 = sshll.u32 %s4774_s20, 1  ;;  %v4911_v0 = vld [vmem:[%s6159_s1] sm:$0xff]  ;;  %v4921_v2 = vld [vmem:[%s6159_s1 + $0x8] sm:$0xff]  ;;  %v4784_v5 = vmov 0   ;;  %s6177_s0 = sld [smem:[#allocation24_spill]]  ;;  %vm1471_vm0 = vcmask 261120  }
  0x18   : > { %v4916_v1 = vld [vmem:[%s6159_s1 + $0x40] sm:$0xff]  ;;  %p426_p11 = scmp.lt.s32.totalorder %s4906_s12, 2  ;;  %v4929_v4 = vld [vmem:[%s6159_s1 + $0x48] sm:$0xff]  ;;  %4704 = vset.pattern.permute.xlu1 %v4784_v5  ;;  %4703 = vset.pattern.permute.xlu0 %v4784_v5  ;;  %vm4786_vm9 = vmmov 0   ;;  %vm1824_vm10 = vcmask 130048   ;;  %vm1913_vm11 = vcmask 64512  }
  0x19   : > { %v3657_v3 = vcombine.high %v4911_v0, %v4916_v1  ;;  %v3659_v6 = vcombine.high %v4921_v2, %v4929_v4  ;;  %v864_v7 = vld [vmem:[%s6160_s2 + $0x8] sm:$0xff]  ;;  %s417_s15 = sand.u32 1, %s4766_s18   ;;  %vm1995_vm12 = vcmask 818176   ;;  %s3554_s16 = ssub.s32 (%p4890_p4), 3, %s4906_s12 }
  0x1a   : > { %s427_s13 = scalar_select %p426_p11, %s4906_s12, 2  ;;  %874 = vperm.xlu1 %4704, %v864_v7  }
  0x1b   : > { %1079 = vmatprep.mubr.bf16.mxu0 %v3657_v3  ;;  %1128 = vmatprep.mubr.bf16.mxu1 %v3659_v6  ;;  %p3555_p12 = scmp.lt.s32.totalorder (%p4890_p4), %s3554_s16, 2 }
  0x1c   : > { %s4032_s14 = sshll.u32 %s427_s13, 11 }
  0x1d   : > { %s4937_s23 = scalar_lea.vmem %s6177_s0, %s4032_s14  ;;  %s6093_s0 = scalar_lea.sflag [#allocation3], %s417_s15 }
  0x1e   : > { %v477_v8 = vld [vmem:[%s4937_s23 + $0xf0] sm:$0xff]  ;;  %v478_v9 = vld [vmem:[%s4937_s23 + $0xf8] sm:$0xff]  ;;  %v475_v19 = vld [vmem:[%s4937_s23 + $0xe0] sm:$0xff] }
  0x1f   : > { %v509_v10 = vld [vmem:[%s4937_s23 + $0x1f0] sm:$0xff]  ;;  %v718_v11 = vpack.c.bf16 %v478_v9, %v477_v8  ;;  %v510_v12 = vld [vmem:[%s4937_s23 + $0x1f8] sm:$0xff]  ;;  %v476_v21 = vld [vmem:[%s4937_s23 + $0xe8] sm:$0xff] }
  0x20   : > { %v461_v13 = vld [vmem:[%s4937_s23 + $0x70] sm:$0xff]  ;;  %v462_v14 = vld [vmem:[%s4937_s23 + $0x78] sm:$0xff]  ;;  %v734_v15 = vpack.c.bf16 %v510_v12, %v509_v10  ;;  %v507_v22 = vld [vmem:[%s4937_s23 + $0x1e0] sm:$0xff]  ;;  %v717_v24 = vpack.c.bf16 %v476_v21, %v475_v19 }
  0x21   : > { %v710_v16 = vpack.c.bf16 %v462_v14, %v461_v13  ;;  %v493_v17 = vld [vmem:[%s4937_s23 + $0x170] sm:$0xff]  ;;  %v494_v18 = vld [vmem:[%s4937_s23 + $0x178] sm:$0xff]  ;;  %4038 = vmatprep.subr.bf16.mxu0 %v718_v11  ;;  %v508_v23 = vld [vmem:[%s4937_s23 + $0x1e8] sm:$0xff] }
  0x22   : > { %v726_v20 = vpack.c.bf16 %v494_v18, %v493_v17  ;;  %4066 = vmatprep.subr.bf16.mxu1 %v734_v15  ;;  %v733_v25 = vpack.c.bf16 %v508_v23, %v507_v22  ;;  %v459_v26 = vld [vmem:[%s4937_s23 + $0x60] sm:$0xff]  ;;  %v460_v27 = vld [vmem:[%s4937_s23 + $0x68] sm:$0xff]  ;;  %v473_v31 = vld [vmem:[%s4937_s23 + $0xd0] sm:$0xff] }
  0x23   : > { %4039 = vmatpush3.bf16.msra.mxu0 %v710_v16  ;;  %v491_v28 = vld [vmem:[%s4937_s23 + $0x160] sm:$0xff]  ;;  %v709_v29 = vpack.c.bf16 %v460_v27, %v459_v26  ;;  %v492_v30 = vld [vmem:[%s4937_s23 + $0x168] sm:$0xff]  ;;  %v474_v32 = vld [vmem:[%s4937_s23 + $0xd8] sm:$0xff] }
  0x24   : > { %4067 = vmatpush3.bf16.msra.mxu1 %v726_v20  ;;  %4040 = vmatprep.subr.bf16.mxu0 %v717_v24  ;;  %v725_v33 = vpack.c.bf16 %v492_v30, %v491_v28  ;;  %v716_v34 = vpack.c.bf16 %v474_v32, %v473_v31  ;;  %v505_v35 = vld [vmem:[%s4937_s23 + $0x1d0] sm:$0xff]  ;;  %v506_v36 = vld [vmem:[%s4937_s23 + $0x1d8] sm:$0xff]  ;;  %v471_v43 = vld [vmem:[%s4937_s23 + $0xc0] sm:$0xff] }
  0x25   : > { %4068 = vmatprep.subr.bf16.mxu1 %v733_v25  ;;  %v457_v37 = vld [vmem:[%s4937_s23 + $0x50] sm:$0xff]  ;;  %v732_v38 = vpack.c.bf16 %v506_v36, %v505_v35  ;;  %v458_v39 = vld [vmem:[%s4937_s23 + $0x58] sm:$0xff]  ;;  %v472_v44 = vld [vmem:[%s4937_s23 + $0xc8] sm:$0xff] }
  0x26   : > { %v489_v40 = vld [vmem:[%s4937_s23 + $0x150] sm:$0xff]  ;;  %v490_v41 = vld [vmem:[%s4937_s23 + $0x158] sm:$0xff]  ;;  %v708_v42 = vpack.c.bf16 %v458_v39, %v457_v37  ;;  %v503_v45 = vld [vmem:[%s4937_s23 + $0x1c0] sm:$0xff]  ;;  %v715_v47 = vpack.c.bf16 %v472_v44, %v471_v43 }
  0x27   : > { %4041 = vmatpush3.bf16.msra.mxu0 %v709_v29  ;;  %v724_v46 = vpack.c.bf16 %v490_v41, %v489_v40  ;;  %v504_v48 = vld [vmem:[%s4937_s23 + $0x1c8] sm:$0xff]  ;;  %v455_v49 = vld [vmem:[%s4937_s23 + $0x40] sm:$0xff]  ;;  %v469_v54 = vld [vmem:[%s4937_s23 + $0xb0] sm:$0xff] }
  0x28   : > { %4069 = vmatpush3.bf16.msra.mxu1 %v725_v33  ;;  %4042 = vmatprep.subr.bf16.mxu0 %v716_v34  ;;  %v456_v50 = vld [vmem:[%s4937_s23 + $0x48] sm:$0xff]  ;;  %v731_v51 = vpack.c.bf16 %v504_v48, %v503_v45  ;;  %v487_v52 = vld [vmem:[%s4937_s23 + $0x140] sm:$0xff]  ;;  %v470_v55 = vld [vmem:[%s4937_s23 + $0xb8] sm:$0xff] }
  0x29   : > { %4070 = vmatprep.subr.bf16.mxu1 %v732_v38  ;;  %v488_v53 = vld [vmem:[%s4937_s23 + $0x148] sm:$0xff]  ;;  %v501_v56 = vld [vmem:[%s4937_s23 + $0x1b0] sm:$0xff]  ;;  %v502_v57 = vld [vmem:[%s4937_s23 + $0x1b8] sm:$0xff]  ;;  %v707_v58 = vpack.c.bf16 %v456_v50, %v455_v49  ;;  %v714_v60 = vpack.c.bf16 %v470_v55, %v469_v54 }
  0x2a   : > { %v723_v59 = vpack.c.bf16 %v488_v53, %v487_v52  ;;  %v453_v61 = vld [vmem:[%s4937_s23 + $0x30] sm:$0xff]  ;;  %v454_v62 = vld [vmem:[%s4937_s23 + $0x38] sm:$0xff]  ;;  %v730_v3 = vpack.c.bf16 %v502_v57, %v501_v56  ;;  %v467_v6 = vld [vmem:[%s4937_s23 + $0xa0] sm:$0xff]  ;;  %v3656_v57 = vcombine.low %v4911_v0, %v4916_v1 }
  0x2b   : > { %4043 = vmatpush3.bf16.msra.mxu0 %v708_v42  ;;  %v485_v63 = vld [vmem:[%s4937_s23 + $0x130] sm:$0xff]  ;;  %v486_v5 = vld [vmem:[%s4937_s23 + $0x138] sm:$0xff]  ;;  %v468_v7 = vld [vmem:[%s4937_s23 + $0xa8] sm:$0xff]  ;;  %v706_v10 = vpack.c.bf16 %v454_v62, %v453_v61  ;;  %v3658_v61 = vcombine.low %v4921_v2, %v4929_v4 }
  0x2c   : > { %4071 = vmatpush3.bf16.msra.mxu1 %v724_v46  ;;  %4044 = vmatprep.subr.bf16.mxu0 %v715_v47  ;;  %v499_v8 = vld [vmem:[%s4937_s23 + $0x1a0] sm:$0xff]  ;;  %v500_v9 = vld [vmem:[%s4937_s23 + $0x1a8] sm:$0xff]  ;;  %v722_v11 = vpack.c.bf16 %v486_v5, %v485_v63  ;;  %v713_v12 = vpack.c.bf16 %v468_v7, %v467_v6  ;;  %v465_v18 = vld [vmem:[%s4937_s23 + $0x90] sm:$0xff] }
  0x2d   : > { %4072 = vmatprep.subr.bf16.mxu1 %v731_v51  ;;  %v451_v13 = vld [vmem:[%s4937_s23 + $0x20] sm:$0xff]  ;;  %v452_v14 = vld [vmem:[%s4937_s23 + $0x28] sm:$0xff]  ;;  %v729_v16 = vpack.c.bf16 %v500_v9, %v499_v8  ;;  %v466_v19 = vld [vmem:[%s4937_s23 + $0x98] sm:$0xff] }
  0x2e   : > { %v483_v15 = vld [vmem:[%s4937_s23 + $0x120] sm:$0xff]  ;;  %v484_v17 = vld [vmem:[%s4937_s23 + $0x128] sm:$0xff]  ;;  %v497_v20 = vld [vmem:[%s4937_s23 + $0x190] sm:$0xff]  ;;  %v705_v22 = vpack.c.bf16 %v452_v14, %v451_v13  ;;  %v712_v24 = vpack.c.bf16 %v466_v19, %v465_v18 }
  0x2f   : > { %4045 = vmatpush3.bf16.msra.mxu0 %v707_v58  ;;  %v498_v21 = vld [vmem:[%s4937_s23 + $0x198] sm:$0xff]  ;;  %v721_v23 = vpack.c.bf16 %v484_v17, %v483_v15  ;;  %v449_v25 = vld [vmem:[%s4937_s23 + $0x10] sm:$0xff]  ;;  %v463_v30 = vld [vmem:[%s4937_s23 + $0x80] sm:$0xff] }
  0x30   : > { %4073 = vmatpush3.bf16.msra.mxu1 %v723_v59  ;;  %4046 = vmatprep.subr.bf16.mxu0 %v714_v60  ;;  %v450_v26 = vld [vmem:[%s4937_s23 + $0x18] sm:$0xff]  ;;  %v481_v27 = vld [vmem:[%s4937_s23 + $0x110] sm:$0xff]  ;;  %v728_v28 = vpack.c.bf16 %v498_v21, %v497_v20  ;;  %v464_v31 = vld [vmem:[%s4937_s23 + $0x88] sm:$0xff] }
  0x31   : > { %4074 = vmatprep.subr.bf16.mxu1 %v730_v3  ;;  %v482_v29 = vld [vmem:[%s4937_s23 + $0x118] sm:$0xff]  ;;  %v495_v32 = vld [vmem:[%s4937_s23 + $0x180] sm:$0xff]  ;;  %v496_v33 = vld [vmem:[%s4937_s23 + $0x188] sm:$0xff]  ;;  %v704_v34 = vpack.c.bf16 %v450_v26, %v449_v25  ;;  %v711_v36 = vpack.c.bf16 %v464_v31, %v463_v30 }
  0x32   : > { %v720_v35 = vpack.c.bf16 %v482_v29, %v481_v27  ;;  %v447_v37 = vld [vmem:[%s4937_s23] sm:$0xff]  ;;  %v448_v38 = vld [vmem:[%s4937_s23 + $0x8] sm:$0xff]  ;;  %v727_v40 = vpack.c.bf16 %v496_v33, %v495_v32  ;;  %v541_v42 = vld [vmem:[%s4937_s23 + $0x2f0] sm:$0xff] }
  0x33   : > { %4047 = vmatpush3.bf16.msra.mxu0 %v706_v10  ;;  %v479_v39 = vld [vmem:[%s4937_s23 + $0x100] sm:$0xff]  ;;  %v480_v41 = vld [vmem:[%s4937_s23 + $0x108] sm:$0xff]  ;;  %v542_v43 = vld [vmem:[%s4937_s23 + $0x2f8] sm:$0xff]  ;;  %v703_v46 = vpack.c.bf16 %v448_v38, %v447_v37 }
  0x34   : > { %4075 = vmatpush3.bf16.msra.mxu1 %v722_v11  ;;  %4048 = vmatprep.subr.bf16.mxu0 %v713_v12  ;;  %v573_v44 = vld [vmem:[%s4937_s23 + $0x3f0] sm:$0xff]  ;;  %v574_v45 = vld [vmem:[%s4937_s23 + $0x3f8] sm:$0xff]  ;;  %v719_v47 = vpack.c.bf16 %v480_v41, %v479_v39  ;;  %v750_v48 = vpack.c.bf16 %v542_v43, %v541_v42  ;;  %v5016_v52 = vld [vmem:[%s6159_s1 + $0x80] sm:$0xff] }
  0x35   : > { %4076 = vmatprep.subr.bf16.mxu1 %v729_v16  ;;  %v525_v49 = vld [vmem:[%s4937_s23 + $0x270] sm:$0xff]  ;;  %v526_v50 = vld [vmem:[%s4937_s23 + $0x278] sm:$0xff]  ;;  %v766_v53 = vpack.c.bf16 %v574_v45, %v573_v44  ;;  %v539_v55 = vld [vmem:[%s4937_s23 + $0x2e0] sm:$0xff] }
  0x36   : > { %v557_v51 = vld [vmem:[%s4937_s23 + $0x370] sm:$0xff]  ;;  %v558_v54 = vld [vmem:[%s4937_s23 + $0x378] sm:$0xff]  ;;  %v540_v56 = vld [vmem:[%s4937_s23 + $0x2e8] sm:$0xff]  ;;  %v742_v62 = vpack.c.bf16 %v526_v50, %v525_v49 }
  0x37   : > { %4049 = vmatpush3.bf16.msra.mxu0 %v705_v22  ;;  %v571_v58 = vld [vmem:[%s4937_s23 + $0x3e0] sm:$0xff]  ;;  %v572_v59 = vld [vmem:[%s4937_s23 + $0x3e8] sm:$0xff]  ;;  %v758_v1 = vpack.c.bf16 %v558_v54, %v557_v51  ;;  %v749_v3 = vpack.c.bf16 %v540_v56, %v539_v55  ;;  %v537_v8 = vld [vmem:[%s4937_s23 + $0x2d0] sm:$0xff] }
  0x38   : > { %4077 = vmatpush3.bf16.msra.mxu1 %v721_v23  ;;  %4050 = vmatprep.subr.bf16.mxu0 %v712_v24  ;;  %v5028_v60 = vld [vmem:[%s6159_s1 + $0xc0] sm:$0xff]  ;;  %v5035_v63 = vld [vmem:[%s6159_s1 + $0x88] sm:$0xff]  ;;  %v765_v4 = vpack.c.bf16 %v572_v59, %v571_v58  ;;  %v538_v9 = vld [vmem:[%s4937_s23 + $0x2d8] sm:$0xff] }
  0x39   : > { %4078 = vmatprep.subr.bf16.mxu1 %v728_v28  ;;  %v5040_v0 = vld [vmem:[%s6159_s1 + $0xc8] sm:$0xff]  ;;  %v523_v5 = vld [vmem:[%s4937_s23 + $0x260] sm:$0xff]  ;;  %v3673_v10 = vcombine.high %v5016_v52, %v5028_v60  ;;  %v569_v11 = vld [vmem:[%s4937_s23 + $0x3d0] sm:$0xff]  ;;  %v748_v16 = vpack.c.bf16 %v538_v9, %v537_v8  ;;  %v3672_v27 = vcombine.low %v5016_v52, %v5028_v60 }
  0x3a   : > { %v524_v6 = vld [vmem:[%s4937_s23 + $0x268] sm:$0xff]  ;;  %v555_v2 = vld [vmem:[%s4937_s23 + $0x360] sm:$0xff]  ;;  %v570_v12 = vld [vmem:[%s4937_s23 + $0x3d8] sm:$0xff]  ;;  %v3675_v13 = vcombine.high %v5035_v63, %v5040_v0  ;;  %v3674_v30 = vcombine.low %v5035_v63, %v5040_v0 }
  0x3b   : > { %4051 = vmatpush3.bf16.msra.mxu0 %v704_v34  ;;  %v556_v7 = vld [vmem:[%s4937_s23 + $0x368] sm:$0xff]  ;;  %v741_v14 = vpack.c.bf16 %v524_v6, %v523_v5  ;;  %v521_v17 = vld [vmem:[%s4937_s23 + $0x250] sm:$0xff]  ;;  %v522_v18 = vld [vmem:[%s4937_s23 + $0x258] sm:$0xff]  ;;  %v764_v21 = vpack.c.bf16 %v570_v12, %v569_v11 }
  0x3c   : > { %4079 = vmatpush3.bf16.msra.mxu1 %v720_v35  ;;  %4052 = vmatprep.subr.bf16.mxu0 %v711_v36  ;;  %v757_v15 = vpack.c.bf16 %v556_v7, %v555_v2  ;;  %v553_v19 = vld [vmem:[%s4937_s23 + $0x350] sm:$0xff]  ;;  %v554_v22 = vld [vmem:[%s4937_s23 + $0x358] sm:$0xff]  ;;  %v535_v23 = vld [vmem:[%s4937_s23 + $0x2c0] sm:$0xff]  ;;  %v740_v29 = vpack.c.bf16 %v522_v18, %v521_v17 }
  0x3d   : > { %4080 = vmatprep.subr.bf16.mxu1 %v727_v40  ;;  %v5060_v20 = vld [vmem:[%s6159_s1 + $0x10] sm:$0xff]  ;;  %v536_v24 = vld [vmem:[%s4937_s23 + $0x2c8] sm:$0xff]  ;;  %v567_v25 = vld [vmem:[%s4937_s23 + $0x3c0] sm:$0xff]  ;;  %v756_v33 = vpack.c.bf16 %v554_v22, %v553_v19 }
  0x3e   : > { %v568_v26 = vld [vmem:[%s4937_s23 + $0x3c8] sm:$0xff]  ;;  %v5072_v28 = vld [vmem:[%s6159_s1 + $0x50] sm:$0xff]  ;;  %v5079_v31 = vld [vmem:[%s6159_s1 + $0x18] sm:$0xff]  ;;  %v747_v34 = vpack.c.bf16 %v536_v24, %v535_v23 }
  0x3f   : > { %4053 = vmatpush3.bf16.msra.mxu0 %v703_v46  ;;  %v5084_v32 = vld [vmem:[%s6159_s1 + $0x58] sm:$0xff]  ;;  %v519_v35 = vld [vmem:[%s4937_s23 + $0x240] sm:$0xff]  ;;  %v520_v36 = vld [vmem:[%s4937_s23 + $0x248] sm:$0xff]  ;;  %v763_v38 = vpack.c.bf16 %v568_v26, %v567_v25  ;;  %v3661_v42 = vcombine.high %v5060_v20, %v5072_v28 }
  0x40   : > { %4081 = vmatpush3.bf16.msra.mxu1 %v719_v47  ;;  %4094 = vmatprep.subr.bf16.mxu0 %v750_v48  ;;  %v551_v37 = vld [vmem:[%s4937_s23 + $0x340] sm:$0xff]  ;;  %v552_v39 = vld [vmem:[%s4937_s23 + $0x348] sm:$0xff]  ;;  %v533_v40 = vld [vmem:[%s4937_s23 + $0x2b0] sm:$0xff]  ;;  %v3663_v45 = vcombine.high %v5079_v31, %v5084_v32  ;;  %v739_v46 = vpack.c.bf16 %v520_v36, %v519_v35 }
  0x41   : > { %4122 = vmatprep.subr.bf16.mxu1 %v766_v53  ;;  %v534_v41 = vld [vmem:[%s4937_s23 + $0x2b8] sm:$0xff]  ;;  %v565_v43 = vld [vmem:[%s4937_s23 + $0x3b0] sm:$0xff]  ;;  %v755_v47 = vpack.c.bf16 %v552_v39, %v551_v37  ;;  %v531_v54 = vld [vmem:[%s4937_s23 + $0x2a0] sm:$0xff] }
  0x42   : > { %1080 = vmatmul.mubr.bf16.vlgmr.msra.gmra.mxu0 %v3656_v57  ;;  %v566_v44 = vld [vmem:[%s4937_s23 + $0x3b8] sm:$0xff]  ;;  %v746_v48 = vpack.c.bf16 %v534_v41, %v533_v40  ;;  %v517_v49 = vld [vmem:[%s4937_s23 + $0x230] sm:$0xff]  ;;  %v532_v55 = vld [vmem:[%s4937_s23 + $0x2a8] sm:$0xff] }
  0x43   : > { %1129 = vmatmul.mubr.bf16.vlgmr.msra.gmra.mxu1 %v3658_v61  ;;  %4095 = vmatpush3.bf16.msra.mxu0 %v742_v62  ;;  %v518_v50 = vld [vmem:[%s4937_s23 + $0x238] sm:$0xff]  ;;  %v549_v51 = vld [vmem:[%s4937_s23 + $0x330] sm:$0xff]  ;;  %v762_v52 = vpack.c.bf16 %v566_v44, %v565_v43  ;;  %v563_v56 = vld [vmem:[%s4937_s23 + $0x3a0] sm:$0xff]  ;;  %v745_v60 = vpack.c.bf16 %v532_v55, %v531_v54 }
  0x44   : > { %4123 = vmatpush3.bf16.msra.mxu1 %v758_v1  ;;  %4096 = vmatprep.subr.bf16.mxu0 %v749_v3  ;;  %v550_v53 = vld [vmem:[%s4937_s23 + $0x338] sm:$0xff]  ;;  %v564_v57 = vld [vmem:[%s4937_s23 + $0x3a8] sm:$0xff]  ;;  %v738_v58 = vpack.c.bf16 %v518_v50, %v517_v49  ;;  %v515_v61 = vld [vmem:[%s4937_s23 + $0x220] sm:$0xff]  ;;  %v3662_v49 = vcombine.low %v5079_v31, %v5084_v32 }
  0x45   : > { %4124 = vmatprep.subr.bf16.mxu1 %v765_v4  ;;  %1087 = vmatprep.mubr.bf16.mxu0 %v3673_v10  ;;  %v754_v59 = vpack.c.bf16 %v550_v53, %v549_v51  ;;  %v516_v62 = vld [vmem:[%s4937_s23 + $0x228] sm:$0xff]  ;;  %v547_v63 = vld [vmem:[%s4937_s23 + $0x320] sm:$0xff]  ;;  %v761_v0 = vpack.c.bf16 %v564_v57, %v563_v56  ;;  %v529_v3 = vld [vmem:[%s4937_s23 + $0x290] sm:$0xff] }
  0x46   : > { %1136 = vmatprep.mubr.bf16.mxu1 %v3675_v13  ;;  %v548_v1 = vld [vmem:[%s4937_s23 + $0x328] sm:$0xff]  ;;  %v530_v5 = vld [vmem:[%s4937_s23 + $0x298] sm:$0xff]  ;;  %v561_v6 = vld [vmem:[%s4937_s23 + $0x390] sm:$0xff]  ;;  %v737_v4 = vpack.c.bf16 %v516_v62, %v515_v61 }
  0x47   : > { %4097 = vmatpush3.bf16.msra.mxu0 %v741_v14  ;;  %v562_v2 = vld [vmem:[%s4937_s23 + $0x398] sm:$0xff]  ;;  %v753_v7 = vpack.c.bf16 %v548_v1, %v547_v63  ;;  %v744_v8 = vpack.c.bf16 %v530_v5, %v529_v3  ;;  %v513_v9 = vld [vmem:[%s4937_s23 + $0x210] sm:$0xff]  ;;  %v527_v14 = vld [vmem:[%s4937_s23 + $0x280] sm:$0xff] }
  0x48   : > { %4125 = vmatpush3.bf16.msra.mxu1 %v757_v15  ;;  %4098 = vmatprep.subr.bf16.mxu0 %v748_v16  ;;  %v514_v10 = vld [vmem:[%s4937_s23 + $0x218] sm:$0xff]  ;;  %v545_v11 = vld [vmem:[%s4937_s23 + $0x310] sm:$0xff]  ;;  %v760_v12 = vpack.c.bf16 %v562_v2, %v561_v6  ;;  %v528_v15 = vld [vmem:[%s4937_s23 + $0x288] sm:$0xff] }
  0x49   : > { %4126 = vmatprep.subr.bf16.mxu1 %v764_v21  ;;  %v546_v13 = vld [vmem:[%s4937_s23 + $0x318] sm:$0xff]  ;;  %v559_v16 = vld [vmem:[%s4937_s23 + $0x380] sm:$0xff]  ;;  %v560_v17 = vld [vmem:[%s4937_s23 + $0x388] sm:$0xff]  ;;  %v736_v18 = vpack.c.bf16 %v514_v10, %v513_v9  ;;  %v743_v21 = vpack.c.bf16 %v528_v15, %v527_v14 }
  0x4a   : > { %1088 = vmatmul.mubr.bf16.gmra.mxu0 %v3672_v27  ;;  %v752_v19 = vpack.c.bf16 %v546_v13, %v545_v11  ;;  %v511_v22 = vld [vmem:[%s4937_s23 + $0x200] sm:$0xff]  ;;  %v512_v23 = vld [vmem:[%s4937_s23 + $0x208] sm:$0xff]  ;;  %v759_v25 = vpack.c.bf16 %v560_v17, %v559_v16  ;;  %v605_v27 = vld [vmem:[%s4937_s23 + $0x4f0] sm:$0xff] }
  0x4b   : > { %4099 = vmatpush3.bf16.msra.mxu0 %v740_v29  ;;  %1137 = vmatmul.mubr.bf16.gmra.mxu1 %v3674_v30  ;;  %v543_v24 = vld [vmem:[%s4937_s23 + $0x300] sm:$0xff]  ;;  %v544_v26 = vld [vmem:[%s4937_s23 + $0x308] sm:$0xff]  ;;  %v606_v29 = vld [vmem:[%s4937_s23 + $0x4f8] sm:$0xff] }
  0x4c   : > { %4127 = vmatpush3.bf16.msra.mxu1 %v756_v33  ;;  %4100 = vmatprep.subr.bf16.mxu0 %v747_v34  ;;  %v637_v30 = vld [vmem:[%s4937_s23 + $0x5f0] sm:$0xff]  ;;  %v638_v33 = vld [vmem:[%s4937_s23 + $0x5f8] sm:$0xff]  ;;  %v735_v34 = vpack.c.bf16 %v512_v23, %v511_v22  ;;  %v751_v35 = vpack.c.bf16 %v544_v26, %v543_v24  ;;  %v782_v36 = vpack.c.bf16 %v606_v29, %v605_v27  ;;  %v603_v43 = vld [vmem:[%s4937_s23 + $0x4e0] sm:$0xff] }
  0x4d   : > { %4128 = vmatprep.subr.bf16.mxu1 %v763_v38  ;;  %1177 = vmatprep.mubr.bf16.mxu0 %v3661_v42  ;;  %v589_v37 = vld [vmem:[%s4937_s23 + $0x470] sm:$0xff]  ;;  %v590_v38 = vld [vmem:[%s4937_s23 + $0x478] sm:$0xff]  ;;  %v798_v41 = vpack.c.bf16 %v638_v33, %v637_v30  ;;  %v604_v44 = vld [vmem:[%s4937_s23 + $0x4e8] sm:$0xff] }
  0x4e   : > { %1226 = vmatprep.mubr.bf16.mxu1 %v3663_v45  ;;  %v621_v39 = vld [vmem:[%s4937_s23 + $0x570] sm:$0xff]  ;;  %v622_v42 = vld [vmem:[%s4937_s23 + $0x578] sm:$0xff]  ;;  %v3660_v45 = vcombine.low %v5060_v20, %v5072_v28  ;;  %v774_v50 = vpack.c.bf16 %v590_v38, %v589_v37  ;;  %v587_v53 = vld [vmem:[%s4937_s23 + $0x460] sm:$0xff] }
  0x4f   : > { %4101 = vmatpush3.bf16.msra.mxu0 %v739_v46  ;;  %v5136_v40 = vld [vmem:[%s6159_s1 + $0x90] sm:$0xff]  ;;  %v635_v46 = vld [vmem:[%s4937_s23 + $0x5e0] sm:$0xff]  ;;  %v5155_v51 = vld [vmem:[%s6159_s1 + $0x98] sm:$0xff]  ;;  %v790_v28 = vpack.c.bf16 %v622_v42, %v621_v39 }
  0x50   : > { %4129 = vmatpush3.bf16.msra.mxu1 %v755_v47  ;;  %4102 = vmatprep.subr.bf16.mxu0 %v746_v48  ;;  %v636_v47 = vld [vmem:[%s4937_s23 + $0x5e8] sm:$0xff]  ;;  %v5148_v48 = vld [vmem:[%s6159_s1 + $0xd0] sm:$0xff]  ;;  %v5160_v20 = vld [vmem:[%s6159_s1 + $0xd8] sm:$0xff] }
  0x51   : > { %4130 = vmatprep.subr.bf16.mxu1 %v762_v52  ;;  %v781_v52 = vpack.c.bf16 %v604_v44, %v603_v43  ;;  %v588_v31 = vld [vmem:[%s4937_s23 + $0x468] sm:$0xff]  ;;  %v619_v32 = vld [vmem:[%s4937_s23 + $0x560] sm:$0xff]  ;;  %v797_v54 = vpack.c.bf16 %v636_v47, %v635_v46  ;;  %v3677_v56 = vcombine.high %v5136_v40, %v5148_v48  ;;  %v601_v57 = vld [vmem:[%s4937_s23 + $0x4d0] sm:$0xff]  ;;  %v3679_v61 = vcombine.high %v5155_v51, %v5160_v20 }
  0x52   : > { %v620_v55 = vld [vmem:[%s4937_s23 + $0x568] sm:$0xff]  ;;  %v773_v62 = vpack.c.bf16 %v588_v31, %v587_v53  ;;  %v585_v1 = vld [vmem:[%s4937_s23 + $0x450] sm:$0xff]  ;;  %v586_v3 = vld [vmem:[%s4937_s23 + $0x458] sm:$0xff]  ;;  %v3676_v10 = vcombine.low %v5136_v40, %v5148_v48  ;;  %v3678_v15 = vcombine.low %v5155_v51, %v5160_v20 }
  0x53   : > { %4103 = vmatpush3.bf16.msra.mxu0 %v738_v58  ;;  %v602_v58 = vld [vmem:[%s4937_s23 + $0x4d8] sm:$0xff]  ;;  %v789_v63 = vpack.c.bf16 %v620_v55, %v619_v32  ;;  %v617_v5 = vld [vmem:[%s4937_s23 + $0x550] sm:$0xff]  ;;  %v5180_v6 = vld [vmem:[%s6159_s1 + $0x20] sm:$0xff]  ;;  %v772_v14 = vpack.c.bf16 %v586_v3, %v585_v1 }
  0x54   : > { %4131 = vmatpush3.bf16.msra.mxu1 %v754_v59  ;;  %4104 = vmatprep.subr.bf16.mxu0 %v745_v60  ;;  %v633_v59 = vld [vmem:[%s4937_s23 + $0x5d0] sm:$0xff]  ;;  %v634_v60 = vld [vmem:[%s4937_s23 + $0x5d8] sm:$0xff]  ;;  %v5185_v2 = vld [vmem:[%s6159_s1 + $0x60] sm:$0xff] }
  0x55   : > { %4132 = vmatprep.subr.bf16.mxu1 %v761_v0  ;;  %v780_v0 = vpack.c.bf16 %v602_v58, %v601_v57  ;;  %v600_v9 = vld [vmem:[%s4937_s23 + $0x4c8] sm:$0xff]  ;;  %v631_v11 = vld [vmem:[%s4937_s23 + $0x5c0] sm:$0xff]  ;;  %v597_v26 = vld [vmem:[%s4937_s23 + $0x4b0] sm:$0xff]  ;;  %v3665_v29 = vcombine.high %v5180_v6, %v5185_v2 }
  0x56   : > { %v5197_v13 = vld [vmem:[%s6160_s2] sm:$0xff]  ;;  %v5204_v16 = vld [vmem:[%s6159_s1 + $0x28] sm:$0xff]  ;;  %v598_v27 = vld [vmem:[%s4937_s23 + $0x4b8] sm:$0xff] }
  0x57   : > { %4105 = vmatpush3.bf16.msra.mxu0 %v737_v4  ;;  %v796_v4 = vpack.c.bf16 %v634_v60, %v633_v59  ;;  %v5209_v17 = vld [vmem:[%s6159_s1 + $0x68] sm:$0xff]  ;;  %869 = vperm.xlu1 %4704, %v5197_v13   ;;  %v615_v23 = vld [vmem:[%s4937_s23 + $0x540] sm:$0xff]  ;;  %v629_v30 = vld [vmem:[%s4937_s23 + $0x5b0] sm:$0xff]  ;;  %v778_v37 = vpack.c.bf16 %v598_v27, %v597_v26 }
  0x58   : > { %4133 = vmatpush3.bf16.msra.mxu1 %v753_v7  ;;  %4106 = vmatprep.subr.bf16.mxu0 %v744_v8  ;;  %v618_v7 = vld [vmem:[%s4937_s23 + $0x558] sm:$0xff]  ;;  %v599_v8 = vld [vmem:[%s4937_s23 + $0x4c0] sm:$0xff]  ;;  %v584_v22 = vld [vmem:[%s4937_s23 + $0x448] sm:$0xff] }
  0x59   : > { %4134 = vmatprep.subr.bf16.mxu1 %v760_v12  ;;  %v632_v12 = vld [vmem:[%s4937_s23 + $0x5c8] sm:$0xff]  ;;  %v630_v33 = vld [vmem:[%s4937_s23 + $0x5b8] sm:$0xff]  ;;  %v581_v38 = vld [vmem:[%s4937_s23 + $0x430] sm:$0xff] }
  0x5a   : > { %v795_v24 = vpack.c.bf16 %v632_v12, %v631_v11  ;;  %v582_v39 = vld [vmem:[%s4937_s23 + $0x438] sm:$0xff]  ;;  %v613_v40 = vld [vmem:[%s4937_s23 + $0x530] sm:$0xff]  ;;  %v595_v43 = vld [vmem:[%s4937_s23 + $0x4a0] sm:$0xff] }
  0x5b   : > { %4107 = vmatpush3.bf16.msra.mxu0 %v736_v18  ;;  %v788_v18 = vpack.c.bf16 %v618_v7, %v617_v5  ;;  %v614_v42 = vld [vmem:[%s4937_s23 + $0x538] sm:$0xff]  ;;  %v596_v44 = vld [vmem:[%s4937_s23 + $0x4a8] sm:$0xff]  ;;  %v770_v47 = vpack.c.bf16 %v582_v39, %v581_v38  ;;  %v611_v20 = vld [vmem:[%s4937_s23 + $0x520] sm:$0xff] }
  0x5c   : > { %4135 = vmatpush3.bf16.msra.mxu1 %v752_v19  ;;  %4108 = vmatprep.subr.bf16.mxu0 %v743_v21  ;;  %v779_v19 = vpack.c.bf16 %v600_v9, %v599_v8  ;;  %v583_v21 = vld [vmem:[%s4937_s23 + $0x440] sm:$0xff]  ;;  %v628_v46 = vld [vmem:[%s4937_s23 + $0x5a8] sm:$0xff]  ;;  %v786_v48 = vpack.c.bf16 %v614_v42, %v613_v40  ;;  %v593_v53 = vld [vmem:[%s4937_s23 + $0x490] sm:$0xff] }
  0x5d   : > { %4136 = vmatprep.subr.bf16.mxu1 %v759_v25  ;;  %v616_v25 = vld [vmem:[%s4937_s23 + $0x548] sm:$0xff]  ;;  %v594_v31 = vld [vmem:[%s4937_s23 + $0x498] sm:$0xff]  ;;  %v625_v32 = vld [vmem:[%s4937_s23 + $0x590] sm:$0xff] }
  0x5e   : > { %v580_v51 = vld [vmem:[%s4937_s23 + $0x428] sm:$0xff]  ;;  %v776_v58 = vpack.c.bf16 %v594_v31, %v593_v53  ;;  %v577_v59 = vld [vmem:[%s4937_s23 + $0x410] sm:$0xff]  ;;  %v578_v60 = vld [vmem:[%s4937_s23 + $0x418] sm:$0xff] }
  0x5f   : > { %4109 = vmatpush3.bf16.msra.mxu0 %v735_v34  ;;  %v3667_v34 = vcombine.high %v5204_v16, %v5209_v17  ;;  %v592_v1 = vld [vmem:[%s4937_s23 + $0x488] sm:$0xff]  ;;  %v623_v3 = vld [vmem:[%s4937_s23 + $0x580] sm:$0xff]  ;;  %v5258_v8 = vld [vmem:[%s6160_s2 + $0x10] sm:$0xff] }
  0x60   : > { %4137 = vmatpush3.bf16.msra.mxu1 %v751_v35  ;;  %4150 = vmatprep.subr.bf16.mxu0 %v782_v36  ;;  %v771_v35 = vpack.c.bf16 %v584_v22, %v583_v21  ;;  %v787_v36 = vpack.c.bf16 %v616_v25, %v615_v23  ;;  %v624_v5 = vld [vmem:[%s4937_s23 + $0x588] sm:$0xff]  ;;  %v575_v7 = vld [vmem:[%s4937_s23 + $0x400] sm:$0xff]  ;;  %v701_v21 = vld [vmem:[%s4937_s23 + $0x7f0] sm:$0xff] }
  0x61   : > { %4178 = vmatprep.subr.bf16.mxu1 %v798_v41  ;;  %v794_v41 = vpack.c.bf16 %v630_v33, %v629_v30  ;;  %v576_v11 = vld [vmem:[%s4937_s23 + $0x408] sm:$0xff]  ;;  %v607_v12 = vld [vmem:[%s4937_s23 + $0x500] sm:$0xff]  ;;  %v702_v22 = vld [vmem:[%s4937_s23 + $0x7f8] sm:$0xff] }
  0x62   : > { %1178 = vmatmul.mubr.bf16.vlgmr.msra.gmra.mxu0 %v3660_v45  ;;  %v627_v45 = vld [vmem:[%s4937_s23 + $0x5a0] sm:$0xff]  ;;  %v5271_v23 = vld [vmem:[%s6162_s4 + $0x18] sm:$0xff]  ;;  %v767_v25 = vpack.c.bf16 %v576_v11, %v575_v7  ;;  %v653_v26 = vld [vmem:[%s4937_s23 + $0x670] sm:$0xff] }
  0x63   : > { %1227 = vmatmul.mubr.bf16.vlgmr.msra.gmra.mxu1 %v3662_v49  ;;  %4151 = vmatpush3.bf16.msra.mxu0 %v774_v50  ;;  %v777_v49 = vpack.c.bf16 %v596_v44, %v595_v43  ;;  %v579_v50 = vld [vmem:[%s4937_s23 + $0x420] sm:$0xff]  ;;  %v654_v27 = vld [vmem:[%s4937_s23 + $0x678] sm:$0xff]  ;;  %v668_v38 = vld [vmem:[%s4937_s23 + $0x6e8] sm:$0xff] }
  0x64   : > { %4179 = vmatpush3.bf16.msra.mxu1 %v790_v28  ;;  %4152 = vmatprep.subr.bf16.mxu0 %v781_v52  ;;  %v793_v28 = vpack.c.bf16 %v628_v46, %v627_v45  ;;  %v612_v52 = vld [vmem:[%s4937_s23 + $0x528] sm:$0xff]  ;;  %v769_v55 = vpack.c.bf16 %v580_v51, %v579_v50  ;;  %v699_v39 = vld [vmem:[%s4937_s23 + $0x7e0] sm:$0xff]  ;;  %v697_v53 = vld [vmem:[%s4937_s23 + $0x7d0] sm:$0xff] }
  0x65   : > { %4180 = vmatprep.subr.bf16.mxu1 %v797_v54  ;;  %1185 = vmatprep.mubr.bf16.mxu0 %v3677_v56  ;;  %v626_v54 = vld [vmem:[%s4937_s23 + $0x598] sm:$0xff]  ;;  %v785_v57 = vpack.c.bf16 %v612_v52, %v611_v20  ;;  %v700_v40 = vld [vmem:[%s4937_s23 + $0x7e8] sm:$0xff]  ;;  %v5298_v42 = vld [vmem:[%s6159_s1 + $0xa0] sm:$0xff] }
  0x66   : > { %1234 = vmatprep.mubr.bf16.mxu1 %v3679_v61  ;;  %v5243_v56 = vld [vmem:[%s6160_s2 + $0x18] sm:$0xff]  ;;  %v609_v61 = vld [vmem:[%s4937_s23 + $0x510] sm:$0xff]  ;;  %v5303_v43 = vld [vmem:[%s6159_s1 + $0xe0] sm:$0xff]  ;;  %v829_v50 = vpack.c.bf16 %v700_v40, %v699_v39 }
  0x67   : > { %4153 = vmatpush3.bf16.msra.mxu0 %v773_v62  ;;  %v792_v62 = vpack.c.bf16 %v626_v54, %v625_v32  ;;  %884 = vperm.xlu0 %4703, %v5243_v56   ;;  %v5308_v44 = vld [vmem:[%s6162_s4 + $0x8] sm:$0xff]  ;;  %v3681_v20 = vcombine.high %v5298_v42, %v5303_v43  ;;  %v666_v52 = vld [vmem:[%s4937_s23 + $0x6d8] sm:$0xff]  ;;  %v645_v40 = vld [vmem:[%s4937_s23 + $0x630] sm:$0xff] }
  0x68   : > { %4181 = vmatpush3.bf16.msra.mxu1 %v789_v63  ;;  %4154 = vmatprep.subr.bf16.mxu0 %v780_v0  ;;  %v610_v63 = vld [vmem:[%s4937_s23 + $0x518] sm:$0xff]  ;;  %v591_v0 = vld [vmem:[%s4937_s23 + $0x480] sm:$0xff]  ;;  %v5315_v45 = vld [vmem:[%s6159_s1 + $0xa8] sm:$0xff] }
  0x69   : > { %4182 = vmatprep.subr.bf16.mxu1 %v796_v4  ;;  %v768_v4 = vpack.c.bf16 %v578_v60, %v577_v59  ;;  %v784_v9 = vpack.c.bf16 %v610_v63, %v609_v61  ;;  %v5320_v46 = vld [vmem:[%s6159_s1 + $0xe8] sm:$0xff]  ;;  %v698_v31 = vld [vmem:[%s4937_s23 + $0x7d8] sm:$0xff]  ;;  %v681_v61 = vld [vmem:[%s4937_s23 + $0x750] sm:$0xff] }
  0x6a   : > { %1186 = vmatmul.mubr.bf16.gmra.mxu0 %v3676_v10  ;;  %v775_v10 = vpack.c.bf16 %v592_v1, %v591_v0  ;;  %v684_v51 = vld [vmem:[%s4937_s23 + $0x768] sm:$0xff]  ;;  %v3683_v32 = vcombine.high %v5315_v45, %v5320_v46  ;;  %v5348_v63 = vld [vmem:[%s6162_s4 + $0x30] sm:$0xff]  ;;  %v828_v0 = vpack.c.bf16 %v698_v31, %v697_v53  ;;  %v663_v1 = vld [vmem:[%s4937_s23 + $0x6c0] sm:$0xff] }
  0x6b   : > { %4155 = vmatpush3.bf16.msra.mxu0 %v772_v14  ;;  %1235 = vmatmul.mubr.bf16.gmra.mxu1 %v3678_v15  ;;  %v608_v14 = vld [vmem:[%s4937_s23 + $0x508] sm:$0xff]  ;;  %v791_v15 = vpack.c.bf16 %v624_v5, %v623_v3  ;;  %v695_v5 = vld [vmem:[%s4937_s23 + $0x7c0] sm:$0xff] }
  0x6c   : > { %4183 = vmatpush3.bf16.msra.mxu1 %v788_v18  ;;  %4156 = vmatprep.subr.bf16.mxu0 %v779_v19  ;;  %v669_v18 = vld [vmem:[%s4937_s23 + $0x6f0] sm:$0xff]  ;;  %v670_v19 = vld [vmem:[%s4937_s23 + $0x6f8] sm:$0xff]  ;;  %v783_v30 = vpack.c.bf16 %v608_v14, %v607_v12  ;;  %v664_v3 = vld [vmem:[%s4937_s23 + $0x6c8] sm:$0xff]  ;;  %v3682_v12 = vcombine.low %v5315_v45, %v5320_v46 }
  0x6d   : > { %4184 = vmatprep.subr.bf16.mxu1 %v795_v24  ;;  %1275 = vmatprep.mubr.bf16.mxu0 %v3665_v29  ;;  %v5276_v24 = vld [vmem:[%s6162_s4 + $0x10] sm:$0xff]  ;;  %v814_v33 = vpack.c.bf16 %v670_v19, %v669_v18  ;;  %v696_v7 = vld [vmem:[%s4937_s23 + $0x7c8] sm:$0xff]  ;;  %v5372_v14 = vld [vmem:[%s6159_s1 + $0x38] sm:$0xff] }
  0x6e   : > { %1324 = vmatprep.mubr.bf16.mxu1 %v3667_v34  ;;  %879 = vperm.xlu0 %4703, %v5258_v8   ;;  %v685_v29 = vld [vmem:[%s4937_s23 + $0x770] sm:$0xff]  ;;  %v686_v34 = vld [vmem:[%s4937_s23 + $0x778] sm:$0xff]  ;;  %v5382_v18 = vld [vmem:[%s6162_s4 + $0x28] sm:$0xff] }
  0x6f   : > { %4157 = vmatpush3.bf16.msra.mxu0 %v771_v35  ;;  %1463 = vperm.xlu1 %4704, %v5276_v24   ;;  %v667_v35 = vld [vmem:[%s4937_s23 + $0x6e0] sm:$0xff]  ;;  %v644_v53 = vld [vmem:[%s4937_s23 + $0x628] sm:$0xff] }
  0x70   : > { %4185 = vmatpush3.bf16.msra.mxu1 %v787_v36  ;;  %4158 = vmatprep.subr.bf16.mxu0 %v778_v37  ;;  %v5287_v36 = vld [vmem:[%s6162_s4] sm:$0xff]  ;;  %v830_v37 = vpack.c.bf16 %v702_v22, %v701_v21  ;;  %v811_v21 = vpack.c.bf16 %v664_v3, %v663_v1  ;;  %v641_v3 = vld [vmem:[%s4937_s23 + $0x610] sm:$0xff] }
  0x71   : > { %4186 = vmatprep.subr.bf16.mxu1 %v794_v41  ;;  %v3664_v41 = vcombine.low %v5180_v6, %v5185_v2  ;;  %v3666_v6 = vcombine.low %v5204_v16, %v5209_v17  ;;  %v806_v2 = vpack.c.bf16 %v654_v27, %v653_v26  ;;  %v822_v16 = vpack.c.bf16 %v686_v34, %v685_v29  ;;  %v647_v22 = vld [vmem:[%s4937_s23 + $0x640] sm:$0xff]  ;;  %v680_v29 = vld [vmem:[%s4937_s23 + $0x748] sm:$0xff] }
  0x72   : > { %1468 = vperm.xlu0 %4703, %v5271_v23   ;;  %v813_v17 = vpack.c.bf16 %v668_v38, %v667_v35  ;;  %v679_v26 = vld [vmem:[%s4937_s23 + $0x740] sm:$0xff]  ;;  %v827_v27 = vpack.c.bf16 %v696_v7, %v695_v5  ;;  %v693_v35 = vld [vmem:[%s4937_s23 + $0x7b0] sm:$0xff]  ;;  %v642_v5 = vld [vmem:[%s4937_s23 + $0x618] sm:$0xff] }
  0x73   : > { %4159 = vmatpush3.bf16.msra.mxu0 %v770_v47  ;;  %1453 = vperm.xlu1 %4704, %v5287_v36   ;;  %v651_v47 = vld [vmem:[%s4937_s23 + $0x660] sm:$0xff] }
  0x74   : > { %4187 = vmatpush3.bf16.msra.mxu1 %v786_v48  ;;  %4160 = vmatprep.subr.bf16.mxu0 %v777_v49  ;;  %v652_v48 = vld [vmem:[%s4937_s23 + $0x668] sm:$0xff]  ;;  %v683_v49 = vld [vmem:[%s4937_s23 + $0x760] sm:$0xff] }
  0x75   : > { %4188 = vmatprep.subr.bf16.mxu1 %v793_v28  ;;  %v665_v28 = vld [vmem:[%s4937_s23 + $0x6d0] sm:$0xff]  ;;  %v805_v54 = vpack.c.bf16 %v652_v48, %v651_v47  ;;  %v821_v59 = vpack.c.bf16 %v684_v51, %v683_v49  ;;  %v5409_v45 = vld [vmem:[%s6162_s4 + $0x20] sm:$0xff]  ;;  %v660_v47 = vld [vmem:[%s4937_s23 + $0x6a8] sm:$0xff] }
  0x76   : > { %1458 = vperm.xlu0 %4703, %v5308_v44   ;;  %v812_v60 = vpack.c.bf16 %v666_v52, %v665_v28  ;;  %v691_v48 = vld [vmem:[%s4937_s23 + $0x7a0] sm:$0xff]  ;;  %v692_v49 = vld [vmem:[%s4937_s23 + $0x7a8] sm:$0xff] }
  0x77   : > { %4161 = vmatpush3.bf16.msra.mxu0 %v769_v55  ;;  %v649_v55 = vld [vmem:[%s4937_s23 + $0x650] sm:$0xff]  ;;  %1603 = vperm.xlu1 %4704, %v5348_v63   ;;  %v643_v51 = vld [vmem:[%s4937_s23 + $0x620] sm:$0xff] }
  0x78   : > { %4189 = vmatpush3.bf16.msra.mxu1 %v785_v57  ;;  %4162 = vmatprep.subr.bf16.mxu0 %v776_v58  ;;  %v650_v57 = vld [vmem:[%s4937_s23 + $0x658] sm:$0xff]  ;;  %v675_v31 = vld [vmem:[%s4937_s23 + $0x720] sm:$0xff] }
  0x79   : > { %4190 = vmatprep.subr.bf16.mxu1 %v792_v62  ;;  %v5341_v58 = vld [vmem:[%s6162_s4 + $0x38] sm:$0xff]  ;;  %v804_v11 = vpack.c.bf16 %v650_v57, %v649_v55  ;;  %v676_v55 = vld [vmem:[%s4937_s23 + $0x728] sm:$0xff]  ;;  %v657_v57 = vld [vmem:[%s4937_s23 + $0x690] sm:$0xff] }
  0x7a   : > { %v682_v62 = vld [vmem:[%s4937_s23 + $0x758] sm:$0xff]  ;;  %1608 = vperm.xlu0 %4703, %v5341_v58  }
  0x7b   : > { %4163 = vmatpush3.bf16.msra.mxu0 %v768_v4  ;;  %v3680_v4 = vcombine.low %v5298_v42, %v5303_v43  ;;  %v820_v19 = vpack.c.bf16 %v682_v62, %v681_v61  ;;  %v819_v42 = vpack.c.bf16 %v680_v29, %v679_v26  ;;  %1593 = vperm.xlu1 %4704, %v5409_v45   ;;  %v690_v61 = vld [vmem:[%s4937_s23 + $0x798] sm:$0xff]  ;;  %v639_v29 = vld [vmem:[%s4937_s23 + $0x600] sm:$0xff] }
  0x7c   : > { %4191 = vmatpush3.bf16.msra.mxu1 %v784_v9  ;;  %4164 = vmatprep.subr.bf16.mxu0 %v775_v10  ;;  %v5359_v9 = vld [vmem:[%s6159_s1 + $0x30] sm:$0xff]  ;;  %v801_v62 = vpack.c.bf16 %v644_v53, %v643_v51 }
  0x7d   : > { %4192 = vmatprep.subr.bf16.mxu1 %v791_v15  ;;  %v5364_v10 = vld [vmem:[%s6159_s1 + $0x70] sm:$0xff]  ;;  %v5377_v15 = vld [vmem:[%s6159_s1 + $0x78] sm:$0xff] }
  0x7e   : > { %v3669_v34 = vcombine.high %v5359_v9, %v5364_v10  ;;  %v3671_v38 = vcombine.high %v5372_v14, %v5377_v15  ;;  %1598 = vperm.xlu0 %4703, %v5382_v18  }
  0x7f   : > { %4165 = vmatpush3.bf16.msra.mxu0 %v767_v25  ;;  %v648_v25 = vld [vmem:[%s4937_s23 + $0x648] sm:$0xff] }
  0x80   : > { %4193 = vmatpush3.bf16.msra.mxu1 %v783_v30  ;;  %4206 = vmatprep.subr.bf16.mxu0 %v814_v33  ;;  %v661_v30 = vld [vmem:[%s4937_s23 + $0x6b0] sm:$0xff]  ;;  %v662_v33 = vld [vmem:[%s4937_s23 + $0x6b8] sm:$0xff]  ;;  %v803_v39 = vpack.c.bf16 %v648_v25, %v647_v22  ;;  %v688_v22 = vld [vmem:[%s4937_s23 + $0x788] sm:$0xff]  ;;  %v800_v25 = vpack.c.bf16 %v642_v5, %v641_v3 }
  0x81   : > { %4234 = vmatprep.subr.bf16.mxu1 %v830_v37  ;;  %v694_v37 = vld [vmem:[%s4937_s23 + $0x7b8] sm:$0xff]  ;;  %v810_v43 = vpack.c.bf16 %v662_v33, %v661_v30  ;;  %v640_v30 = vld [vmem:[%s4937_s23 + $0x608] sm:$0xff] }
  0x82   : > { %1276 = vmatmul.mubr.bf16.vlgmr.msra.gmra.mxu0 %v3664_v41  ;;  %v5402_v41 = vld [vmem:[%s6164_s6 + $0x8] sm:$0xff]  ;;  %v826_v46 = vpack.c.bf16 %v694_v37, %v693_v35  ;;  %v799_v37 = vpack.c.bf16 %v640_v30, %v639_v29 }
  0x83   : > { %1325 = vmatmul.mubr.bf16.vlgmr.msra.gmra.mxu1 %v3666_v6  ;;  %4207 = vmatpush3.bf16.msra.mxu0 %v806_v2  ;;  %v646_v6 = vld [vmem:[%s4937_s23 + $0x638] sm:$0xff]  ;;  %v677_v2 = vld [vmem:[%s4937_s23 + $0x730] sm:$0xff]  ;;  %v672_v35 = vld [vmem:[%s4937_s23 + $0x708] sm:$0xff] }
  0x84   : > { %4235 = vmatpush3.bf16.msra.mxu1 %v822_v16  ;;  %4208 = vmatprep.subr.bf16.mxu0 %v813_v17  ;;  %v678_v16 = vld [vmem:[%s4937_s23 + $0x738] sm:$0xff]  ;;  %v659_v17 = vld [vmem:[%s4937_s23 + $0x6a0] sm:$0xff] }
  0x85   : > { %4236 = vmatprep.subr.bf16.mxu1 %v829_v50  ;;  %1283 = vmatprep.mubr.bf16.mxu0 %v3681_v20  ;;  %v802_v50 = vpack.c.bf16 %v646_v6, %v645_v40  ;;  %v5422_v20 = vld [vmem:[%s6166_s8] sm:$0xff]  ;;  %v818_v28 = vpack.c.bf16 %v678_v16, %v677_v2  ;;  %v809_v52 = vpack.c.bf16 %v660_v47, %v659_v17  ;;  %v862_v40 = vld [vmem:[%s6159_s1 + $0xf8] sm:$0xff] }
  0x86   : > { %1332 = vmatprep.mubr.bf16.mxu1 %v3683_v32  ;;  %1731 = vperm.xlu0 %4703, %v5402_v41   ;;  %v5429_v32 = vld [vmem:[%s6164_s6] sm:$0xff] }
  0x87   : > { %4209 = vmatpush3.bf16.msra.mxu0 %v805_v54  ;;  %v825_v54 = vpack.c.bf16 %v692_v49, %v691_v48  ;;  %1726 = vperm.xlu1 %4704, %v5429_v32  }
  0x88   : > { %4237 = vmatpush3.bf16.msra.mxu1 %v821_v59  ;;  %4210 = vmatprep.subr.bf16.mxu0 %v812_v60  ;;  %v658_v59 = vld [vmem:[%s4937_s23 + $0x698] sm:$0xff]  ;;  %v689_v60 = vld [vmem:[%s4937_s23 + $0x790] sm:$0xff] }
  0x89   : > { %4238 = vmatprep.subr.bf16.mxu1 %v828_v0  ;;  %v817_v0 = vpack.c.bf16 %v676_v55, %v675_v31  ;;  %v808_v1 = vpack.c.bf16 %v658_v59, %v657_v57  ;;  %v824_v7 = vpack.c.bf16 %v690_v61, %v689_v60 }
  0x8a   : > { %1284 = vmatmul.mubr.bf16.gmra.mxu0 %v3680_v4  ;;  %1821 = vperm.xlu0 %4703, %v5422_v20   ;;  %v673_v4 = vld [vmem:[%s4937_s23 + $0x710] sm:$0xff] }
  0x8b   : > { %4211 = vmatpush3.bf16.msra.mxu0 %v804_v11  ;;  %1333 = vmatmul.mubr.bf16.gmra.mxu1 %v3682_v12  ;;  %v674_v11 = vld [vmem:[%s4937_s23 + $0x718] sm:$0xff]  ;;  %v655_v12 = vld [vmem:[%s4937_s23 + $0x680] sm:$0xff] }
  0x8c   : > { %4239 = vmatpush3.bf16.msra.mxu1 %v820_v19  ;;  %4212 = vmatprep.subr.bf16.mxu0 %v811_v21  ;;  %v656_v19 = vld [vmem:[%s4937_s23 + $0x688] sm:$0xff]  ;;  %v687_v21 = vld [vmem:[%s4937_s23 + $0x780] sm:$0xff]  ;;  %v816_v26 = vpack.c.bf16 %v674_v11, %v673_v4 }
  0x8d   : > { %4240 = vmatprep.subr.bf16.mxu1 %v827_v27  ;;  %1373 = vmatprep.mubr.bf16.mxu0 %v3669_v34  ;;  %v807_v27 = vpack.c.bf16 %v656_v19, %v655_v12  ;;  %v823_v33 = vpack.c.bf16 %v688_v22, %v687_v21  ;;  %v671_v34 = vld [vmem:[%s4937_s23 + $0x700] sm:$0xff] }
  0x8e   : > { %1422 = vmatprep.mubr.bf16.mxu1 %v3671_v38  ;;  %2431 = vperm.xlu0 %4703, %v5258_v8   ;;  %v4705_v8 = vld [vmem:[%s6160_s2 + $0x8] sm:$0xff]  ;;  %v853_v38 = vld [vmem:[%s6159_s1 + $0xb0] sm:$0xff] }
  0x8f   : > { %4213 = vmatpush3.bf16.msra.mxu0 %v803_v39  ;;  %2436 = vperm.xlu1 %4704, %v5243_v56   ;;  %v815_v56 = vpack.c.bf16 %v672_v35, %v671_v34  ;;  %v861_v39 = vld [vmem:[%s6159_s1 + $0xf0] sm:$0xff] }
  0x90   : > { %4241 = vmatpush3.bf16.msra.mxu1 %v819_v42  ;;  %4214 = vmatprep.subr.bf16.mxu0 %v810_v43  ;;  %v3668_v42 = vcombine.low %v5359_v9, %v5364_v10  ;;  %v3670_v43 = vcombine.low %v5372_v14, %v5377_v15  ;;  %v3685_v6 = vcombine.high %v853_v38, %v861_v39 }
  0x91   : > { %4242 = vmatprep.subr.bf16.mxu1 %v826_v46  ;;  %v3684_v9 = vcombine.low %v853_v38, %v861_v39 }
  0x92   : > { %2421 = vperm.xlu0 %4703, %v5197_v13   ;;  %v854_v13 = vld [vmem:[%s6159_s1 + $0xb8] sm:$0xff] }
  0x93   : > { %4215 = vmatpush3.bf16.msra.mxu0 %v802_v50  ;;  %2426 = vperm.xlu1 %4704, %v4705_v8   ;;  %v3687_v2 = vcombine.high %v854_v13, %v862_v40 }
  0x94   : > { %4243 = vmatpush3.bf16.msra.mxu1 %v818_v28  ;;  %4216 = vmatprep.subr.bf16.mxu0 %v809_v52 }
  0x95   : > { %4244 = vmatprep.subr.bf16.mxu1 %v825_v54  ;;  %v875_v30 = vpop.permute.xlu1 %874 }
  0x96   : > { %3015 = vperm.xlu0 %4703, %v5276_v24   ;;  %v3686_v24 = vcombine.low %v854_v13, %v862_v40 }
  0x97   : > { %4217 = vmatpush3.bf16.msra.mxu0 %v801_v62  ;;  %3020 = vperm.xlu1 %4704, %v5271_v23   ;;  %v1901_v23 = vld [vmem:[%s6168_s10] sm:$0xff] }
  0x98   : > { %4245 = vmatpush3.bf16.msra.mxu1 %v817_v0  ;;  %4218 = vmatprep.subr.bf16.mxu0 %v808_v1 }
  0x99   : > { %4246 = vmatprep.subr.bf16.mxu1 %v824_v7 }
  0x9a   : > { %3005 = vperm.xlu0 %4703, %v5287_v36   ;;  %v1902_v36 = vld [vmem:[%s6168_s10 + $0x8] sm:$0xff] }
  0x9b   : > { %4219 = vmatpush3.bf16.msra.mxu0 %v800_v25  ;;  %3010 = vperm.xlu1 %4704, %v5308_v44   ;;  %v1443_v44 = vld [vmem:[%s6161_s3] sm:$0xff] }
  0x9c   : > { %4247 = vmatpush3.bf16.msra.mxu1 %v816_v26  ;;  %4220 = vmatprep.subr.bf16.mxu0 %v807_v27 }
  0x9d   : > { %4248 = vmatprep.subr.bf16.mxu1 %v823_v33 }
  0x9e   : > { %3152 = vperm.xlu0 %4703, %v5348_v63  }
  0x9f   : > { %4221 = vmatpush3.bf16.msra.mxu0 %v799_v37  ;;  %3157 = vperm.xlu1 %4704, %v5341_v58  }
  0xa0   : > { %4249 = vmatpush3.bf16.msra.mxu1 %v815_v56 }
  0xa2   : > { %1374 = vmatmul.mubr.bf16.vlgmr.msra.gmra.mxu0 %v3668_v42  ;;  %3142 = vperm.xlu0 %4703, %v5409_v45  }
  0xa3   : > { %1423 = vmatmul.mubr.bf16.vlgmr.msra.gmra.mxu1 %v3670_v43  ;;  %1381 = vmatprep.mubr.bf16.mxu0 %v3685_v6 }
  0xa4   : > { %1430 = vmatprep.mubr.bf16.mxu1 %v3687_v2  ;;  %3147 = vperm.xlu1 %4704, %v5382_v18  }
  0xa6   : > { %3275 = vperm.xlu0 %4703, %v5429_v32  }
  0xa8   : > { %3280 = vperm.xlu1 %4704, %v5402_v41  }
  0xaa   : > { %1382 = vmatmul.mubr.bf16.gmra.mxu0 %v3684_v9  ;;  %1905 = vperm.xlu0 %4703, %v1901_v23  }
  0xab   : > { %1431 = vmatmul.mubr.bf16.gmra.mxu1 %v3686_v24  ;;  %4550 = vmatprep.mubr.msk.f32.mxu0 %vm1471_vm0, %v1443_v44 }
  0xac   : > { %3370 = vperm.xlu1 %4704, %v5422_v20  }
  0xae   : > { %3453 = vperm.xlu0 %4703, %v1901_v23  }
  0xb0   : > { %1910 = vperm.xlu1 %4704, %v1902_v36  }
  0xb4   : > { %3458 = vperm.xlu1 %4704, %v1902_v36  }
  0xd2   : > { %v870_v13 = vpop.permute.xlu1 %869 }
  0xe2   : > { %v885_v27 = vpop.permute.xlu0 %884 }
  0xe9   : > { %v880_v37 = vpop.permute.xlu0 %879 }
 0x102   : > { %v4054_v58 = vpop.f32.mrf.mxu0 }
 0x103   : > { %v4082_v10 = vpop.f32.mrf.mxu1 }
 0x104   : > { %v4055_v63 = vpop.f32.mrf.mxu0 }
 0x105   : > { %v4083_v15 = vpop.f32.mrf.mxu1  ;;  %v4056_v39 = vadd.f32 %v4055_v63, %v4054_v58 }
 0x106   : > { %v4057_v14 = vpop.f32.mrf.mxu0  ;;  %v4084_v36 = vadd.f32 %v4083_v15, %v4082_v10 }
 0x107   : > { %v4085_v41 = vpop.f32.mrf.mxu1  ;;  %v1082_v44 = vadd.f32 %v4056_v39, %v870_v13 }
 0x108   : > { %v4058_v18 = vpop.f32.mrf.mxu0 }
 0x109   : > { %v4086_v46 = vpop.f32.mrf.mxu1  ;;  %v4059_v35 = vadd.f32 %v4058_v18, %v4057_v14 }
 0x10a   : > { %v4060_v45 = vpop.f32.mrf.mxu0 }
 0x10b   : > { %v4088_v17 = vpop.f32.mrf.mxu1  ;;  %v1085_v43 = vadd.f32 %v4059_v35, %v875_v30 }
 0x10c   : > { %v4061_v16 = vpop.f32.mrf.mxu0 }
 0x10d   : > { %v4089_v48 = vpop.f32.mrf.mxu1  ;;  %v4062_v34 = vadd.f32 %v4061_v16, %v4060_v45 }
 0x10e   : > { %v4063_v47 = vpop.f32.mrf.mxu0  ;;  %v4090_v40 = vadd.f32 %v4089_v48, %v4088_v17 }
 0x10f   : > { %v4091_v50 = vpop.f32.mrf.mxu1  ;;  %v1090_v42 = vadd.f32 %v4062_v34, %v880_v37  ;;  %v1131_v34 = vadd.f32 %v4084_v36, %v1082_v44 }
 0x110   : > { %v4064_v49 = vpop.f32.mrf.mxu0 }
 0x111   : > { %v4092_v20 = vpop.f32.mrf.mxu1  ;;  %v4065_v56 = vadd.f32 %v4064_v49, %v4063_v47  ;;  %v1139_v14 = vadd.f32 %v4090_v40, %v1090_v42 }
 0x112   : > { %v4093_v9 = vadd.f32 %v4092_v20, %v4091_v50 }
 0x113   : > { %v1093_v2 = vadd.f32 %v4065_v56, %v885_v27 }
 0x115   : > { %v1142_v63 = vadd.f32 %v4093_v9, %v1093_v2 }
 0x122   : > { %v4110_v51 = vpop.f32.mrf.mxu0 }
 0x123   : > { %v5493_v52 = vpop.f32.mrf.mxu1 }
 0x124   : > { %v4111_v28 = vpop.f32.mrf.mxu0 }
 0x125   : > { %v5495_v31 = vpop.f32.mrf.mxu1  ;;  %v4112_v49 = vadd.f32 %v4111_v28, %v4110_v51 }
 0x126   : > { %v4113_v53 = vpop.f32.mrf.mxu0 }
 0x127   : > { %v5497_v54 = vpop.f32.mrf.mxu1 }
 0x128   : > { %v4114_v32 = vpop.f32.mrf.mxu0 }
 0x129   : > { %v4142_v57 = vpop.f32.mrf.mxu1 }
 0x12a   : > { %v4116_v55 = vpop.f32.mrf.mxu0 }
 0x12b   : > { %v4144_v59 = vpop.f32.mrf.mxu1 }
 0x12c   : > { %v4117_v60 = vpop.f32.mrf.mxu0 }
 0x12d   : > { %v4145_v61 = vpop.f32.mrf.mxu1  ;;  %v4118_v24 = vadd.f32 %v4117_v60, %v4116_v55 }
 0x12e   : > { %v4119_v62 = vpop.f32.mrf.mxu0  ;;  %v4146_v48 = vadd.f32 %v4145_v61, %v4144_v59 }
 0x12f   : > { %v4147_v0 = vpop.f32.mrf.mxu1  ;;  %v1188_v17 = vadd.f32 %v4118_v24, %v1139_v14 }
 0x130   : > { %v4120_v1 = vpop.f32.mrf.mxu0 }
 0x131   : > { %v4148_v5 = vpop.f32.mrf.mxu1  ;;  %v4121_v18 = vadd.f32 %v4120_v1, %v4119_v62  ;;  %v1237_v28 = vadd.f32 %v4146_v48, %v1188_v17  ;;  %v1444_v48 = vld [vmem:[%s6161_s3 + $0x8] sm:$0xff] }
 0x132   : > { %v4149_v55 = vadd.f32 %v4148_v5, %v4147_v0 }
 0x133   : > { %v1191_v20 = vadd.f32 %v4121_v18, %v1142_v63 }
 0x142   : > { %v4166_v3 = vpop.f32.mrf.mxu0 }
 0x143   : > { %v5499_v4 = vpop.f32.mrf.mxu1 }
 0x144   : > { %v4167_v7 = vpop.f32.mrf.mxu0 }
 0x145   : > { %v5501_v11 = vpop.f32.mrf.mxu1  ;;  %v4168_v61 = vadd.f32 %v4167_v7, %v4166_v3 }
 0x146   : > { %v4169_v12 = vpop.f32.mrf.mxu0 }
 0x147   : > { %v5503_v19 = vpop.f32.mrf.mxu1 }
 0x148   : > { %6178 = vst [vmem:[#allocation6_spill] sm:$0xff] %v5503_v19  ;;  %v4170_v21 = vpop.f32.mrf.mxu0  ;;  %v4115_v19 = vadd.f32 %v4114_v32, %v4113_v53  ;;  %v4143_v53 = vadd.f32 %v4142_v57, %v5497_v54  ;;  %v4196_v57 = vadd.f32 %v5501_v11, %v5499_v4 }
 0x149   : > { %v5505_v22 = vpop.f32.mrf.mxu1  ;;  %v4171_v32 = vadd.f32 %v4170_v21, %v4169_v12 }
 0x14a   : > { %6179 = vst [vmem:[#allocation7_spill] sm:$0xff] %v5505_v22  ;;  %v4172_v25 = vpop.f32.mrf.mxu0  ;;  %v4087_v22 = vadd.f32 %v4086_v46, %v4085_v41  ;;  %v1180_v41 = vadd.f32 %v4112_v49, %v1131_v34  ;;  %v4140_v46 = vadd.f32 %v5495_v31, %v5493_v52  ;;  %v3692_v34 = vld [vmem:[%s6161_s3 + $0x20] sm:$0xff] }
 0x14b   : > { %v4200_v26 = vpop.f32.mrf.mxu1  ;;  %4564 = vmatprep.mubr.msk.f32.mxu1 %vm1471_vm0, %v3692_v34  ;;  %v1817_v34 = vld [vmem:[%s6165_s7] sm:$0xff] }
 0x14c   : > { %v4173_v29 = vpop.f32.mrf.mxu0  ;;  %v1134_v47 = vadd.f32 %v4087_v22, %v1085_v43  ;;  %v1229_v5 = vadd.f32 %v4140_v46, %v1180_v41 }
 0x14d   : > { %v4201_v33 = vpop.f32.mrf.mxu1  ;;  %v4174_v10 = vadd.f32 %v4173_v29, %v4172_v25 }
 0x14e   : > { %v4175_v8 = vpop.f32.mrf.mxu0  ;;  %v1183_v27 = vadd.f32 %v4115_v19, %v1134_v47  ;;  %v1240_v19 = vadd.f32 %v4149_v55, %v1191_v20  ;;  %v4202_v35 = vadd.f32 %v4201_v33, %v4200_v26  ;;  %v1278_v54 = vadd.f32 %v4168_v61, %v1229_v5  ;;  %v3694_v5 = vld [vmem:[%s6161_s3 + $0x30] sm:$0xff] }
 0x14f   : > { %v4203_v38 = vpop.f32.mrf.mxu1  ;;  %v1286_v22 = vadd.f32 %v4174_v10, %v1237_v28  ;;  %v6180_v12 = vld [vmem:[#allocation6_spill] sm:$0xff] }
 0x150   : > { %v4176_v6 = vpop.f32.mrf.mxu0  ;;  %v1232_v59 = vadd.f32 %v4143_v53, %v1183_v27  ;;  %v1327_v2 = vadd.f32 %v4196_v57, %v1278_v54  ;;  %v1469_v27 = vpop.permute.xlu0 %1468 }
 0x151   : > { %v4204_v23 = vpop.f32.mrf.mxu1  ;;  %v4177_v60 = vadd.f32 %v4176_v6, %v4175_v8  ;;  %v6181_v21 = vld [vmem:[#allocation7_spill] sm:$0xff]  ;;  %v1335_v7 = vadd.f32 %v4202_v35, %v1286_v22 }
 0x152   : > { %v1281_v25 = vadd.f32 %v4171_v32, %v1232_v59  ;;  %v4205_v56 = vadd.f32 %v4204_v23, %v4203_v38  ;;  %v4199_v8 = vadd.f32 %v6181_v21, %v6180_v12 }
 0x153   : > { %v1289_v37 = vadd.f32 %v4177_v60, %v1240_v19 }
 0x154   : > { %v1330_v26 = vadd.f32 %v4199_v8, %v1281_v25  ;;  %v1459_v10 = vpop.permute.xlu0 %1458  ;;  %v3695_v25 = vld [vmem:[%s6161_s3 + $0x38] sm:$0xff] }
 0x155   : > { %v1338_v40 = vadd.f32 %v4205_v56, %v1289_v37 }
 0x158   : > { %v1609_v37 = vpop.permute.xlu0 %1608 }
 0x15c   : > { %v1599_v54 = vpop.permute.xlu0 %1598 }
 0x162   : > { %v4222_v45 = vpop.f32.mrf.mxu0 }
 0x163   : > { %v4250_v16 = vpop.f32.mrf.mxu1 }
 0x164   : > { %v4223_v58 = vpop.f32.mrf.mxu0 }
 0x165   : > { %v4251_v30 = vpop.f32.mrf.mxu1  ;;  %v4224_v42 = vadd.f32 %v4223_v58, %v4222_v45 }
 0x166   : > { %v4225_v50 = vpop.f32.mrf.mxu0  ;;  %v4252_v18 = vadd.f32 %v4251_v30, %v4250_v16  ;;  %v1445_v16 = vld [vmem:[%s6161_s3 + $0x10] sm:$0xff]  ;;  %v1446_v30 = vld [vmem:[%s6161_s3 + $0x18] sm:$0xff] }
 0x167   : > { %v4253_v15 = vpop.f32.mrf.mxu1  ;;  %v1376_v4 = vadd.f32 %v4224_v42, %v1327_v2  ;;  %v1721_v2 = vld [vmem:[%s6163_s5 + $0x8] sm:$0xff] }
 0x168   : > { %v4226_v51 = vpop.f32.mrf.mxu0 }
 0x169   : > { %v4254_v62 = vpop.f32.mrf.mxu1  ;;  %v4227_v39 = vadd.f32 %v4226_v51, %v4225_v50  ;;  %v1425_v63 = vadd.f32 %v4252_v18, %v1376_v4  ;;  %v1464_v50 = vpop.permute.xlu1 %1463  ;;  %v3739_v4 = vld [vmem:[%s4937_s23 + $0x8f0] sm:$0xff] }
 0x16a   : > { %v4228_v1 = vpop.f32.mrf.mxu0  ;;  %v4255_v11 = vadd.f32 %v4254_v62, %v4253_v15 }
 0x16b   : > { %v4256_v0 = vpop.f32.mrf.mxu1  ;;  %v1379_v9 = vadd.f32 %v4227_v39, %v1330_v26  ;;  %v1439_v58 = vmax.f32 %v1425_v63, 0.0  ;;  %v5565_v63 = vld [vmem:[%s6159_s1 + $0x40] sm:$0xff] }
 0x16c   : > { %v4229_v29 = vpop.f32.mrf.mxu0 }
 0x16d   : > { %v4230_v52 = vadd.f32 %v4229_v29, %v4228_v1  ;;  %v4257_v31 = vpop.f32.mrf.mxu1  ;;  %v1428_v47 = vadd.f32 %v4255_v11, %v1379_v9  ;;  %v1454_v53 = vpop.permute.xlu1 %1453  ;;  %v1720_v29 = vld [vmem:[%s6163_s5] sm:$0xff]  ;;  %v6171_v9 = vmov 0.0   ;;  %v3740_v11 = vld [vmem:[%s4937_s23 + $0x8f8] sm:$0xff] }
 0x16e   : > { %v4231_v3 = vpop.f32.mrf.mxu0  ;;  %v4258_v24 = vadd.f32 %v4257_v31, %v4256_v0  ;;  %v3693_v0 = vld [vmem:[%s6161_s3 + $0x28] sm:$0xff] }
 0x16f   : > { %v4259_v13 = vpop.f32.mrf.mxu1  ;;  %v1384_v43 = vadd.f32 %v4230_v52, %v1335_v7  ;;  %v1440_v45 = vmax.f32 %v1428_v47, 0.0  ;;  %v3724_v47 = vld [vmem:[%s4937_s23 + $0x878] sm:$0xff] }
 0x170   : > { %v4232_v33 = vpop.f32.mrf.mxu0 }
 0x171   : > { %v4233_v6 = vadd.f32 %v4232_v33, %v4231_v3  ;;  %v4260_v38 = vpop.f32.mrf.mxu1  ;;  %v1433_v44 = vadd.f32 %v4258_v24, %v1384_v43  ;;  %v1604_v56 = vpop.permute.xlu1 %1603 }
 0x172   : > { %v4261_v36 = vadd.f32 %v4260_v38, %v4259_v13  ;;  %v1732_v24 = vpop.permute.xlu0 %1731 }
 0x173   : > { %v1387_v23 = vadd.f32 %v4233_v6, %v1338_v40  ;;  %v1441_v17 = vmax.f32 %v1433_v44, 0.0  ;;  %v3723_v44 = vld [vmem:[%s4937_s23 + $0x870] sm:$0xff] }
 0x175   : > { %v1436_v14 = vadd.f32 %v4261_v36, %v1387_v23  ;;  %v1594_v8 = vpop.permute.xlu1 %1593 }
 0x177   : > { %v1442_v49 = vmax.f32 %v1436_v14, 0.0 }
 0x179   : > { %4542 = vmatprep.subr.mxu0 %v1442_v49  ;;  %v1727_v14 = vpop.permute.xlu1 %1726 }
 0x17a   : > { %4543 = vmatpush3.msra.mxu0 %v1442_v49  ;;  %v5560_v49 = vld [vmem:[%s6159_s1] sm:$0xff] }
 0x17b   : > { %4544 = vmatprep.subr.mxu0 %v1441_v17 }
 0x17c   : > { %4545 = vmatpush3.msra.mxu0 %v1441_v17 }
 0x17d   : > { %4546 = vmatprep.subr.mxu0 %v1440_v45 }
 0x17e   : > { %4547 = vmatpush3.msra.mxu0 %v1440_v45 }
 0x17f   : > { %4548 = vmatprep.subr.mxu0 %v1439_v58 }
 0x180   : > { %4549 = vmatpush3.msra.mxu0 %v1439_v58  ;;  %v3737_v58 = vld [vmem:[%s4937_s23 + $0x8e0] sm:$0xff] }
 0x181   : > { %4551 = vmatmul.mubr.msk.f32.vlgmr.msra.gmra.mxu0 %vm1471_vm0, %v1444_v48  ;;  %v3738_v48 = vld [vmem:[%s4937_s23 + $0x8e8] sm:$0xff] }
 0x182   : > { %4553 = vmatprep.mubr.msk.f32.mxu0 %vm1471_vm0, %v1445_v16  ;;  %v2270_v16 = vpack.c.bf16 %v3740_v11, %v3739_v4  ;;  %v3803_v4 = vld [vmem:[%s4937_s23 + $0xaf0] sm:$0xff]  ;;  %v3804_v11 = vld [vmem:[%s4937_s23 + $0xaf8] sm:$0xff] }
 0x185   : > { %4554 = vmatmul.mubr.msk.f32.gmra.mxu0 %vm1471_vm0, %v1446_v30 }
 0x186   : > { %4578 = vmatprep.mubr.msk.f32.mxu0 %vm1471_vm0, %v1720_v29  ;;  %v3729_v29 = vld [vmem:[%s4937_s23 + $0x8a0] sm:$0xff] }
 0x241   : > { %v4552_v20 = vpop.f32.mrf.mxu0 }
 0x242   : > { %v1556_v41 = vadd.f32 %v4552_v20, %v1459_v10  ;;  %v2269_v20 = vpack.c.bf16 %v3738_v48, %v3737_v58  ;;  %v3722_v10 = vld [vmem:[%s4937_s23 + $0x868] sm:$0xff] }
 0x243   : > { %v1550_v55 = vpop.f32.mrf.mxu0  ;;  %v3786_v58 = vld [vmem:[%s4937_s23 + $0xa68] sm:$0xff] }
 0x244   : > { %v1551_v51 = vadd.f32 %v1550_v55, %v1454_v53  ;;  %v1574_v62 = vmul.f32 0.01, %v1556_v41  ;;  %vm1570_vm3 = vcmp.gt.f32.partialorder %v1556_v41, 0.0  ;;  %v3721_v55 = vld [vmem:[%s4937_s23 + $0x860] sm:$0xff] }
 0x245   : > { %v4555_v15 = vpop.f32.mrf.mxu0 }
 0x246   : > { %v1566_v46 = vadd.f32 %v4555_v15, %v1469_v27  ;;  %v1573_v1 = vmul.f32 0.01, %v1551_v51  ;;  %vm1569_vm4 = vcmp.gt.f32.partialorder %v1551_v51, 0.0  ;;  %v1578_v22 = vsel %vm1570_vm3, %v1556_v41, %v1574_v62  ;;  %v3735_v15 = vld [vmem:[%s4937_s23 + $0x8d0] sm:$0xff]  ;;  %v3736_v41 = vld [vmem:[%s4937_s23 + $0x8d8] sm:$0xff] }
 0x247   : > { %v1560_v32 = vpop.f32.mrf.mxu0  ;;  %v2262_v27 = vpack.c.bf16 %v3724_v47, %v3723_v44  ;;  %v2268_v53 = vpack.c.bf16 %v3736_v41, %v3735_v15  ;;  %v2302_v44 = vpack.c.bf16 %v3804_v11, %v3803_v4  ;;  %v3781_v41 = vld [vmem:[%s4937_s23 + $0xa40] sm:$0xff]  ;;  %v2401_v11 = vld [vmem:[%s6159_s1 + $0x90] sm:$0xff] }
 0x248   : > { %v1576_v28 = vmul.f32 0.01, %v1566_v46  ;;  %v1561_v60 = vadd.f32 %v1560_v32, %v1464_v50  ;;  %vm1572_vm1 = vcmp.gt.f32.partialorder %v1566_v46, 0.0  ;;  %v1577_v35 = vsel %vm1569_vm4, %v1551_v51, %v1573_v1  ;;  %v3719_v32 = vld [vmem:[%s4937_s23 + $0x850] sm:$0xff]  ;;  %v3720_v51 = vld [vmem:[%s4937_s23 + $0x858] sm:$0xff]  ;;  %v3718_v1 = vld [vmem:[%s4937_s23 + $0x848] sm:$0xff] }
 0x249   : > { %v3966_v50 = vcombine.high %v5560_v49, %v5565_v63  ;;  %v2260_v62 = vpack.c.bf16 %v3720_v51, %v3719_v32  ;;  %v3795_v32 = vld [vmem:[%s4937_s23 + $0xab0] sm:$0xff]  ;;  %v3796_v51 = vld [vmem:[%s4937_s23 + $0xab8] sm:$0xff] }
 0x24a   : > { %v1575_v59 = vmul.f32 0.01, %v1561_v60  ;;  %v1580_v61 = vsel %vm1572_vm1, %v1566_v46, %v1576_v28  ;;  %vm1571_vm2 = vcmp.gt.f32.partialorder %v1561_v60, 0.0  ;;  %v2261_v46 = vpack.c.bf16 %v3722_v10, %v3721_v55  ;;  %v3733_v28 = vld [vmem:[%s4937_s23 + $0x8c0] sm:$0xff]  ;;  %v3798_v10 = vld [vmem:[%s4937_s23 + $0xac8] sm:$0xff] }
 0x24b   : > { %4556 = vmatprep.subr.mxu1 %v1580_v61  ;;  %v3797_v55 = vld [vmem:[%s4937_s23 + $0xac0] sm:$0xff] }
 0x24c   : > { %4557 = vmatpush3.msra.mxu1 %v1580_v61  ;;  %v1579_v19 = vsel %vm1571_vm2, %v1561_v60, %v1575_v59  ;;  %v3734_v60 = vld [vmem:[%s4937_s23 + $0x8c8] sm:$0xff]  ;;  %v3717_v61 = vld [vmem:[%s4937_s23 + $0x840] sm:$0xff]  ;;  %v2299_v15 = vpack.c.bf16 %v3798_v10, %v3797_v55  ;;  %v3860_v55 = vld [vmem:[%s4937_s23 + $0xcb8] sm:$0xff] }
 0x24d   : > { %4558 = vmatprep.subr.mxu1 %v1579_v19  ;;  %v2267_v59 = vpack.c.bf16 %v3734_v60, %v3733_v28  ;;  %v2298_v28 = vpack.c.bf16 %v3796_v51, %v3795_v32  ;;  %v3779_v60 = vld [vmem:[%s4937_s23 + $0xa30] sm:$0xff]  ;;  %v3858_v32 = vld [vmem:[%s4937_s23 + $0xca8] sm:$0xff] }
 0x24e   : > { %4559 = vmatpush3.msra.mxu1 %v1579_v19  ;;  %v3731_v19 = vld [vmem:[%s4937_s23 + $0x8b0] sm:$0xff] }
 0x24f   : > { %4560 = vmatprep.subr.mxu1 %v1578_v22 }
 0x250   : > { %4561 = vmatpush3.msra.mxu1 %v1578_v22  ;;  %v3732_v22 = vld [vmem:[%s4937_s23 + $0x8b8] sm:$0xff] }
 0x251   : > { %4562 = vmatprep.subr.mxu1 %v1577_v35 }
 0x252   : > { %4563 = vmatpush3.msra.mxu1 %v1577_v35  ;;  %v2259_v35 = vpack.c.bf16 %v3718_v1, %v3717_v61  ;;  %v3793_v61 = vld [vmem:[%s4937_s23 + $0xaa0] sm:$0xff]  ;;  %v3794_v1 = vld [vmem:[%s4937_s23 + $0xaa8] sm:$0xff] }
 0x253   : > { %4565 = vmatmul.mubr.msk.f32.vlgmr.msra.gmra.mxu1 %vm1471_vm0, %v3693_v0  ;;  %4581 = vmatprep.subr.mxu1 %v6171_v9  ;;  %v2266_v0 = vpack.c.bf16 %v3732_v22, %v3731_v19  ;;  %v2297_v19 = vpack.c.bf16 %v3794_v1, %v3793_v61  ;;  %v3777_v22 = vld [vmem:[%s4937_s23 + $0xa20] sm:$0xff]  ;;  %v3856_v61 = vld [vmem:[%s4937_s23 + $0xc98] sm:$0xff] }
 0x254   : > { %4567 = vmatprep.mubr.msk.f32.mxu1 %vm1471_vm0, %v3694_v5  ;;  %v3715_v5 = vld [vmem:[%s4937_s23 + $0x830] sm:$0xff] }
 0x257   : > { %4568 = vmatmul.mubr.msk.f32.gmra.mxu1 %vm1471_vm0, %v3695_v25  ;;  %v3716_v25 = vld [vmem:[%s4937_s23 + $0x838] sm:$0xff] }
 0x258   : > { %4585 = vmatprep.mubr.msk.f32.mxu1 %vm4786_vm9, %v6171_v9 }
 0x313   : > { %v4566_v52 = vpop.f32.mrf.mxu1 }
 0x314   : > { %v1695_v12 = vadd.f32 %v4566_v52, %v1599_v54  ;;  %v3714_v54 = vld [vmem:[%s4937_s23 + $0x828] sm:$0xff] }
 0x315   : > { %v1689_v31 = vpop.f32.mrf.mxu1 }
 0x316   : > { %v1690_v7 = vadd.f32 %v1689_v31, %v1594_v8  ;;  %v1713_v26 = vmul.f32 0.01, %v1695_v12  ;;  %vm1709_vm7 = vcmp.gt.f32.partialorder %v1695_v12, 0.0  ;;  %v3713_v31 = vld [vmem:[%s4937_s23 + $0x820] sm:$0xff] }
 0x317   : > { %v4569_v57 = vpop.f32.mrf.mxu1 }
 0x318   : > { %v1705_v21 = vadd.f32 %v4569_v57, %v1609_v37  ;;  %v1712_v42 = vmul.f32 0.01, %v1690_v7  ;;  %vm1708_vm8 = vcmp.gt.f32.partialorder %v1690_v7, 0.0  ;;  %v1717_v6 = vsel %vm1709_vm7, %v1695_v12, %v1713_v26  ;;  %v3730_v37 = vld [vmem:[%s4937_s23 + $0x8a8] sm:$0xff]  ;;  %v3727_v57 = vld [vmem:[%s4937_s23 + $0x890] sm:$0xff]  ;;  %v3728_v12 = vld [vmem:[%s4937_s23 + $0x898] sm:$0xff] }
 0x319   : > { %v1699_v3 = vpop.f32.mrf.mxu1  ;;  %v2265_v52 = vpack.c.bf16 %v3730_v37, %v3729_v29  ;;  %v2264_v8 = vpack.c.bf16 %v3728_v12, %v3727_v57  ;;  %v3775_v37 = vld [vmem:[%s4937_s23 + $0xa10] sm:$0xff]  ;;  %v3773_v12 = vld [vmem:[%s4937_s23 + $0xa00] sm:$0xff] }
 0x31a   : > { %v1715_v39 = vmul.f32 0.01, %v1705_v21  ;;  %v1700_v13 = vadd.f32 %v1699_v3, %v1604_v56  ;;  %vm1711_vm5 = vcmp.gt.f32.partialorder %v1705_v21, 0.0  ;;  %v1716_v38 = vsel %vm1708_vm8, %v1690_v7, %v1712_v42  ;;  %v3711_v3 = vld [vmem:[%s4937_s23 + $0x810] sm:$0xff]  ;;  %v3712_v7 = vld [vmem:[%s4937_s23 + $0x818] sm:$0xff]  ;;  %v3710_v42 = vld [vmem:[%s4937_s23 + $0x808] sm:$0xff] }
 0x31b   : > { %v2258_v56 = vpack.c.bf16 %v3716_v25, %v3715_v5  ;;  %v2256_v26 = vpack.c.bf16 %v3712_v7, %v3711_v3  ;;  %v3791_v5 = vld [vmem:[%s4937_s23 + $0xa90] sm:$0xff]  ;;  %v3792_v25 = vld [vmem:[%s4937_s23 + $0xa98] sm:$0xff] }
 0x31c   : > { %v1714_v33 = vmul.f32 0.01, %v1700_v13  ;;  %v1719_v40 = vsel %vm1711_vm5, %v1705_v21, %v1715_v39  ;;  %vm1710_vm6 = vcmp.gt.f32.partialorder %v1700_v13, 0.0  ;;  %v2257_v21 = vpack.c.bf16 %v3714_v54, %v3713_v31  ;;  %v3725_v39 = vld [vmem:[%s4937_s23 + $0x880] sm:$0xff]  ;;  %v3790_v54 = vld [vmem:[%s4937_s23 + $0xa88] sm:$0xff]  ;;  %v2385_v3 = vld [vmem:[%s6159_s1 + $0x10] sm:$0xff] }
 0x31d   : > { %4570 = vmatprep.subr.mxu0 %v1719_v40  ;;  %v2296_v29 = vpack.c.bf16 %v3792_v25, %v3791_v5  ;;  %v3789_v31 = vld [vmem:[%s4937_s23 + $0xa80] sm:$0xff]  ;;  %v2393_v7 = vld [vmem:[%s6159_s1 + $0x50] sm:$0xff]  ;;  %v3854_v5 = vld [vmem:[%s4937_s23 + $0xc88] sm:$0xff] }
 0x31e   : > { %4571 = vmatpush3.msra.mxu0 %v1719_v40  ;;  %v1718_v43 = vsel %vm1710_vm6, %v1700_v13, %v1714_v33  ;;  %v3726_v13 = vld [vmem:[%s4937_s23 + $0x888] sm:$0xff]  ;;  %v3709_v40 = vld [vmem:[%s4937_s23 + $0x800] sm:$0xff]  ;;  %v2295_v57 = vpack.c.bf16 %v3790_v54, %v3789_v31 }
 0x31f   : > { %4572 = vmatprep.subr.mxu0 %v1718_v43  ;;  %v2263_v33 = vpack.c.bf16 %v3726_v13, %v3725_v39  ;;  %v3970_v39 = vcombine.high %v2385_v3, %v2393_v7  ;;  %v3867_v13 = vld [vmem:[%s4937_s23 + $0xcf0] sm:$0xff]  ;;  %v2395_v31 = vld [vmem:[%s6159_s1 + $0x60] sm:$0xff] }
 0x320   : > { %4573 = vmatpush3.msra.mxu0 %v1718_v43  ;;  %v2255_v43 = vpack.c.bf16 %v3710_v42, %v3709_v40  ;;  %v3851_v42 = vld [vmem:[%s4937_s23 + $0xc70] sm:$0xff] }
 0x321   : > { %4574 = vmatprep.subr.mxu0 %v1717_v6 }
 0x322   : > { %4575 = vmatpush3.msra.mxu0 %v1717_v6  ;;  %v2399_v6 = vld [vmem:[%s6159_s1 + $0x80] sm:$0xff] }
 0x323   : > { %4576 = vmatprep.subr.mxu0 %v1716_v38 }
 0x324   : > { %4577 = vmatpush3.msra.mxu0 %v1716_v38  ;;  %v2407_v38 = vld [vmem:[%s6159_s1 + $0xc0] sm:$0xff] }
 0x325   : > { %4579 = vmatmul.mubr.msk.f32.vlgmr.msra.gmra.mxu0 %vm1471_vm0, %v1721_v2  ;;  %v3965_v2 = vcombine.low %v5560_v49, %v5565_v63  ;;  %v3801_v49 = vld [vmem:[%s4937_s23 + $0xae0] sm:$0xff]  ;;  %v3802_v63 = vld [vmem:[%s4937_s23 + $0xae8] sm:$0xff] }
 0x3e5   : > { %v4580_v23 = vpop.f32.mrf.mxu0 }
 0x3e6   : > { %v1812_v36 = vadd.f32 %v4580_v23, %v1732_v24  ;;  %v3982_v24 = vcombine.high %v2399_v6, %v2407_v38  ;;  %v3981_v23 = vcombine.low %v2399_v6, %v2407_v38  ;;  %v3865_v38 = vld [vmem:[%s4937_s23 + $0xce0] sm:$0xff] }
 0x3e7   : > { %v1806_v18 = vpop.f32.mrf.mxu0 }
 0x3e8   : > { %v1816_v17 = vmax.f32 %v1812_v36, 0.0  ;;  %v1807_v45 = vadd.f32 %v1806_v18, %v1727_v14  ;;  %v1899_v36 = vld [vmem:[%s6167_s9] sm:$0xff]  ;;  %v3787_v14 = vld [vmem:[%s4937_s23 + $0xa70] sm:$0xff]  ;;  %v3788_v18 = vld [vmem:[%s4937_s23 + $0xa78] sm:$0xff] }
 0x3e9   : > { %4590 = vmatprep.mubr.msk.f32.mxu0 %vm1913_vm11, %v1899_v36  ;;  %v2294_v47 = vpack.c.bf16 %v3788_v18, %v3787_v14  ;;  %v3850_v36 = vld [vmem:[%s4937_s23 + $0xc68] sm:$0xff]  ;;  %v3863_v18 = vld [vmem:[%s4937_s23 + $0xcd0] sm:$0xff] }
 0x3ea   : > { %v1815_v30 = vmax.f32 %v1807_v45, 0.0  ;;  %4582 = vmatpush3.msra.mxu1 %v1816_v17  ;;  %v2301_v17 = vpack.c.bf16 %v3802_v63, %v3801_v49  ;;  %v3785_v45 = vld [vmem:[%s4937_s23 + $0xa60] sm:$0xff] }
 0x3eb   : > { %4583 = vmatprep.subr.mxu1 %v6171_v9  ;;  %v2293_v48 = vpack.c.bf16 %v3786_v58, %v3785_v45  ;;  %v3848_v45 = vld [vmem:[%s4937_s23 + $0xc58] sm:$0xff] }
 0x3ec   : > { %4584 = vmatpush3.msra.mxu1 %v1815_v30  ;;  %v3800_v30 = vld [vmem:[%s4937_s23 + $0xad8] sm:$0xff] }
 0x3ed   : > { %4586 = vmatmul.mubr.msk.f32.vlgmr.msra.gmra.mxu1 %vm1824_vm10, %v1817_v34  ;;  %4290 = vmatprep.subr.bf16.mxu1 %v2270_v16  ;;  %v3799_v16 = vld [vmem:[%s4937_s23 + $0xad0] sm:$0xff] }
 0x3ee   : > { %4291 = vmatpush3.bf16.msra.mxu1 %v2262_v27  ;;  %2631 = vmatprep.mubr.bf16.mxu1 %v3966_v50  ;;  %v2300_v34 = vpack.c.bf16 %v3800_v30, %v3799_v16  ;;  %v3783_v27 = vld [vmem:[%s4937_s23 + $0xa50] sm:$0xff]  ;;  %v3784_v50 = vld [vmem:[%s4937_s23 + $0xa58] sm:$0xff]  ;;  %v3862_v16 = vld [vmem:[%s4937_s23 + $0xcc8] sm:$0xff] }
 0x3ef   : > { %4292 = vmatprep.subr.bf16.mxu1 %v2269_v20  ;;  %v2292_v20 = vpack.c.bf16 %v3784_v50, %v3783_v27  ;;  %v3846_v27 = vld [vmem:[%s4937_s23 + $0xc48] sm:$0xff] }
 0x3f2   : > { %4293 = vmatpush3.bf16.msra.mxu1 %v2261_v46  ;;  %v3782_v46 = vld [vmem:[%s4937_s23 + $0xa48] sm:$0xff] }
 0x3f3   : > { %4294 = vmatprep.subr.bf16.mxu1 %v2268_v53  ;;  %v2291_v53 = vpack.c.bf16 %v3782_v46, %v3781_v41  ;;  %v3844_v41 = vld [vmem:[%s4937_s23 + $0xc38] sm:$0xff] }
 0x3f6   : > { %4295 = vmatpush3.bf16.msra.mxu1 %v2260_v62  ;;  %v3780_v62 = vld [vmem:[%s4937_s23 + $0xa38] sm:$0xff] }
 0x3f7   : > { %4296 = vmatprep.subr.bf16.mxu1 %v2267_v59  ;;  %v2290_v59 = vpack.c.bf16 %v3780_v62, %v3779_v60  ;;  %v3842_v60 = vld [vmem:[%s4937_s23 + $0xc28] sm:$0xff] }
 0x3fa   : > { %4297 = vmatpush3.bf16.msra.mxu1 %v2259_v35  ;;  %v3778_v35 = vld [vmem:[%s4937_s23 + $0xa28] sm:$0xff] }
 0x3fb   : > { %4298 = vmatprep.subr.bf16.mxu1 %v2266_v0  ;;  %v2289_v0 = vpack.c.bf16 %v3778_v35, %v3777_v22  ;;  %v3840_v22 = vld [vmem:[%s4937_s23 + $0xc18] sm:$0xff] }
 0x3fe   : > { %4299 = vmatpush3.bf16.msra.mxu1 %v2258_v56  ;;  %v3776_v56 = vld [vmem:[%s4937_s23 + $0xa18] sm:$0xff] }
 0x3ff   : > { %4300 = vmatprep.subr.bf16.mxu1 %v2265_v52  ;;  %v2288_v52 = vpack.c.bf16 %v3776_v56, %v3775_v37  ;;  %v3838_v37 = vld [vmem:[%s4937_s23 + $0xc08] sm:$0xff] }
 0x402   : > { %4301 = vmatpush3.bf16.msra.mxu1 %v2257_v21  ;;  %v3774_v21 = vld [vmem:[%s4937_s23 + $0xa08] sm:$0xff] }
 0x403   : > { %4302 = vmatprep.subr.bf16.mxu1 %v2264_v8  ;;  %v2287_v8 = vpack.c.bf16 %v3774_v21, %v3773_v12  ;;  %v3931_v12 = vld [vmem:[%s4937_s23 + $0xef0] sm:$0xff]  ;;  %v3932_v21 = vld [vmem:[%s4937_s23 + $0xef8] sm:$0xff] }
 0x406   : > { %4303 = vmatpush3.bf16.msra.mxu1 %v2256_v26  ;;  %v3868_v26 = vld [vmem:[%s4937_s23 + $0xcf8] sm:$0xff] }
 0x407   : > { %4304 = vmatprep.subr.bf16.mxu1 %v2263_v33  ;;  %v3969_v33 = vcombine.low %v2385_v3, %v2393_v7  ;;  %v2334_v40 = vpack.c.bf16 %v3868_v26, %v3867_v13  ;;  %v3915_v3 = vld [vmem:[%s4937_s23 + $0xe70] sm:$0xff]  ;;  %v3916_v7 = vld [vmem:[%s4937_s23 + $0xe78] sm:$0xff]  ;;  %v3929_v13 = vld [vmem:[%s4937_s23 + $0xee0] sm:$0xff] }
 0x408   : > { %v3930_v26 = vld [vmem:[%s4937_s23 + $0xee8] sm:$0xff] }
 0x40a   : > { %4305 = vmatpush3.bf16.msra.mxu1 %v2255_v43  ;;  %v3852_v43 = vld [vmem:[%s4937_s23 + $0xc78] sm:$0xff] }
 0x40b   : > { %4346 = vmatprep.subr.bf16.mxu1 %v2302_v44  ;;  %v2326_v6 = vpack.c.bf16 %v3852_v43, %v3851_v42  ;;  %v2409_v44 = vld [vmem:[%s6159_s1 + $0xd0] sm:$0xff]  ;;  %v3914_v42 = vld [vmem:[%s4937_s23 + $0xe68] sm:$0xff] }
 0x40c   : > { %v3986_v14 = vcombine.high %v2401_v11, %v2409_v44  ;;  %v3985_v49 = vcombine.low %v2401_v11, %v2409_v44  ;;  %v3911_v11 = vld [vmem:[%s4937_s23 + $0xe50] sm:$0xff]  ;;  %v3912_v44 = vld [vmem:[%s4937_s23 + $0xe58] sm:$0xff] }
 0x40d   : > { %2632 = vmatmul.mubr.bf16.vlgmr.msra.gmra.mxu1 %v3965_v2  ;;  %v3866_v2 = vld [vmem:[%s4937_s23 + $0xce8] sm:$0xff] }
 0x40e   : > { %2639 = vmatprep.mubr.bf16.mxu1 %v3982_v24  ;;  %4347 = vmatpush3.bf16.msra.mxu1 %v2294_v47  ;;  %v2333_v24 = vpack.c.bf16 %v3866_v2, %v3865_v38  ;;  %v3864_v47 = vld [vmem:[%s4937_s23 + $0xcd8] sm:$0xff]  ;;  %v2411_v38 = vld [vmem:[%s6159_s1 + $0xe0] sm:$0xff] }
 0x40f   : > { %4348 = vmatprep.subr.bf16.mxu1 %v2301_v17  ;;  %v2332_v63 = vpack.c.bf16 %v3864_v47, %v3863_v18  ;;  %v3847_v17 = vld [vmem:[%s4937_s23 + $0xc50] sm:$0xff]  ;;  %v3925_v18 = vld [vmem:[%s4937_s23 + $0xec0] sm:$0xff]  ;;  %v3926_v47 = vld [vmem:[%s4937_s23 + $0xec8] sm:$0xff] }
 0x410   : > { %v2324_v58 = vpack.c.bf16 %v3848_v45, %v3847_v17  ;;  %v3910_v17 = vld [vmem:[%s4937_s23 + $0xe48] sm:$0xff] }
 0x412   : > { %4349 = vmatpush3.bf16.msra.mxu1 %v2293_v48  ;;  %v3861_v48 = vld [vmem:[%s4937_s23 + $0xcc0] sm:$0xff] }
 0x413   : > { %4350 = vmatprep.subr.bf16.mxu1 %v2300_v34  ;;  %v2331_v30 = vpack.c.bf16 %v3862_v16, %v3861_v48  ;;  %v3845_v34 = vld [vmem:[%s4937_s23 + $0xc40] sm:$0xff]  ;;  %v3924_v48 = vld [vmem:[%s4937_s23 + $0xeb8] sm:$0xff] }
 0x414   : > { %v2323_v50 = vpack.c.bf16 %v3846_v27, %v3845_v34  ;;  %v3908_v34 = vld [vmem:[%s4937_s23 + $0xe38] sm:$0xff] }
 0x415   : > { %2640 = vmatmul.mubr.bf16.gmra.mxu1 %v3981_v23  ;;  %v3849_v23 = vld [vmem:[%s4937_s23 + $0xc60] sm:$0xff] }
 0x416   : > { %4351 = vmatpush3.bf16.msra.mxu1 %v2292_v20  ;;  %2729 = vmatprep.mubr.bf16.mxu1 %v3970_v39  ;;  %v2325_v4 = vpack.c.bf16 %v3850_v36, %v3849_v23  ;;  %v3859_v20 = vld [vmem:[%s4937_s23 + $0xcb0] sm:$0xff]  ;;  %v2358_v39 = vpack.c.bf16 %v3916_v7, %v3915_v3  ;;  %v3928_v23 = vld [vmem:[%s4937_s23 + $0xed8] sm:$0xff]  ;;  %v5753_v7 = vld [vmem:[%s6159_s1 + $0x8] sm:$0xff] }
 0x417   : > { %4352 = vmatprep.subr.bf16.mxu1 %v2299_v15  ;;  %v2330_v10 = vpack.c.bf16 %v3860_v55, %v3859_v20  ;;  %v3843_v15 = vld [vmem:[%s4937_s23 + $0xc30] sm:$0xff]  ;;  %v3922_v20 = vld [vmem:[%s4937_s23 + $0xea8] sm:$0xff]  ;;  %v3756_v3 = vld [vmem:[%s4937_s23 + $0x978] sm:$0xff] }
 0x418   : > { %v2322_v46 = vpack.c.bf16 %v3844_v41, %v3843_v15  ;;  %v3906_v15 = vld [vmem:[%s4937_s23 + $0xe28] sm:$0xff] }
 0x41a   : > { %4353 = vmatpush3.bf16.msra.mxu1 %v2291_v53  ;;  %v3857_v53 = vld [vmem:[%s4937_s23 + $0xca0] sm:$0xff] }
 0x41b   : > { %4354 = vmatprep.subr.bf16.mxu1 %v2298_v28  ;;  %v2329_v51 = vpack.c.bf16 %v3858_v32, %v3857_v53  ;;  %v3841_v28 = vld [vmem:[%s4937_s23 + $0xc20] sm:$0xff]  ;;  %v3920_v53 = vld [vmem:[%s4937_s23 + $0xe98] sm:$0xff] }
 0x41c   : > { %v2321_v62 = vpack.c.bf16 %v3842_v60, %v3841_v28  ;;  %v3904_v28 = vld [vmem:[%s4937_s23 + $0xe18] sm:$0xff] }
 0x41e   : > { %4355 = vmatpush3.bf16.msra.mxu1 %v2290_v59  ;;  %v3855_v59 = vld [vmem:[%s4937_s23 + $0xc90] sm:$0xff] }
 0x41f   : > { %4356 = vmatprep.subr.bf16.mxu1 %v2297_v19  ;;  %v2328_v1 = vpack.c.bf16 %v3856_v61, %v3855_v59  ;;  %v3839_v19 = vld [vmem:[%s4937_s23 + $0xc10] sm:$0xff]  ;;  %v3918_v59 = vld [vmem:[%s4937_s23 + $0xe88] sm:$0xff] }
 0x420   : > { %v2320_v35 = vpack.c.bf16 %v3840_v22, %v3839_v19  ;;  %v3902_v19 = vld [vmem:[%s4937_s23 + $0xe08] sm:$0xff] }
 0x422   : > { %4357 = vmatpush3.bf16.msra.mxu1 %v2289_v0  ;;  %v3853_v0 = vld [vmem:[%s4937_s23 + $0xc80] sm:$0xff] }
 0x423   : > { %4358 = vmatprep.subr.bf16.mxu1 %v2296_v29  ;;  %v2327_v25 = vpack.c.bf16 %v3854_v5, %v3853_v0  ;;  %v3837_v29 = vld [vmem:[%s4937_s23 + $0xc00] sm:$0xff]  ;;  %v2397_v0 = vld [vmem:[%s6159_s1 + $0x70] sm:$0xff] }
 0x424   : > { %v2319_v56 = vpack.c.bf16 %v3838_v37, %v3837_v29  ;;  %v2405_v29 = vld [vmem:[%s6159_s1 + $0xb0] sm:$0xff] }
 0x425   : > { %v2413_v37 = vld [vmem:[%s6159_s1 + $0xf0] sm:$0xff] }
 0x426   : > { %4359 = vmatpush3.bf16.msra.mxu1 %v2288_v52  ;;  %v2387_v52 = vld [vmem:[%s6159_s1 + $0x20] sm:$0xff] }
 0x427   : > { %4360 = vmatprep.subr.bf16.mxu1 %v2295_v57  ;;  %v3973_v54 = vcombine.low %v2387_v52, %v2395_v31  ;;  %v3974_v57 = vcombine.high %v2387_v52, %v2395_v31  ;;  %v3993_v52 = vcombine.low %v2405_v29, %v2413_v37  ;;  %v1822_v31 = vpop.permute.xlu0 %1821 }
 0x42a   : > { %4361 = vmatpush3.bf16.msra.mxu1 %v2287_v8  ;;  %v2366_v8 = vpack.c.bf16 %v3932_v21, %v3931_v12  ;;  %v3772_v12 = vld [vmem:[%s4937_s23 + $0x9f8] sm:$0xff]  ;;  %v3755_v21 = vld [vmem:[%s4937_s23 + $0x970] sm:$0xff] }
 0x42b   : > { %4402 = vmatprep.subr.bf16.mxu1 %v2334_v40  ;;  %v3913_v40 = vld [vmem:[%s4937_s23 + $0xe60] sm:$0xff] }
 0x42c   : > { %v2357_v43 = vpack.c.bf16 %v3914_v42, %v3913_v40 }
 0x42d   : > { %2730 = vmatmul.mubr.bf16.vlgmr.msra.gmra.mxu1 %v3969_v33  ;;  %v2365_v33 = vpack.c.bf16 %v3930_v26, %v3929_v13  ;;  %v3769_v26 = vld [vmem:[%s4937_s23 + $0x9e0] sm:$0xff] }
 0x42e   : > { %4403 = vmatpush3.bf16.msra.mxu1 %v2326_v6  ;;  %2737 = vmatprep.mubr.bf16.mxu1 %v3986_v14  ;;  %v2403_v6 = vld [vmem:[%s6159_s1 + $0xa0] sm:$0xff]  ;;  %v2356_v14 = vpack.c.bf16 %v3912_v44, %v3911_v11 }
 0x42f   : > { %4404 = vmatprep.subr.bf16.mxu1 %v2333_v24  ;;  %v3990_v2 = vcombine.high %v2403_v6, %v2411_v38  ;;  %v3927_v24 = vld [vmem:[%s4937_s23 + $0xed0] sm:$0xff]  ;;  %v3989_v36 = vcombine.low %v2403_v6, %v2411_v38  ;;  %v2278_v6 = vpack.c.bf16 %v3756_v3, %v3755_v21 }
 0x432   : > { %4405 = vmatpush3.bf16.msra.mxu1 %v2325_v4  ;;  %v2364_v4 = vpack.c.bf16 %v3928_v23, %v3927_v24  ;;  %v3753_v24 = vld [vmem:[%s4937_s23 + $0x960] sm:$0xff]  ;;  %v3754_v23 = vld [vmem:[%s4937_s23 + $0x968] sm:$0xff] }
 0x433   : > { %4406 = vmatprep.subr.bf16.mxu1 %v2332_v63  ;;  %v3909_v63 = vld [vmem:[%s4937_s23 + $0xe40] sm:$0xff]  ;;  %v2277_v11 = vpack.c.bf16 %v3754_v23, %v3753_v24  ;;  %v3830_v24 = vld [vmem:[%s4937_s23 + $0xbc8] sm:$0xff] }
 0x434   : > { %v2355_v45 = vpack.c.bf16 %v3910_v17, %v3909_v63 }
 0x435   : > { %2738 = vmatmul.mubr.bf16.gmra.mxu1 %v3985_v49  ;;  %v2363_v49 = vpack.c.bf16 %v3926_v47, %v3925_v18  ;;  %v3752_v18 = vld [vmem:[%s4937_s23 + $0x958] sm:$0xff]  ;;  %v3765_v47 = vld [vmem:[%s4937_s23 + $0x9c0] sm:$0xff] }
 0x436   : > { %4407 = vmatpush3.bf16.msra.mxu1 %v2324_v58  ;;  %2827 = vmatprep.mubr.bf16.mxu1 %v3974_v57  ;;  %v3923_v58 = vld [vmem:[%s4937_s23 + $0xeb0] sm:$0xff] }
 0x437   : > { %4408 = vmatprep.subr.bf16.mxu1 %v2331_v30  ;;  %v2362_v16 = vpack.c.bf16 %v3924_v48, %v3923_v58  ;;  %v3907_v30 = vld [vmem:[%s4937_s23 + $0xe30] sm:$0xff]  ;;  %v3750_v58 = vld [vmem:[%s4937_s23 + $0x948] sm:$0xff] }
 0x438   : > { %v2354_v27 = vpack.c.bf16 %v3908_v34, %v3907_v30  ;;  %v3771_v57 = vld [vmem:[%s4937_s23 + $0x9f0] sm:$0xff] }
 0x439   : > { %v2286_v42 = vpack.c.bf16 %v3772_v12, %v3771_v57  ;;  %v3763_v48 = vld [vmem:[%s4937_s23 + $0x9b0] sm:$0xff]  ;;  %v3834_v57 = vld [vmem:[%s4937_s23 + $0xbe8] sm:$0xff] }
 0x43a   : > { %4409 = vmatpush3.bf16.msra.mxu1 %v2323_v50  ;;  %v3921_v50 = vld [vmem:[%s4937_s23 + $0xea0] sm:$0xff] }
 0x43b   : > { %4410 = vmatprep.subr.bf16.mxu1 %v2330_v10  ;;  %v2361_v55 = vpack.c.bf16 %v3922_v20, %v3921_v50  ;;  %v3905_v10 = vld [vmem:[%s4937_s23 + $0xe20] sm:$0xff]  ;;  %v3748_v50 = vld [vmem:[%s4937_s23 + $0x938] sm:$0xff] }
 0x43c   : > { %v2353_v41 = vpack.c.bf16 %v3906_v15, %v3905_v10  ;;  %v3761_v20 = vld [vmem:[%s4937_s23 + $0x9a0] sm:$0xff] }
 0x43e   : > { %4411 = vmatpush3.bf16.msra.mxu1 %v2322_v46  ;;  %v3919_v46 = vld [vmem:[%s4937_s23 + $0xe90] sm:$0xff] }
 0x43f   : > { %4412 = vmatprep.subr.bf16.mxu1 %v2329_v51  ;;  %v2360_v32 = vpack.c.bf16 %v3920_v53, %v3919_v46  ;;  %v3903_v51 = vld [vmem:[%s4937_s23 + $0xe10] sm:$0xff]  ;;  %v3746_v46 = vld [vmem:[%s4937_s23 + $0x928] sm:$0xff] }
 0x440   : > { %v2352_v60 = vpack.c.bf16 %v3904_v28, %v3903_v51  ;;  %v3759_v53 = vld [vmem:[%s4937_s23 + $0x990] sm:$0xff] }
 0x442   : > { %4413 = vmatpush3.bf16.msra.mxu1 %v2321_v62  ;;  %v3917_v62 = vld [vmem:[%s4937_s23 + $0xe80] sm:$0xff] }
 0x443   : > { %4414 = vmatprep.subr.bf16.mxu1 %v2328_v1  ;;  %v2359_v61 = vpack.c.bf16 %v3918_v59, %v3917_v62  ;;  %v3901_v1 = vld [vmem:[%s4937_s23 + $0xe00] sm:$0xff]  ;;  %v3744_v62 = vld [vmem:[%s4937_s23 + $0x918] sm:$0xff] }
 0x444   : > { %v2351_v22 = vpack.c.bf16 %v3902_v19, %v3901_v1  ;;  %v3757_v59 = vld [vmem:[%s4937_s23 + $0x980] sm:$0xff] }
 0x446   : > { %4415 = vmatpush3.bf16.msra.mxu1 %v2320_v35  ;;  %v2389_v35 = vld [vmem:[%s6159_s1 + $0x30] sm:$0xff] }
 0x447   : > { %4416 = vmatprep.subr.bf16.mxu1 %v2327_v25  ;;  %v3977_v5 = vcombine.low %v2389_v35, %v2397_v0  ;;  %v3978_v25 = vcombine.high %v2389_v35, %v2397_v0  ;;  %v3742_v35 = vld [vmem:[%s4937_s23 + $0x908] sm:$0xff]  ;;  %v3835_v0 = vld [vmem:[%s4937_s23 + $0xbf0] sm:$0xff] }
 0x44a   : > { %4417 = vmatpush3.bf16.msra.mxu1 %v2319_v56  ;;  %v3994_v56 = vcombine.high %v2405_v29, %v2413_v37  ;;  %v3819_v29 = vld [vmem:[%s4937_s23 + $0xb70] sm:$0xff] }
 0x44b   : > { %4458 = vmatprep.subr.bf16.mxu1 %v2366_v8 }
 0x44d   : > { %2828 = vmatmul.mubr.bf16.vlgmr.msra.gmra.mxu1 %v3973_v54 }
 0x44e   : > { %4459 = vmatpush3.bf16.msra.mxu1 %v2358_v39  ;;  %2835 = vmatprep.mubr.bf16.mxu1 %v3990_v2  ;;  %v5758_v39 = vld [vmem:[%s6159_s1 + $0x48] sm:$0xff] }
 0x44f   : > { %4460 = vmatprep.subr.bf16.mxu1 %v2365_v33  ;;  %v3770_v33 = vld [vmem:[%s4937_s23 + $0x9e8] sm:$0xff]  ;;  %v3968_v38 = vcombine.high %v5753_v7, %v5758_v39  ;;  %v3967_v12 = vcombine.low %v5753_v7, %v5758_v39  ;;  %v3816_v39 = vld [vmem:[%s4937_s23 + $0xb58] sm:$0xff] }
 0x450   : > { %v2285_v2 = vpack.c.bf16 %v3770_v33, %v3769_v26  ;;  %v3818_v26 = vld [vmem:[%s4937_s23 + $0xb68] sm:$0xff]  ;;  %v3831_v33 = vld [vmem:[%s4937_s23 + $0xbd0] sm:$0xff] }
 0x452   : > { %4461 = vmatpush3.bf16.msra.mxu1 %v2357_v43  ;;  %v1900_v43 = vld [vmem:[%s6167_s9 + $0x8] sm:$0xff] }
 0x453   : > { %4462 = vmatprep.subr.bf16.mxu1 %v2364_v4  ;;  %v3768_v4 = vld [vmem:[%s4937_s23 + $0x9d8] sm:$0xff] }
 0x455   : > { %2836 = vmatmul.mubr.bf16.gmra.mxu1 %v3989_v36  ;;  %v3767_v36 = vld [vmem:[%s4937_s23 + $0x9d0] sm:$0xff] }
 0x456   : > { %4463 = vmatpush3.bf16.msra.mxu1 %v2356_v14  ;;  %2925 = vmatprep.mubr.bf16.mxu1 %v3978_v25  ;;  %v2284_v44 = vpack.c.bf16 %v3768_v4, %v3767_v36  ;;  %v3751_v14 = vld [vmem:[%s4937_s23 + $0x950] sm:$0xff] }
 0x457   : > { %4464 = vmatprep.subr.bf16.mxu1 %v2363_v49  ;;  %v3766_v49 = vld [vmem:[%s4937_s23 + $0x9c8] sm:$0xff]  ;;  %v2276_v63 = vpack.c.bf16 %v3752_v18, %v3751_v14  ;;  %v3827_v18 = vld [vmem:[%s4937_s23 + $0xbb0] sm:$0xff] }
 0x458   : > { %v2283_v17 = vpack.c.bf16 %v3766_v49, %v3765_v47  ;;  %v3814_v14 = vld [vmem:[%s4937_s23 + $0xb48] sm:$0xff]  ;;  %v3828_v47 = vld [vmem:[%s4937_s23 + $0xbb8] sm:$0xff] }
 0x45a   : > { %4465 = vmatpush3.bf16.msra.mxu1 %v2355_v45  ;;  %v3749_v45 = vld [vmem:[%s4937_s23 + $0x940] sm:$0xff] }
 0x45b   : > { %4466 = vmatprep.subr.bf16.mxu1 %v2362_v16  ;;  %v3764_v16 = vld [vmem:[%s4937_s23 + $0x9b8] sm:$0xff]  ;;  %v2275_v30 = vpack.c.bf16 %v3750_v58, %v3749_v45  ;;  %v3825_v58 = vld [vmem:[%s4937_s23 + $0xba0] sm:$0xff] }
 0x45c   : > { %v2282_v34 = vpack.c.bf16 %v3764_v16, %v3763_v48  ;;  %v3812_v45 = vld [vmem:[%s4937_s23 + $0xb38] sm:$0xff]  ;;  %v3826_v48 = vld [vmem:[%s4937_s23 + $0xba8] sm:$0xff] }
 0x45e   : > { %4467 = vmatpush3.bf16.msra.mxu1 %v2354_v27  ;;  %v3747_v27 = vld [vmem:[%s4937_s23 + $0x930] sm:$0xff] }
 0x45f   : > { %4468 = vmatprep.subr.bf16.mxu1 %v2361_v55  ;;  %v3762_v55 = vld [vmem:[%s4937_s23 + $0x9a8] sm:$0xff]  ;;  %v2274_v10 = vpack.c.bf16 %v3748_v50, %v3747_v27  ;;  %v3823_v50 = vld [vmem:[%s4937_s23 + $0xb90] sm:$0xff] }
 0x460   : > { %v2281_v15 = vpack.c.bf16 %v3762_v55, %v3761_v20  ;;  %v3810_v27 = vld [vmem:[%s4937_s23 + $0xb28] sm:$0xff]  ;;  %v3824_v20 = vld [vmem:[%s4937_s23 + $0xb98] sm:$0xff] }
 0x462   : > { %4469 = vmatpush3.bf16.msra.mxu1 %v2353_v41  ;;  %v3745_v41 = vld [vmem:[%s4937_s23 + $0x920] sm:$0xff] }
 0x463   : > { %4470 = vmatprep.subr.bf16.mxu1 %v2360_v32  ;;  %v3760_v32 = vld [vmem:[%s4937_s23 + $0x998] sm:$0xff]  ;;  %v2273_v51 = vpack.c.bf16 %v3746_v46, %v3745_v41  ;;  %v3821_v46 = vld [vmem:[%s4937_s23 + $0xb80] sm:$0xff] }
 0x464   : > { %v2280_v28 = vpack.c.bf16 %v3760_v32, %v3759_v53  ;;  %v3808_v41 = vld [vmem:[%s4937_s23 + $0xb18] sm:$0xff]  ;;  %v3822_v53 = vld [vmem:[%s4937_s23 + $0xb88] sm:$0xff] }
 0x466   : > { %4471 = vmatpush3.bf16.msra.mxu1 %v2352_v60  ;;  %v3743_v60 = vld [vmem:[%s4937_s23 + $0x910] sm:$0xff] }
 0x467   : > { %4472 = vmatprep.subr.bf16.mxu1 %v2359_v61  ;;  %v3758_v61 = vld [vmem:[%s4937_s23 + $0x988] sm:$0xff]  ;;  %v2272_v1 = vpack.c.bf16 %v3744_v62, %v3743_v60  ;;  %v3899_v62 = vld [vmem:[%s4937_s23 + $0xdf0] sm:$0xff] }
 0x468   : > { %v2279_v19 = vpack.c.bf16 %v3758_v61, %v3757_v59  ;;  %v3806_v60 = vld [vmem:[%s4937_s23 + $0xb08] sm:$0xff]  ;;  %v3900_v59 = vld [vmem:[%s4937_s23 + $0xdf8] sm:$0xff] }
 0x46a   : > { %4473 = vmatpush3.bf16.msra.mxu1 %v2351_v22  ;;  %v3741_v22 = vld [vmem:[%s4937_s23 + $0x900] sm:$0xff] }
 0x46b   : > { %v2271_v25 = vpack.c.bf16 %v3742_v35, %v3741_v22  ;;  %v3884_v22 = vld [vmem:[%s4937_s23 + $0xd78] sm:$0xff] }
 0x46c   : > { %v2402_v35 = vld [vmem:[%s6159_s1 + $0x98] sm:$0xff] }
 0x46d   : > { %2926 = vmatmul.mubr.bf16.vlgmr.msra.gmra.mxu1 %v3977_v5  ;;  %v3836_v5 = vld [vmem:[%s4937_s23 + $0xbf8] sm:$0xff] }
 0x46e   : > { %2933 = vmatprep.mubr.bf16.mxu1 %v3994_v56  ;;  %v2318_v37 = vpack.c.bf16 %v3836_v5, %v3835_v0  ;;  %v3820_v56 = vld [vmem:[%s4937_s23 + $0xb78] sm:$0xff]  ;;  %v3897_v5 = vld [vmem:[%s4937_s23 + $0xde0] sm:$0xff] }
 0x46f   : > { %v2310_v21 = vpack.c.bf16 %v3820_v56, %v3819_v29  ;;  %v2410_v0 = vld [vmem:[%s6159_s1 + $0xd8] sm:$0xff] }
 0x470   : > { %v3988_v56 = vcombine.high %v2402_v35, %v2410_v0 }
 0x475   : > { %2934 = vmatmul.mubr.bf16.gmra.mxu1 %v3993_v52  ;;  %v2400_v52 = vld [vmem:[%s6159_s1 + $0x88] sm:$0xff] }
 0x4ad   : > { %v1894_v54 = vpop.f32.mrf.mxu1 }
 0x4ae   : > { %v1895_v8 = vadd.f32 %v1894_v54, %v1822_v31  ;;  %v2408_v31 = vld [vmem:[%s6159_s1 + $0xc8] sm:$0xff]  ;;  %v3833_v54 = vld [vmem:[%s4937_s23 + $0xbe0] sm:$0xff] }
 0x4af   : > { %v4587_v13 = vpop.f32.mrf.mxu1  ;;  %v2317_v3 = vpack.c.bf16 %v3834_v57, %v3833_v54  ;;  %v3983_v23 = vcombine.low %v2400_v52, %v2408_v31  ;;  %v3882_v54 = vld [vmem:[%s4937_s23 + $0xd68] sm:$0xff]  ;;  %v3895_v57 = vld [vmem:[%s4937_s23 + $0xdd0] sm:$0xff] }
 0x4b0   : > { %v1898_v40 = vmax.f32 %v1895_v8, 0.0  ;;  %v3984_v8 = vcombine.high %v2400_v52, %v2408_v31  ;;  %v3817_v13 = vld [vmem:[%s4937_s23 + $0xb60] sm:$0xff] }
 0x4b1   : > { %v3881_v31 = vld [vmem:[%s4937_s23 + $0xd60] sm:$0xff] }
 0x4b2   : > { %4588 = vmatprep.subr.mxu0 %v1898_v40 }
 0x4b3   : > { %4589 = vmatpush3.msra.mxu0 %v1898_v40  ;;  %v3832_v40 = vld [vmem:[%s4937_s23 + $0xbd8] sm:$0xff] }
 0x4b4   : > { %4591 = vmatmul.mubr.msk.f32.vlgmr.msra.gmra.mxu0 %vm1913_vm11, %v1900_v43  ;;  %4318 = vmatprep.subr.bf16.mxu0 %v2286_v42  ;;  %v2309_v42 = vpack.c.bf16 %v3818_v26, %v3817_v13  ;;  %v3815_v43 = vld [vmem:[%s4937_s23 + $0xb50] sm:$0xff]  ;;  %v2316_v7 = vpack.c.bf16 %v3832_v40, %v3831_v33  ;;  %v3880_v13 = vld [vmem:[%s4937_s23 + $0xd58] sm:$0xff]  ;;  %v5869_v26 = vld [vmem:[%s6159_s1 + $0x28] sm:$0xff] }
 0x4b5   : > { %4319 = vmatpush3.bf16.msra.mxu0 %v2278_v6  ;;  %2680 = vmatprep.mubr.bf16.mxu0 %v3968_v38  ;;  %v5817_v6 = vld [vmem:[%s6159_s1 + $0x18] sm:$0xff]  ;;  %v2308_v36 = vpack.c.bf16 %v3816_v39, %v3815_v43  ;;  %v5874_v33 = vld [vmem:[%s6159_s1 + $0x68] sm:$0xff]  ;;  %v3893_v40 = vld [vmem:[%s4937_s23 + $0xdc0] sm:$0xff]  ;;  %v3987_v43 = vcombine.low %v2402_v35, %v2410_v0 }
 0x4b6   : > { %4320 = vmatprep.subr.bf16.mxu0 %v2285_v2  ;;  %v5822_v38 = vld [vmem:[%s6159_s1 + $0x58] sm:$0xff]  ;;  %v3829_v2 = vld [vmem:[%s4937_s23 + $0xbc0] sm:$0xff]  ;;  %v3976_v39 = vcombine.high %v5869_v26, %v5874_v33 }
 0x4b7   : > { %v3972_v4 = vcombine.high %v5817_v6, %v5822_v38  ;;  %v3971_v29 = vcombine.low %v5817_v6, %v5822_v38  ;;  %v3877_v38 = vld [vmem:[%s4937_s23 + $0xd40] sm:$0xff] }
 0x4b8   : > { %v3945_v0 = vld [vmem:[%s4937_s23 + $0xf60] sm:$0xff] }
 0x4b9   : > { %4321 = vmatpush3.bf16.msra.mxu0 %v2277_v11  ;;  %v2315_v11 = vpack.c.bf16 %v3830_v24, %v3829_v2  ;;  %v3878_v2 = vld [vmem:[%s4937_s23 + $0xd48] sm:$0xff]  ;;  %v3891_v24 = vld [vmem:[%s4937_s23 + $0xdb0] sm:$0xff] }
 0x4ba   : > { %4322 = vmatprep.subr.bf16.mxu0 %v2284_v44  ;;  %v3813_v44 = vld [vmem:[%s4937_s23 + $0xb40] sm:$0xff] }
 0x4bb   : > { %v2307_v49 = vpack.c.bf16 %v3814_v14, %v3813_v44  ;;  %v3876_v44 = vld [vmem:[%s4937_s23 + $0xd38] sm:$0xff]  ;;  %v3889_v14 = vld [vmem:[%s4937_s23 + $0xda0] sm:$0xff] }
 0x4bd   : > { %4323 = vmatpush3.bf16.msra.mxu0 %v2276_v63  ;;  %v2314_v63 = vpack.c.bf16 %v3828_v47, %v3827_v18  ;;  %v3890_v18 = vld [vmem:[%s4937_s23 + $0xda8] sm:$0xff] }
 0x4be   : > { %4324 = vmatprep.subr.bf16.mxu0 %v2283_v17  ;;  %v3811_v17 = vld [vmem:[%s4937_s23 + $0xb30] sm:$0xff] }
 0x4bf   : > { %v2306_v16 = vpack.c.bf16 %v3812_v45, %v3811_v17  ;;  %v3874_v17 = vld [vmem:[%s4937_s23 + $0xd28] sm:$0xff]  ;;  %v3887_v45 = vld [vmem:[%s4937_s23 + $0xd90] sm:$0xff] }
 0x4c1   : > { %4325 = vmatpush3.bf16.msra.mxu0 %v2275_v30  ;;  %v2313_v30 = vpack.c.bf16 %v3826_v48, %v3825_v58  ;;  %v3888_v58 = vld [vmem:[%s4937_s23 + $0xd98] sm:$0xff] }
 0x4c2   : > { %4326 = vmatprep.subr.bf16.mxu0 %v2282_v34  ;;  %v3809_v34 = vld [vmem:[%s4937_s23 + $0xb20] sm:$0xff] }
 0x4c3   : > { %v2305_v55 = vpack.c.bf16 %v3810_v27, %v3809_v34  ;;  %v3872_v34 = vld [vmem:[%s4937_s23 + $0xd18] sm:$0xff]  ;;  %v3885_v27 = vld [vmem:[%s4937_s23 + $0xd80] sm:$0xff] }
 0x4c5   : > { %4327 = vmatpush3.bf16.msra.mxu0 %v2274_v10  ;;  %v2312_v10 = vpack.c.bf16 %v3824_v20, %v3823_v50  ;;  %v3886_v50 = vld [vmem:[%s4937_s23 + $0xd88] sm:$0xff] }
 0x4c6   : > { %4328 = vmatprep.subr.bf16.mxu0 %v2281_v15  ;;  %v3807_v15 = vld [vmem:[%s4937_s23 + $0xb10] sm:$0xff] }
 0x4c7   : > { %v2304_v32 = vpack.c.bf16 %v3808_v41, %v3807_v15  ;;  %v3870_v15 = vld [vmem:[%s4937_s23 + $0xd08] sm:$0xff]  ;;  %v3963_v41 = vld [vmem:[%s4937_s23 + $0xff0] sm:$0xff] }
 0x4c9   : > { %4329 = vmatpush3.bf16.msra.mxu0 %v2273_v51  ;;  %v2311_v51 = vpack.c.bf16 %v3822_v53, %v3821_v46  ;;  %v3964_v46 = vld [vmem:[%s4937_s23 + $0xff8] sm:$0xff] }
 0x4ca   : > { %4330 = vmatprep.subr.bf16.mxu0 %v2280_v28  ;;  %v3805_v28 = vld [vmem:[%s4937_s23 + $0xb00] sm:$0xff] }
 0x4cb   : > { %v2303_v61 = vpack.c.bf16 %v3806_v60, %v3805_v28  ;;  %v3948_v28 = vld [vmem:[%s4937_s23 + $0xf78] sm:$0xff]  ;;  %v2404_v60 = vld [vmem:[%s6159_s1 + $0xa8] sm:$0xff] }
 0x4cd   : > { %4331 = vmatpush3.bf16.msra.mxu0 %v2272_v1  ;;  %v3883_v1 = vld [vmem:[%s4937_s23 + $0xd70] sm:$0xff] }
 0x4ce   : > { %4332 = vmatprep.subr.bf16.mxu0 %v2279_v19  ;;  %v2350_v19 = vpack.c.bf16 %v3900_v59, %v3899_v62  ;;  %v2412_v62 = vld [vmem:[%s6159_s1 + $0xe8] sm:$0xff]  ;;  %v3961_v59 = vld [vmem:[%s4937_s23 + $0xfe0] sm:$0xff] }
 0x4d1   : > { %4333 = vmatpush3.bf16.msra.mxu0 %v2271_v25  ;;  %v3898_v25 = vld [vmem:[%s4937_s23 + $0xde8] sm:$0xff] }
 0x4d2   : > { %4374 = vmatprep.subr.bf16.mxu0 %v2318_v37  ;;  %v2342_v37 = vpack.c.bf16 %v3884_v22, %v3883_v1  ;;  %v2349_v52 = vpack.c.bf16 %v3898_v25, %v3897_v5  ;;  %v3975_v1 = vcombine.low %v5869_v26, %v5874_v33  ;;  %v3992_v22 = vcombine.high %v2404_v60, %v2412_v62  ;;  %v3946_v5 = vld [vmem:[%s4937_s23 + $0xf68] sm:$0xff]  ;;  %v3959_v25 = vld [vmem:[%s4937_s23 + $0xfd0] sm:$0xff]  ;;  %v3941_v33 = vld [vmem:[%s4937_s23 + $0xf40] sm:$0xff] }
 0x4d4   : > { %2681 = vmatmul.mubr.bf16.vlgmr.msra.gmra.mxu0 %v3967_v12  ;;  %v3896_v12 = vld [vmem:[%s4937_s23 + $0xdd8] sm:$0xff] }
 0x4d5   : > { %4375 = vmatpush3.bf16.msra.mxu0 %v2310_v21  ;;  %2688 = vmatprep.mubr.bf16.mxu0 %v3984_v8  ;;  %v2341_v21 = vpack.c.bf16 %v3882_v54, %v3881_v31  ;;  %v3879_v8 = vld [vmem:[%s4937_s23 + $0xd50] sm:$0xff]  ;;  %v3944_v31 = vld [vmem:[%s4937_s23 + $0xf58] sm:$0xff] }
 0x4d6   : > { %4376 = vmatprep.subr.bf16.mxu0 %v2317_v3  ;;  %v2348_v3 = vpack.c.bf16 %v3896_v12, %v3895_v57  ;;  %v2390_v54 = vld [vmem:[%s6159_s1 + $0x38] sm:$0xff]  ;;  %v3957_v12 = vld [vmem:[%s4937_s23 + $0xfc0] sm:$0xff] }
 0x4d7   : > { %v2398_v57 = vld [vmem:[%s6159_s1 + $0x78] sm:$0xff] }
 0x4d9   : > { %4377 = vmatpush3.bf16.msra.mxu0 %v2309_v42  ;;  %v3894_v42 = vld [vmem:[%s4937_s23 + $0xdc8] sm:$0xff] }
 0x4da   : > { %4378 = vmatprep.subr.bf16.mxu0 %v2316_v7  ;;  %v2340_v7 = vpack.c.bf16 %v3880_v13, %v3879_v8  ;;  %v2347_v6 = vpack.c.bf16 %v3894_v42, %v3893_v40  ;;  %v3991_v8 = vcombine.low %v2404_v60, %v2412_v62  ;;  %v3980_v13 = vcombine.high %v2390_v54, %v2398_v57  ;;  %v3942_v40 = vld [vmem:[%s4937_s23 + $0xf48] sm:$0xff]  ;;  %v3955_v42 = vld [vmem:[%s4937_s23 + $0xfb0] sm:$0xff] }
 0x4dc   : > { %2689 = vmatmul.mubr.bf16.gmra.mxu0 %v3983_v23  ;;  %v3892_v23 = vld [vmem:[%s4937_s23 + $0xdb8] sm:$0xff] }
 0x4dd   : > { %4379 = vmatpush3.bf16.msra.mxu0 %v2308_v36  ;;  %2778 = vmatprep.mubr.bf16.mxu0 %v3972_v4  ;;  %v2339_v36 = vpack.c.bf16 %v3878_v2, %v3877_v38  ;;  %v2346_v4 = vpack.c.bf16 %v3892_v23, %v3891_v24  ;;  %v3940_v38 = vld [vmem:[%s4937_s23 + $0xf38] sm:$0xff]  ;;  %v3953_v2 = vld [vmem:[%s4937_s23 + $0xfa0] sm:$0xff]  ;;  %v3954_v24 = vld [vmem:[%s4937_s23 + $0xfa8] sm:$0xff] }
 0x4de   : > { %4380 = vmatprep.subr.bf16.mxu0 %v2315_v11  ;;  %v3875_v11 = vld [vmem:[%s4937_s23 + $0xd30] sm:$0xff] }
 0x4df   : > { %v2338_v47 = vpack.c.bf16 %v3876_v44, %v3875_v11  ;;  %v3938_v11 = vld [vmem:[%s4937_s23 + $0xf28] sm:$0xff]  ;;  %v3951_v44 = vld [vmem:[%s4937_s23 + $0xf90] sm:$0xff] }
 0x4e1   : > { %4381 = vmatpush3.bf16.msra.mxu0 %v2307_v49  ;;  %v2345_v49 = vpack.c.bf16 %v3890_v18, %v3889_v14  ;;  %v3952_v14 = vld [vmem:[%s4937_s23 + $0xf98] sm:$0xff] }
 0x4e2   : > { %4382 = vmatprep.subr.bf16.mxu0 %v2314_v63  ;;  %v3873_v63 = vld [vmem:[%s4937_s23 + $0xd20] sm:$0xff] }
 0x4e3   : > { %v2337_v48 = vpack.c.bf16 %v3874_v17, %v3873_v63  ;;  %v3936_v63 = vld [vmem:[%s4937_s23 + $0xf18] sm:$0xff]  ;;  %v3949_v17 = vld [vmem:[%s4937_s23 + $0xf80] sm:$0xff] }
 0x4e5   : > { %4383 = vmatpush3.bf16.msra.mxu0 %v2306_v16  ;;  %v2344_v16 = vpack.c.bf16 %v3888_v58, %v3887_v45  ;;  %v3950_v45 = vld [vmem:[%s4937_s23 + $0xf88] sm:$0xff] }
 0x4e6   : > { %4384 = vmatprep.subr.bf16.mxu0 %v2313_v30  ;;  %v3871_v30 = vld [vmem:[%s4937_s23 + $0xd10] sm:$0xff] }
 0x4e7   : > { %v2336_v20 = vpack.c.bf16 %v3872_v34, %v3871_v30  ;;  %v3934_v30 = vld [vmem:[%s4937_s23 + $0xf08] sm:$0xff] }
 0x4e9   : > { %4385 = vmatpush3.bf16.msra.mxu0 %v2305_v55  ;;  %v2343_v55 = vpack.c.bf16 %v3886_v50, %v3885_v27  ;;  %v2406_v27 = vld [vmem:[%s6159_s1 + $0xb8] sm:$0xff] }
 0x4ea   : > { %4386 = vmatprep.subr.bf16.mxu0 %v2312_v10  ;;  %v3869_v10 = vld [vmem:[%s4937_s23 + $0xd00] sm:$0xff]  ;;  %v2414_v50 = vld [vmem:[%s6159_s1 + $0xf8] sm:$0xff] }
 0x4eb   : > { %v2335_v53 = vpack.c.bf16 %v3870_v15, %v3869_v10  ;;  %v3995_v10 = vcombine.low %v2406_v27, %v2414_v50  ;;  %v5951_v15 = vpop.permute.xlu1 %2436 }
 0x4ed   : > { %4387 = vmatpush3.bf16.msra.mxu0 %v2304_v32  ;;  %v3947_v32 = vld [vmem:[%s4937_s23 + $0xf70] sm:$0xff] }
 0x4ee   : > { %4388 = vmatprep.subr.bf16.mxu0 %v2311_v51  ;;  %v2382_v51 = vpack.c.bf16 %v3964_v46, %v3963_v41  ;;  %v5955_v46 = vpop.permute.xlu0 %2431 }
 0x4ef   : > { %v5953_v41 = vpop.permute.xlu1 %2426 }
 0x4f1   : > { %4389 = vmatpush3.bf16.msra.mxu0 %v2303_v61  ;;  %v3962_v61 = vld [vmem:[%s4937_s23 + $0xfe8] sm:$0xff] }
 0x4f2   : > { %4430 = vmatprep.subr.bf16.mxu0 %v2350_v19  ;;  %v2374_v19 = vpack.c.bf16 %v3948_v28, %v3947_v32  ;;  %v2381_v35 = vpack.c.bf16 %v3962_v61, %v3961_v59  ;;  %v5959_v32 = vpop.permute.xlu0 %2421 }
 0x4f4   : > { %2779 = vmatmul.mubr.bf16.vlgmr.msra.gmra.mxu0 %v3971_v29  ;;  %v3960_v29 = vld [vmem:[%s4937_s23 + $0xfd8] sm:$0xff] }
 0x4f5   : > { %4431 = vmatpush3.bf16.msra.mxu0 %v2342_v37  ;;  %2786 = vmatprep.mubr.bf16.mxu0 %v3988_v56  ;;  %v2373_v37 = vpack.c.bf16 %v3946_v5, %v3945_v0  ;;  %v3943_v56 = vld [vmem:[%s4937_s23 + $0xf50] sm:$0xff] }
 0x4f6   : > { %4432 = vmatprep.subr.bf16.mxu0 %v2349_v52  ;;  %v2380_v52 = vpack.c.bf16 %v3960_v29, %v3959_v25  ;;  %v5963_v28 = vpop.permute.xlu0 %3015 }
 0x4f7   : > { %6184 = vst [vmem:[#allocation8_spill] sm:$0xff] %v5963_v28 }
 0x4f9   : > { %4433 = vmatpush3.bf16.msra.mxu0 %v2341_v21  ;;  %v3958_v21 = vld [vmem:[%s4937_s23 + $0xfc8] sm:$0xff] }
 0x4fa   : > { %4434 = vmatprep.subr.bf16.mxu0 %v2348_v3  ;;  %v2372_v3 = vpack.c.bf16 %v3944_v31, %v3943_v56  ;;  %v2379_v26 = vpack.c.bf16 %v3958_v21, %v3957_v12  ;;  %v5967_v62 = vpop.permute.xlu0 %3005 }
 0x4fb   : > { %6186 = vst [vmem:[#allocation10_spill] sm:$0xff] %v5967_v62 }
 0x4fc   : > { %2787 = vmatmul.mubr.bf16.gmra.mxu0 %v3987_v43  ;;  %v3956_v43 = vld [vmem:[%s4937_s23 + $0xfb8] sm:$0xff] }
 0x4fd   : > { %4435 = vmatpush3.bf16.msra.mxu0 %v2340_v7  ;;  %2876 = vmatprep.mubr.bf16.mxu0 %v3976_v39  ;;  %v2371_v7 = vpack.c.bf16 %v3942_v40, %v3941_v33  ;;  %v2378_v39 = vpack.c.bf16 %v3956_v43, %v3955_v42 }
 0x4fe   : > { %4436 = vmatprep.subr.bf16.mxu0 %v2347_v6  ;;  %v3939_v6 = vld [vmem:[%s4937_s23 + $0xf30] sm:$0xff]  ;;  %v5971_v61 = vpop.permute.xlu0 %3152 }
 0x4ff   : > { %v2370_v23 = vpack.c.bf16 %v3940_v38, %v3939_v6  ;;  %6188 = vst [vmem:[#allocation12_spill] sm:$0xff] %v5971_v61 }
 0x501   : > { %4437 = vmatpush3.bf16.msra.mxu0 %v2339_v36  ;;  %v2377_v36 = vpack.c.bf16 %v3954_v24, %v3953_v2 }
 0x502   : > { %4438 = vmatprep.subr.bf16.mxu0 %v2346_v4  ;;  %v3937_v4 = vld [vmem:[%s4937_s23 + $0xf20] sm:$0xff] }
 0x503   : > { %v2369_v18 = vpack.c.bf16 %v3938_v11, %v3937_v4 }
 0x505   : > { %4439 = vmatpush3.bf16.msra.mxu0 %v2338_v47  ;;  %v2376_v47 = vpack.c.bf16 %v3952_v14, %v3951_v44 }
 0x506   : > { %4440 = vmatprep.subr.bf16.mxu0 %v2345_v49  ;;  %v3935_v49 = vld [vmem:[%s4937_s23 + $0xf10] sm:$0xff] }
 0x507   : > { %v2368_v58 = vpack.c.bf16 %v3936_v63, %v3935_v49 }
 0x509   : > { %4441 = vmatpush3.bf16.msra.mxu0 %v2337_v48  ;;  %v2375_v48 = vpack.c.bf16 %v3950_v45, %v3949_v17 }
 0x50a   : > { %4442 = vmatprep.subr.bf16.mxu0 %v2344_v16  ;;  %v3933_v16 = vld [vmem:[%s4937_s23 + $0xf00] sm:$0xff]  ;;  %s3652_s23 = sshll.u32 %s417_s15, 5 }
 0x50b   : > { %v2367_v34 = vpack.c.bf16 %v3934_v30, %v3933_v16  ;;  %s5983_s28 = scalar_lea.vmem [#allocation2], %s3652_s23 }
 0x50d   : > { %4443 = vmatpush3.bf16.msra.mxu0 %v2336_v20  ;;  %v3979_v20 = vcombine.low %v2390_v54, %v2398_v57  ;;  %v2995_v57 = vld [vmem:[%s6161_s3] sm:$0xff] }
 0x50e   : > { %4444 = vmatprep.subr.bf16.mxu0 %v2343_v55  ;;  %v3996_v55 = vcombine.high %v2406_v27, %v2414_v50  ;;  %4601 = vmatprep.mubr.msk.f32.mxu1 %vm1471_vm0, %v2995_v57 }
 0x511   : > { %4445 = vmatpush3.bf16.msra.mxu0 %v2335_v53  ;;  %v5957_v53 = vpop.permute.xlu1 %3020 }
 0x512   : > { %4486 = vmatprep.subr.bf16.mxu0 %v2382_v51  ;;  %6182 = vst [vmem:[#allocation6_spill] sm:$0xff] %v5957_v53 }
 0x514   : > { %2877 = vmatmul.mubr.bf16.vlgmr.msra.gmra.mxu0 %v3975_v1 }
 0x515   : > { %4487 = vmatpush3.bf16.msra.mxu0 %v2374_v19  ;;  %2884 = vmatprep.mubr.bf16.mxu0 %v3992_v22  ;;  %v5961_v51 = vpop.permute.xlu1 %3010  ;;  %v5975_v19 = vpop.permute.xlu0 %3142 }
 0x516   : > { %4488 = vmatprep.subr.bf16.mxu0 %v2381_v35  ;;  %6183 = vst [vmem:[#allocation7_spill] sm:$0xff] %v5961_v51  ;;  %6190 = vst [vmem:[#allocation14_spill] sm:$0xff] %v5975_v19 }
 0x519   : > { %4489 = vmatpush3.bf16.msra.mxu0 %v2373_v37  ;;  %v5965_v60 = vpop.permute.xlu1 %3157  ;;  %v5979_v35 = vpop.permute.xlu0 %3275 }
 0x51a   : > { %4490 = vmatprep.subr.bf16.mxu0 %v2380_v52  ;;  %6185 = vst [vmem:[#allocation9_spill] sm:$0xff] %v5965_v60  ;;  %6192 = vst [vmem:[#allocation16_spill] sm:$0xff] %v5979_v35  ;;  %v4306_v52 = vpop.f32.mrf.mxu1 }
 0x51c   : > { %2885 = vmatmul.mubr.bf16.gmra.mxu0 %v3991_v8  ;;  %v4307_v31 = vpop.f32.mrf.mxu1 }
 0x51d   : > { %4491 = vmatpush3.bf16.msra.mxu0 %v2372_v3  ;;  %2974 = vmatprep.mubr.bf16.mxu0 %v3980_v13  ;;  %v5969_v59 = vpop.permute.xlu1 %3147  ;;  %v1906_v29 = vpop.permute.xlu0 %1905  ;;  %v4308_v28 = vadd.f32 %v4307_v31, %v4306_v52 }
 0x51e   : > { %4492 = vmatprep.subr.bf16.mxu0 %v2379_v26  ;;  %6187 = vst [vmem:[#allocation11_spill] sm:$0xff] %v5969_v59  ;;  %v4309_v54 = vpop.f32.mrf.mxu1 }
 0x520   : > { %v4310_v12 = vpop.f32.mrf.mxu1 }
 0x521   : > { %4493 = vmatpush3.bf16.msra.mxu0 %v2371_v7  ;;  %v5973_v1 = vpop.permute.xlu1 %3280  ;;  %v4311_v61 = vadd.f32 %v4310_v12, %v4309_v54  ;;  %v2634_v54 = vadd.f32 %v4308_v28, %v5959_v32 }
 0x522   : > { %4494 = vmatprep.subr.bf16.mxu0 %v2378_v39  ;;  %6189 = vst [vmem:[#allocation13_spill] sm:$0xff] %v5973_v1  ;;  %v4312_v21 = vpop.f32.mrf.mxu1 }
 0x524   : > { %v4313_v8 = vpop.f32.mrf.mxu1 }
 0x525   : > { %4495 = vmatpush3.bf16.msra.mxu0 %v2370_v23  ;;  %v5977_v22 = vpop.permute.xlu1 %3370  ;;  %v4314_v35 = vadd.f32 %v4313_v8, %v4312_v21 }
 0x526   : > { %4496 = vmatprep.subr.bf16.mxu0 %v2377_v36  ;;  %6191 = vst [vmem:[#allocation15_spill] sm:$0xff] %v5977_v22  ;;  %v4315_v13 = vpop.f32.mrf.mxu1 }
 0x527   : > { %v2642_v53 = vadd.f32 %v4314_v35, %v5955_v46 }
 0x528   : > { %v4316_v33 = vpop.f32.mrf.mxu1 }
 0x529   : > { %4497 = vmatpush3.bf16.msra.mxu0 %v2369_v18  ;;  %v1911_v0 = vpop.permute.xlu1 %1910  ;;  %v4317_v1 = vadd.f32 %v4316_v33, %v4315_v13 }
 0x52a   : > { %4498 = vmatprep.subr.bf16.mxu0 %v2376_v47  ;;  %v5993_v42 = vpop.f32.mrf.mxu1 }
 0x52b   : > { %v2645_v51 = vadd.f32 %v4317_v1, %v5951_v15 }
 0x52c   : > { %v5995_v7 = vpop.f32.mrf.mxu1 }
 0x52d   : > { %4499 = vmatpush3.bf16.msra.mxu0 %v2368_v58  ;;  %v4364_v15 = vadd.f32 %v5995_v7, %v5993_v42 }
 0x52e   : > { %4500 = vmatprep.subr.bf16.mxu0 %v2375_v48  ;;  %v4365_v6 = vpop.f32.mrf.mxu1 }
 0x530   : > { %v4366_v2 = vpop.f32.mrf.mxu1 }
 0x531   : > { %4501 = vmatpush3.bf16.msra.mxu0 %v2367_v34  ;;  %v4367_v52 = vadd.f32 %v4366_v2, %v4365_v6 }
 0x532   : > { %v4368_v23 = vpop.f32.mrf.mxu1 }
 0x534   : > { %2975 = vmatmul.mubr.bf16.vlgmr.msra.gmra.mxu0 %v3979_v20  ;;  %v4369_v4 = vpop.f32.mrf.mxu1 }
 0x535   : > { %2982 = vmatprep.mubr.bf16.mxu0 %v3996_v55 }
 0x536   : > { %v4371_v44 = vpop.f32.mrf.mxu1 }
 0x538   : > { %v4372_v18 = vpop.f32.mrf.mxu1 }
 0x539   : > { %v4373_v21 = vadd.f32 %v4372_v18, %v4371_v44 }
 0x53a   : > { %v5997_v49 = vpop.f32.mrf.mxu1 }
 0x53b   : > { %6193 = vst [vmem:[#allocation17_spill] sm:$0xff] %v5997_v49  ;;  %v4370_v49 = vadd.f32 %v4369_v4, %v4368_v23 }
 0x53c   : > { %2983 = vmatmul.mubr.bf16.gmra.mxu0 %v3995_v10  ;;  %v5999_v17 = vpop.f32.mrf.mxu1 }
 0x53d   : > { %6194 = vst [vmem:[#allocation18_spill] sm:$0xff] %v5999_v17 }
 0x53e   : > { %v4421_v58 = vpop.f32.mrf.mxu1 }
 0x540   : > { %v4422_v16 = vpop.f32.mrf.mxu1 }
 0x541   : > { %v4423_v6 = vadd.f32 %v4422_v16, %v4421_v58 }
 0x542   : > { %v4424_v34 = vpop.f32.mrf.mxu1  ;;  %v6200_v42 = vld [vmem:[#allocation17_spill] sm:$0xff] }
 0x544   : > { %v4425_v50 = vpop.f32.mrf.mxu1  ;;  %v6201_v7 = vld [vmem:[#allocation18_spill] sm:$0xff] }
 0x545   : > { %v4420_v23 = vadd.f32 %v6201_v7, %v6200_v42 }
 0x546   : > { %v4427_v55 = vpop.f32.mrf.mxu1 }
 0x574   : > { %v4592_v5 = vpop.f32.mrf.mxu0 }
 0x575   : > { %v1992_v25 = vadd.f32 %v4592_v5, %v1911_v0  ;;  %v4428_v0 = vpop.f32.mrf.mxu1 }
 0x576   : > { %v1986_v37 = vpop.f32.mrf.mxu0 }
 0x577   : > { %1997 = vst.msk [vmem:[%s5983_s28 + $0x8] sm:$0xff] %vm1995_vm12, %v1992_v25  ;;  %v1987_v56 = vadd.f32 %v1986_v37, %v1906_v29  ;;  %v6003_v25 = vpop.f32.mrf.mxu1 }
 0x578   : > { %6196 = vst [vmem:[#allocation20_spill] sm:$0xff] %v6003_v25 }
 0x579   : > { %1996 = vst.msk [vmem:[%s5983_s28] sm:$0xff] %vm1995_vm12, %v1987_v56  ;;  %v6005_v37 = vpop.f32.mrf.mxu1 }
 0x57a   : > { %6197 = vst [vmem:[#allocation21_spill] sm:$0xff] %v6005_v37  ;;  %v2637_v37 = vadd.f32 %v4311_v61, %v5953_v41 }
 0x57b   : > { %v6007_v57 = vpop.f32.mrf.mxu1 }
 0x57c   : > { %6198 = vst [vmem:[#allocation22_spill] sm:$0xff] %v6007_v57 }
 0x57d   : > { %v6009_v22 = vpop.f32.mrf.mxu1 }
 0x57e   : > { %6199 = vst [vmem:[#allocation23_spill] sm:$0xff] %v6009_v22 }
 0x57f   : > { %v4480_v62 = vpop.f32.mrf.mxu1 }
 0x581   : > { %v4481_v12 = vpop.f32.mrf.mxu1 }
 0x583   : > { %v6203_v16 = vld [vmem:[#allocation22_spill] sm:$0xff] }
 0x594   : > { %v4334_v3 = vpop.f32.mrf.mxu0 }
 0x596   : > { %v4335_v26 = vpop.f32.mrf.mxu0 }
 0x598   : > { %v4337_v40 = vpop.f32.mrf.mxu0 }
 0x59a   : > { %v4338_v43 = vpop.f32.mrf.mxu0 }
 0x59b   : > { %v4339_v25 = vadd.f32 %v4338_v43, %v4337_v40 }
 0x59c   : > { %v4340_v39 = vpop.f32.mrf.mxu0 }
 0x59d   : > { %v2686_v13 = vadd.f32 %v4339_v25, %v2637_v37 }
 0x59e   : > { %v4341_v38 = vpop.f32.mrf.mxu0 }
 0x59f   : > { %v4342_v60 = vadd.f32 %v4341_v38, %v4340_v39 }
 0x5a0   : > { %v4343_v24 = vpop.f32.mrf.mxu0 }
 0x5a1   : > { %v2691_v17 = vadd.f32 %v4342_v60, %v2642_v53  ;;  %v4426_v60 = vadd.f32 %v4425_v50, %v4424_v34 }
 0x5a2   : > { %v4344_v36 = vpop.f32.mrf.mxu0 }
 0x5a3   : > { %v4345_v59 = vadd.f32 %v4344_v36, %v4343_v24  ;;  %v2740_v41 = vadd.f32 %v4370_v49, %v2691_v17 }
 0x5a5   : > { %v2694_v22 = vadd.f32 %v4345_v59, %v2645_v51  ;;  %v4483_v51 = vpop.f32.mrf.mxu1 }
 0x5a7   : > { %v2743_v61 = vadd.f32 %v4373_v21, %v2694_v22  ;;  %v4484_v22 = vpop.f32.mrf.mxu1 }
 0x5b4   : > { %v4390_v11 = vpop.f32.mrf.mxu0 }
 0x5b6   : > { %v4391_v14 = vpop.f32.mrf.mxu0 }
 0x5b7   : > { %v4392_v53 = vadd.f32 %v4391_v14, %v4390_v11 }
 0x5b8   : > { %v4393_v47 = vpop.f32.mrf.mxu0 }
 0x5ba   : > { %v4394_v63 = vpop.f32.mrf.mxu0 }
 0x5bb   : > { %v4395_v35 = vadd.f32 %v4394_v63, %v4393_v47  ;;  %v4482_v47 = vadd.f32 %v4481_v12, %v4480_v62 }
 0x5bc   : > { %v4396_v45 = vpop.f32.mrf.mxu0 }
 0x5be   : > { %v4397_v48 = vpop.f32.mrf.mxu0 }
 0x5bf   : > { %v4398_v31 = vadd.f32 %v4397_v48, %v4396_v45  ;;  %v4485_v48 = vadd.f32 %v4484_v22, %v4483_v51  ;;  %v4002_v22 = vld [vmem:[%s6161_s3 + $0x28] sm:$0xff] }
 0x5c0   : > { %v4399_v30 = vpop.f32.mrf.mxu0 }
 0x5c1   : > { %v2789_v32 = vadd.f32 %v4398_v31, %v2740_v41  ;;  %v4001_v41 = vld [vmem:[%s6161_s3 + $0x20] sm:$0xff] }
 0x5c2   : > { %v4400_v27 = vpop.f32.mrf.mxu0  ;;  %4615 = vmatprep.mubr.msk.f32.mxu0 %vm1471_vm0, %v4001_v41 }
 0x5c3   : > { %v4401_v33 = vadd.f32 %v4400_v27, %v4399_v30  ;;  %v2838_v4 = vadd.f32 %v4426_v60, %v2789_v32  ;;  %v6204_v30 = vld [vmem:[#allocation23_spill] sm:$0xff] }
 0x5c4   : > { %v4479_v34 = vadd.f32 %v6204_v30, %v6203_v16  ;;  %v6207_v60 = vld [vmem:[#allocation7_spill] sm:$0xff]  ;;  %v6215_v16 = vld [vmem:[#allocation12_spill] sm:$0xff] }
 0x5c5   : > { %v2792_v28 = vadd.f32 %v4401_v33, %v2743_v61 }
 0x5d4   : > { %v6001_v20 = vpop.f32.mrf.mxu0 }
 0x5d5   : > { %6195 = vst [vmem:[#allocation19_spill] sm:$0xff] %v6001_v20  ;;  %v4336_v20 = vadd.f32 %v4335_v26, %v4334_v3  ;;  %v2735_v3 = vadd.f32 %v4367_v52, %v2686_v13  ;;  %v4429_v26 = vadd.f32 %v4428_v0, %v4427_v55  ;;  %v6206_v55 = vld [vmem:[#allocation21_spill] sm:$0xff] }
 0x5d6   : > { %v4447_v10 = vpop.f32.mrf.mxu0 }
 0x5d7   : > { %v2683_v46 = vadd.f32 %v4336_v20, %v2634_v54  ;;  %v2784_v39 = vadd.f32 %v4395_v35, %v2735_v3  ;;  %v2841_v11 = vadd.f32 %v4429_v26, %v2792_v28  ;;  %v6205_v20 = vld [vmem:[#allocation20_spill] sm:$0xff]  ;;  %v6209_v28 = vld [vmem:[#allocation10_spill] sm:$0xff] }
 0x5d8   : > { %v4449_v5 = vpop.f32.mrf.mxu0  ;;  %v4476_v0 = vadd.f32 %v6206_v55, %v6205_v20 }
 0x5d9   : > { %v2732_v40 = vadd.f32 %v4364_v15, %v2683_v46  ;;  %v2833_v63 = vadd.f32 %v4423_v6, %v2784_v39  ;;  %v2996_v15 = vld [vmem:[%s6161_s3 + $0x8] sm:$0xff] }
 0x5da   : > { %v4450_v29 = vpop.f32.mrf.mxu0 }
 0x5db   : > { %v2781_v24 = vadd.f32 %v4392_v53, %v2732_v40  ;;  %v4451_v44 = vadd.f32 %v4450_v29, %v4449_v5 }
 0x5dc   : > { %v4452_v56 = vpop.f32.mrf.mxu0  ;;  %v6202_v14 = vld [vmem:[#allocation19_spill] sm:$0xff] }
 0x5dd   : > { %v4448_v18 = vadd.f32 %v4447_v10, %v6202_v14  ;;  %v2830_v58 = vadd.f32 %v4420_v23, %v2781_v24 }
 0x5de   : > { %v4453_v9 = vpop.f32.mrf.mxu0 }
 0x5df   : > { %v4454_v38 = vadd.f32 %v4453_v9, %v4452_v56  ;;  %v2879_v50 = vadd.f32 %v4448_v18, %v2830_v58  ;;  %v6214_v58 = vld [vmem:[#allocation14_spill] sm:$0xff] }
 0x5e0   : > { %v4455_v19 = vpop.f32.mrf.mxu0 }
 0x5e1   : > { %v2887_v17 = vadd.f32 %v4454_v38, %v2838_v4  ;;  %v2928_v54 = vadd.f32 %v4476_v0, %v2879_v50  ;;  %v6211_v4 = vmov 0.0  }
 0x5e2   : > { %v4456_v57 = vpop.f32.mrf.mxu0 }
 0x5e3   : > { %v4457_v2 = vadd.f32 %v4456_v57, %v4455_v19  ;;  %v2882_v19 = vadd.f32 %v4451_v44, %v2833_v63  ;;  %v2936_v25 = vadd.f32 %v4482_v47, %v2887_v17  ;;  %v3269_v44 = vld [vmem:[%s6163_s5] sm:$0xff]  ;;  %v6213_v17 = vld [vmem:[#allocation9_spill] sm:$0xff] }
 0x5e5   : > { %v2890_v45 = vadd.f32 %v4457_v2, %v2841_v11  ;;  %v2931_v37 = vadd.f32 %v4479_v34, %v2882_v19  ;;  %v4004_v11 = vld [vmem:[%s6161_s3 + $0x38] sm:$0xff] }
 0x5e7   : > { %v2939_v10 = vadd.f32 %v4485_v48, %v2890_v45 }
 0x5f4   : > { %v4502_v8 = vpop.f32.mrf.mxu0 }
 0x5f6   : > { %v4503_v1 = vpop.f32.mrf.mxu0 }
 0x5f7   : > { %v4504_v56 = vadd.f32 %v4503_v1, %v4502_v8  ;;  %v2997_v8 = vld [vmem:[%s6161_s3 + $0x10] sm:$0xff]  ;;  %v2998_v1 = vld [vmem:[%s6161_s3 + $0x18] sm:$0xff] }
 0x5f8   : > { %v4505_v59 = vpop.f32.mrf.mxu0 }
 0x5f9   : > { %v2977_v52 = vadd.f32 %v4504_v56, %v2928_v54 }
 0x5fa   : > { %v4506_v43 = vpop.f32.mrf.mxu0 }
 0x5fb   : > { %v4507_v62 = vadd.f32 %v4506_v43, %v4505_v59  ;;  %v2991_v46 = vmax.f32 %v2977_v52, 0.0  ;;  %v6208_v59 = vld [vmem:[#allocation6_spill] sm:$0xff]  ;;  %v6210_v43 = vld [vmem:[#allocation8_spill] sm:$0xff] }
 0x5fc   : > { %v4508_v36 = vpop.f32.mrf.mxu0 }
 0x5fd   : > { %v2980_v12 = vadd.f32 %v4507_v62, %v2931_v37  ;;  %v6216_v62 = vld [vmem:[#allocation13_spill] sm:$0xff] }
 0x5fe   : > { %v4509_v49 = vpop.f32.mrf.mxu0 }
 0x5ff   : > { %v4510_v27 = vadd.f32 %v4509_v49, %v4508_v36  ;;  %v2992_v33 = vmax.f32 %v2980_v12, 0.0  ;;  %v4003_v36 = vld [vmem:[%s6161_s3 + $0x30] sm:$0xff]  ;;  %v6212_v49 = vld [vmem:[#allocation11_spill] sm:$0xff]  ;;  %v3366_v12 = vld [vmem:[%s6165_s7] sm:$0xff] }
 0x600   : > { %v4511_v9 = vpop.f32.mrf.mxu0 }
 0x601   : > { %v2985_v57 = vadd.f32 %v4510_v27, %v2936_v25  ;;  %v3270_v25 = vld [vmem:[%s6163_s5 + $0x8] sm:$0xff] }
 0x602   : > { %v4512_v5 = vpop.f32.mrf.mxu0 }
 0x603   : > { %v4513_v29 = vadd.f32 %v4512_v5, %v4511_v9  ;;  %v2993_v31 = vmax.f32 %v2985_v57, 0.0  ;;  %v6217_v57 = vld [vmem:[#allocation16_spill] sm:$0xff] }
 0x605   : > { %v2988_v21 = vadd.f32 %v4513_v29, %v2939_v10 }
 0x607   : > { %v2994_v13 = vmax.f32 %v2988_v21, 0.0 }
 0x609   : > { %4593 = vmatprep.subr.mxu1 %v2994_v13 }
 0x60a   : > { %4594 = vmatpush3.msra.mxu1 %v2994_v13  ;;  %v3447_v13 = vld [vmem:[%s6167_s9] sm:$0xff] }
 0x60b   : > { %4595 = vmatprep.subr.mxu1 %v2993_v31 }
 0x60c   : > { %4596 = vmatpush3.msra.mxu1 %v2993_v31  ;;  %v6218_v31 = vld [vmem:[#allocation15_spill] sm:$0xff] }
 0x60d   : > { %4597 = vmatprep.subr.mxu1 %v2992_v33 }
 0x60e   : > { %4598 = vmatpush3.msra.mxu1 %v2992_v33 }
 0x60f   : > { %4599 = vmatprep.subr.mxu1 %v2991_v46 }
 0x610   : > { %4600 = vmatpush3.msra.mxu1 %v2991_v46 }
 0x611   : > { %4602 = vmatmul.mubr.msk.f32.vlgmr.msra.gmra.mxu1 %vm1471_vm0, %v2996_v15 }
 0x612   : > { %4604 = vmatprep.mubr.msk.f32.mxu1 %vm1471_vm0, %v2997_v8  ;;  %v3448_v8 = vld [vmem:[%s6167_s9 + $0x8] sm:$0xff] }
 0x615   : > { %4605 = vmatmul.mubr.msk.f32.gmra.mxu1 %vm1471_vm0, %v2998_v1  ;;  %v3459_v1 = vpop.permute.xlu1 %3458 }
 0x616   : > { %4629 = vmatprep.mubr.msk.f32.mxu1 %vm1471_vm0, %v3269_v44 }
 0x6d1   : > { %v4603_v61 = vpop.f32.mrf.mxu1 }
 0x6d2   : > { %v3107_v51 = vadd.f32 %v4603_v61, %v6207_v60 }
 0x6d3   : > { %v3101_v35 = vpop.f32.mrf.mxu1 }
 0x6d4   : > { %v3102_v26 = vadd.f32 %v3101_v35, %v6209_v28  ;;  %v3125_v6 = vmul.f32 0.01, %v3107_v51  ;;  %vm3121_vm15 = vcmp.gt.f32.partialorder %v3107_v51, 0.0  ;;  %v3454_v35 = vpop.permute.xlu0 %3453 }
 0x6d5   : > { %v4606_v53 = vpop.f32.mrf.mxu1 }
 0x6d6   : > { %v3117_v3 = vadd.f32 %v4606_v53, %v6208_v59  ;;  %v3124_v24 = vmul.f32 0.01, %v3102_v26  ;;  %vm3120_vm1 = vcmp.gt.f32.partialorder %v3102_v26, 0.0  ;;  %v3129_v7 = vsel %vm3121_vm15, %v3107_v51, %v3125_v6 }
 0x6d7   : > { %v3111_v32 = vpop.f32.mrf.mxu1 }
 0x6d8   : > { %v3127_v40 = vmul.f32 0.01, %v3117_v3  ;;  %v3112_v39 = vadd.f32 %v3111_v32, %v6210_v43  ;;  %vm3123_vm13 = vcmp.gt.f32.partialorder %v3117_v3, 0.0  ;;  %v3128_v23 = vsel %vm3120_vm1, %v3102_v26, %v3124_v24 }
 0x6da   : > { %v3126_v38 = vmul.f32 0.01, %v3112_v39  ;;  %v3131_v2 = vsel %vm3123_vm13, %v3117_v3, %v3127_v40  ;;  %vm3122_vm14 = vcmp.gt.f32.partialorder %v3112_v39, 0.0 }
 0x6db   : > { %4607 = vmatprep.subr.mxu0 %v3131_v2 }
 0x6dc   : > { %4608 = vmatpush3.msra.mxu0 %v3131_v2  ;;  %v3130_v42 = vsel %vm3122_vm14, %v3112_v39, %v3126_v38 }
 0x6dd   : > { %4609 = vmatprep.subr.mxu0 %v3130_v42 }
 0x6de   : > { %4610 = vmatpush3.msra.mxu0 %v3130_v42 }
 0x6df   : > { %4611 = vmatprep.subr.mxu0 %v3129_v7 }
 0x6e0   : > { %4612 = vmatpush3.msra.mxu0 %v3129_v7 }
 0x6e1   : > { %4613 = vmatprep.subr.mxu0 %v3128_v23 }
 0x6e2   : > { %4614 = vmatpush3.msra.mxu0 %v3128_v23 }
 0x6e3   : > { %4616 = vmatmul.mubr.msk.f32.vlgmr.msra.gmra.mxu0 %vm1471_vm0, %v4002_v22  ;;  %4632 = vmatprep.subr.mxu0 %v6211_v4 }
 0x6e4   : > { %4618 = vmatprep.mubr.msk.f32.mxu0 %vm1471_vm0, %v4003_v36 }
 0x6e7   : > { %4619 = vmatmul.mubr.msk.f32.gmra.mxu0 %vm1471_vm0, %v4004_v11 }
 0x6e8   : > { %4636 = vmatprep.mubr.msk.f32.mxu0 %vm4786_vm9, %v6211_v4 }
 0x7a3   : > { %v4617_v14 = vpop.f32.mrf.mxu0 }
 0x7a4   : > { %v3244_v63 = vadd.f32 %v4617_v14, %v6212_v49 }
 0x7a5   : > { %v3238_v18 = vpop.f32.mrf.mxu0 }
 0x7a6   : > { %v3239_v9 = vadd.f32 %v3238_v18, %v6214_v58  ;;  %v3262_v34 = vmul.f32 0.01, %v3244_v63  ;;  %vm3258_vm4 = vcmp.gt.f32.partialorder %v3244_v63, 0.0 }
 0x7a7   : > { %v4620_v47 = vpop.f32.mrf.mxu0 }
 0x7a8   : > { %v3254_v45 = vadd.f32 %v4620_v47, %v6213_v17  ;;  %v3261_v20 = vmul.f32 0.01, %v3239_v9  ;;  %vm3257_vm5 = vcmp.gt.f32.partialorder %v3239_v9, 0.0  ;;  %v3266_v0 = vsel %vm3258_vm4, %v3244_v63, %v3262_v34 }
 0x7a9   : > { %v3248_v48 = vpop.f32.mrf.mxu0 }
 0x7aa   : > { %v3264_v19 = vmul.f32 0.01, %v3254_v45  ;;  %v3249_v30 = vadd.f32 %v3248_v48, %v6215_v16  ;;  %vm3260_vm2 = vcmp.gt.f32.partialorder %v3254_v45, 0.0  ;;  %v3265_v5 = vsel %vm3257_vm5, %v3239_v9, %v3261_v20 }
 0x7ac   : > { %v3263_v27 = vmul.f32 0.01, %v3249_v30  ;;  %v3268_v50 = vsel %vm3260_vm2, %v3254_v45, %v3264_v19  ;;  %vm3259_vm3 = vcmp.gt.f32.partialorder %v3249_v30, 0.0 }
 0x7ad   : > { %4621 = vmatprep.subr.mxu1 %v3268_v50 }
 0x7ae   : > { %4622 = vmatpush3.msra.mxu1 %v3268_v50  ;;  %v3267_v55 = vsel %vm3259_vm3, %v3249_v30, %v3263_v27 }
 0x7af   : > { %4623 = vmatprep.subr.mxu1 %v3267_v55 }
 0x7b0   : > { %4624 = vmatpush3.msra.mxu1 %v3267_v55 }
 0x7b1   : > { %4625 = vmatprep.subr.mxu1 %v3266_v0 }
 0x7b2   : > { %4626 = vmatpush3.msra.mxu1 %v3266_v0 }
 0x7b3   : > { %4627 = vmatprep.subr.mxu1 %v3265_v5 }
 0x7b4   : > { %4628 = vmatpush3.msra.mxu1 %v3265_v5 }
 0x7b5   : > { %4630 = vmatmul.mubr.msk.f32.vlgmr.msra.gmra.mxu1 %vm1471_vm0, %v3270_v25 }
 0x7b6   : > { %4641 = vmatprep.mubr.msk.f32.mxu1 %vm1913_vm11, %v3447_v13 }
 0x875   : > { %v4631_v10 = vpop.f32.mrf.mxu1 }
 0x876   : > { %v3361_v29 = vadd.f32 %v4631_v10, %v6216_v62 }
 0x877   : > { %v3355_v37 = vpop.f32.mrf.mxu1 }
 0x878   : > { %v3365_v56 = vmax.f32 %v3361_v29, 0.0  ;;  %v3356_v21 = vadd.f32 %v3355_v37, %v6217_v57 }
 0x87a   : > { %v3364_v54 = vmax.f32 %v3356_v21, 0.0  ;;  %4633 = vmatpush3.msra.mxu0 %v3365_v56 }
 0x87b   : > { %4634 = vmatprep.subr.mxu0 %v6211_v4 }
 0x87c   : > { %4635 = vmatpush3.msra.mxu0 %v3364_v54 }
 0x87d   : > { %4637 = vmatmul.mubr.msk.f32.vlgmr.msra.gmra.mxu0 %vm1824_vm10, %v3366_v12 }
 0x93d   : > { %v3442_v52 = vpop.f32.mrf.mxu0 }
 0x93e   : > { %v3443_v33 = vadd.f32 %v3442_v52, %v6218_v31 }
 0x93f   : > { %v4638_v46 = vpop.f32.mrf.mxu0 }
 0x940   : > { %v3446_v15 = vmax.f32 %v3443_v33, 0.0 }
 0x942   : > { %4639 = vmatprep.subr.mxu1 %v3446_v15 }
 0x943   : > { %4640 = vmatpush3.msra.mxu1 %v3446_v15 }
 0x944   : > { %4642 = vmatmul.mubr.msk.f32.vlgmr.msra.gmra.mxu1 %vm1913_vm11, %v3448_v8 }
 0xa04   : > { %v4643_v41 = vpop.f32.mrf.mxu1 }
 0xa05   : > { %v3539_v61 = vadd.f32 %v4643_v41, %v3459_v1  ;;  %3552 = sbr.rel (!%p4890_p4) target bundleno = 2597 (0xa25), region = 68 }
 0xa06   : > { %v3533_v53 = vpop.f32.mrf.mxu1 }
 0xa07   : > { %4019 = vst.msk [vmem:[%s5983_s28 + $0x18] sm:$0xff] %vm1995_vm12, %v3539_v61  ;;  %v3534_v60 = vadd.f32 %v3533_v53, %v3454_v35 }
 0xa09   : > { %4018 = vst.msk [vmem:[%s5983_s28 + $0x10] sm:$0xff] %vm1995_vm12, %v3534_v60 }
 0xa0a   : > { %s6228_s16 = smov (!%p3555_p12, %s3554_s16), 2 }
 0xa0b   : > { %s6098_s24 = sshll.u32 %s6228_s16, 8 }
 0xa0c   : > { %s3560_s25 = ssub.s32 512, %s6098_s24 }
 0xa0d   : > { %3561 = vsyncadd %s6093_s0, %s3560_s25  ;;  %p4024_p13 = scmp.ne.s32.totalorder %s6098_s24, 0  ;;  %s4035_s15 = sshll.u32 %s4774_s20, 9 }
 0xa0e   : > { %s6107_s23 = scalar_lea.hbm %s6169_s11, %s4035_s15  ;;  %s3569_s12 = sshll.u32 %s5983_s28, 4  ;;  %s6110_s12 = int_to_ptr.vmem [resolvable:$true] %s3569_s12 }
 0xa0f   : > { %s4706_s13 = scalar_lea.vmem %s6110_s12, %s6098_s24  ;;  %s4787_s14 = smov [#allocation2]  }
 0xa10   : > { %p4707_p0 = scmp.ne.s32.totalorder %s6110_s12, %s4706_s13  ;;  %s4710_s16 = sshll.u32 %s4787_s14, 4  ;;  %s4711_s16 = int_to_ptr.vmem [resolvable:$false] %s4710_s16 }
 0xa11   : > { %s4712_s20 = scalar_lea.vmem %s4711_s16, 1024  ;;  %p4713_p3 = scmp.lt.s32.totalorder %s6110_s12, %s4711_s16 }
 0xa12   : > { %p4708_p1 = pnand %p4707_p0, %p4024_p13  ;;  %p4714_p4 = scmp.lt.s32.totalorder %s4712_s20, %s4706_s13 }
 0xa14   : > { %p4709_p2 = pneg %p4708_p1  ;;  %p4715_p5 = por %p4714_p4, %p4713_p3 }
 0xa16   : > { %p4716_p6 = pnand %p4715_p5, %p4709_p2 }
 0xa18   : > { %4719 = shalt.err (!%p4716_p6)
}
 0xa19   : > { %s4720_s28 = scalar_lea.hbm %s6107_s23, %s6098_s24  ;;  %s4724_s26 = scalar_lea.hbm %s6169_s11, 768 }
 0xa1a   : > { %p4721_p7 = scmp.ne.s32.totalorder %s6107_s23, %s4720_s28  ;;  %p4725_p11 = scmp.lt.s32.totalorder %s6107_s23, %s6169_s11 }
 0xa1b   : > { %p4726_p12 = scmp.lt.s32.totalorder %s4724_s26, %s4720_s28 }
 0xa1c   : > { %p4722_p9 = pnand %p4721_p7, %p4024_p13 }
 0xa1d   : > { %p4727_p0 = por %p4726_p12, %p4725_p11 }
 0xa1e   : > { %p4723_p10 = pneg %p4722_p9 }
 0xa20   : > { %p4728_p1 = pnand %p4727_p0, %p4723_p10 }
 0xa22   : > { %4731 = shalt.err (!%p4728_p1)
}
 0xa23   : > { %s4788_s13 = smov 128   ;;  %s4789_s16 = smov 8  }
 0xa24   : > { %3575 = dma.vmem_to_hbm [thread:$0]  (%p4024_p13), %s6110_s12, %s6098_s24, %s6107_s23, %s6093_s0, %s4788_s13, %s4788_s13, %s4789_s16  }
 0xa25 PF: > { %p4649_p2 = scmp.ge.s32.totalorder %s4782_s22, 2  ;;  %s3584_s20 = sand.u32 1, %s4762_s17  }
 0xa26   : > { %s3585_s28 = scalar_lea.sflag [#allocation3], %s3584_s20 }
 0xa27   : > { %p4646_p3 = pnand %p4649_p2, %p4897_p8 }
 0xa29   : > { %p4647_p4 = pneg %p4646_p3 }
 0xa2b   : > { %4757 = dma.done.wait (%p4647_p4), %s3585_s28, 512  }
 0xa2c   : > { %4759 = vsyncadd (%p4647_p4), %s3585_s28, 4294966784  ;;  %s24_s22 = sadd.s32 1, %s4782_s22   ;;  %s6219_s0 = sld [smem:[#allocation5_spill]] }
 0xa2d   : > { %p21_p5 = scmp.ge.s32.totalorder %s24_s22, 4   ;;  %s6220_s17 = smov %s4766_s18 }
 0xa2e   : > { %s6221_s18 = smov %s4770_s19  ;;  %s6222_s19 = smov %s4903_s30 }
 0xa2f   : > { %s6223_s20 = smov %s4778_s21  ;;  %23 = sbr.rel (!%p21_p5) target bundleno = 6 (0x6), region = 103 }
 0xa32   : > { %s6224_s21 = smov %s6219_s0 }
 0xa34   :  { %3590 = vsyncpa [#allocation3], 1 }
 0xa35   :  { %3592 = vsyncpa [#allocation3 + $0x1], 1 }

</bundles_post_ra>
